<compile_context>
chip_gen: v5e
topology: v5e:2x2
jax: 0.10.0
libtpu: 0.0.40
codegen_flags: <defaults>
</compile_context>

<pallas_src>
import functools
import math

import jax
import jax.numpy as jnp
from jax.experimental import pallas as pl
from jax.experimental.pallas import tpu as pltpu


def _round_up(x, m):
    return (x + m - 1) // m * m


# ---------------------------------------------------------------------------
# Pallas kernels: tap-accumulated matmul with fused shift / residual / ReLU
# ---------------------------------------------------------------------------

def _conv_kernel(a_ref, w_ref, shift_ref, o_ref, acc_ref, *, relu):
    @pl.when(pl.program_id(2) == 0)
    def _():
        acc_ref[...] = jnp.zeros_like(acc_ref)

    acc_ref[...] += jnp.dot(a_ref[...], w_ref[...],
                            preferred_element_type=jnp.float32)

    @pl.when(pl.program_id(2) == pl.num_programs(2) - 1)
    def _():
        out = acc_ref[...] + shift_ref[...]
        if relu:
            out = jnp.maximum(out, 0.0)
        o_ref[...] = out.astype(o_ref.dtype)


def _conv_res_kernel(a_ref, w_ref, shift_ref, res_ref, o_ref, acc_ref, *, relu):
    @pl.when(pl.program_id(2) == 0)
    def _():
        acc_ref[...] = jnp.zeros_like(acc_ref)

    acc_ref[...] += jnp.dot(a_ref[...], w_ref[...],
                            preferred_element_type=jnp.float32)

    @pl.when(pl.program_id(2) == pl.num_programs(2) - 1)
    def _():
        out = acc_ref[...] + shift_ref[...] + res_ref[...].astype(jnp.float32)
        if relu:
            out = jnp.maximum(out, 0.0)
        o_ref[...] = out.astype(o_ref.dtype)


def _row_tiling(m):
    """Pick the largest row tile that divides M (pad only if nothing fits)."""
    for tm in (512, 256, 128):
        if m % tm == 0:
            return tm, m
    if m % 8 == 0 and m <= 1024:
        return m, m                      # single full-M tile
    return 256, _round_up(m, 256)        # generic fallback (pads rows)


def _col_tile(n):
    for tn in (256, 128):
        if n % tn == 0:
            return tn
    return n                             # full-N block (only for tiny channel counts)


def fused_conv_matmul(a3, w3, shift, residual=None, relu=False):
    """rows = maybe_relu( sum_t A3[t] @ W3[t] + shift [+ residual] ).

    a3:       (T, M, K) bf16 activation taps (channels-last rows per tap)
    w3:       (T, K, N) bf16 BN-scale-folded weights
    shift:    (N,)      f32  folded conv bias + BN shift
    residual: (M, N)    bf16 optional fused residual rows
    returns   (M, N)    bf16
    """
    t_, m, k = a3.shape
    n = w3.shape[-1]
    tm, mp = _row_tiling(m)
    tn = _col_tile(n)

    if mp != m:  # only taken for awkward row counts; never in the demo shapes
        a3 = jnp.zeros((t_, mp, k), a3.dtype).at[:, :m, :].set(a3)
        if residual is not None:
            residual = jnp.zeros((mp, n), residual.dtype).at[:m, :].set(residual)

    shift2 = shift.reshape(1, n).astype(jnp.float32)
    grid = (mp // tm, n // tn, t_)

    in_specs = [
        pl.BlockSpec((None, tm, k), lambda i, j, t: (t, i, 0)),   # A tap row-tile
        pl.BlockSpec((None, k, tn), lambda i, j, t: (t, 0, j)),   # W tap col-tile
        pl.BlockSpec((1, tn), lambda i, j, t: (0, j)),            # folded shift
    ]
    args = [a3, w3, shift2]
    if residual is None:
        kernel = functools.partial(_conv_kernel, relu=relu)
    else:
        kernel = functools.partial(_conv_res_kernel, relu=relu)
        in_specs.append(pl.BlockSpec((tm, tn), lambda i, j, t: (i, j)))
        args.append(residual)

    out = pl.pallas_call(
        kernel,
        out_shape=jax.ShapeDtypeStruct((mp, n), jnp.bfloat16),
        grid=grid,
        in_specs=in_specs,
        out_specs=pl.BlockSpec((tm, tn), lambda i, j, t: (i, j)),
        scratch_shapes=[pltpu.VMEM((tm, tn), jnp.float32)],
        compiler_params=pltpu.CompilerParams(
            dimension_semantics=("parallel", "parallel", "arbitrary"),
            vmem_limit_bytes=32 * 1024 * 1024),
    )(*args)
    return out[:m] if mp != m else out


# ---------------------------------------------------------------------------
# Conv glue: channels-last tap extraction (1x1x1 convs are pure reshapes)
# ---------------------------------------------------------------------------

def extract_taps(x, ksize, stride, padding):
    """x: (N, D, H, W, C) channels-last -> (T, M, C) tap rows, M = N*Do*Ho*Wo."""
    n, d, h, w, c = x.shape
    kd, kh, kw = ksize
    sd, sh, sw = stride
    pd, ph, pw = padding
    do = (d + 2 * pd - kd) // sd + 1
    ho = (h + 2 * ph - kh) // sh + 1
    wo = (w + 2 * pw - kw) // sw + 1

    if (kd, kh, kw) == (1, 1, 1) and (pd, ph, pw) == (0, 0, 0):
        xs = x if (sd, sh, sw) == (1, 1, 1) else x[:, ::sd, ::sh, ::sw, :]
        return xs.reshape(1, n * do * ho * wo, c), (n, do, ho, wo)

    xp = jnp.pad(x, ((0, 0), (pd, pd), (ph, ph), (pw, pw), (0, 0)))
    taps = []
    for a in range(kd):
        for b in range(kh):
            for cc in range(kw):
                taps.append(
                    xp[:, a:a + do * sd:sd, b:b + ho * sh:sh, cc:cc + wo * sw:sw, :]
                    .reshape(n * do * ho * wo, c))
    return jnp.stack(taps, axis=0), (n, do, ho, wo)


def conv_bn_act(x, w3, shift, ksize, stride, padding, relu, residual=None):
    """Fused Conv3d + folded BN (+ residual) (+ ReLU) in channels-last layout."""
    a3, (n, do, ho, wo) = extract_taps(x, ksize, stride, padding)
    rows = fused_conv_matmul(a3, w3, shift, residual=residual, relu=relu)
    return rows.reshape(n, do, ho, wo, w3.shape[-1])


# ---------------------------------------------------------------------------
# Forward pass (mirrors SpatioTemporalResBottleBlock / ...Layer)
# ---------------------------------------------------------------------------

def block_forward(x, p, k, downsample):
    pad = k // 2
    s = 2 if downsample else 1
    # conv0 + bn0 + relu0 (1x1x1)
    res = conv_bn_act(x, *p['conv0'], (1, 1, 1), (1, 1, 1), (0, 0, 0), relu=True)
    # conv1 = SpatioTemporalConv: spatial (1,k,k) + internal BN + ReLU
    res = conv_bn_act(res, *p['spatial'], (1, k, k), (1, s, s), (0, pad, pad), relu=True)
    #                 ... then temporal (k,1,1), fused with the block's bn1 + relu1
    res = conv_bn_act(res, *p['temporal'], (k, 1, 1), (s, 1, 1), (pad, 0, 0), relu=True)
    # identity path
    if downsample:
        idn = conv_bn_act(x, *p['ds'], (1, 1, 1), (2, 2, 2), (0, 0, 0), relu=False)
    else:
        idn = x
    idn_rows = idn.reshape(-1, idn.shape[-1])
    # conv2 + bn2 + residual add + output ReLU, all fused in one kernel
    return conv_bn_act(res, *p['conv2'], (1, 1, 1), (1, 1, 1), (0, 0, 0),
                       relu=True, residual=idn_rows)


def layer_forward(x, params, *, kernel_size, downsample_flags):
    # NCDHW -> channels-last bf16 once at the boundary
    x = jnp.transpose(x, (0, 2, 3, 4, 1)).astype(jnp.bfloat16)
    for p, ds in zip(params, downsample_flags):
        x = block_forward(x, p, kernel_size, ds)
    # back to NCDHW f32 at the boundary
    return jnp.transpose(x, (0, 4, 1, 2, 3)).astype(jnp.float32)


# ---------------------------------------------------------------------------
# Deterministic parameters + one-time (hoisted) BN folding / bf16 packing
# ---------------------------------------------------------------------------

def _conv_params(key, cin, cout, ksize):
    kw_, kb = jax.random.split(key)
    fan_in = cin * ksize[0] * ksize[1] * ksize[2]
    std = 1.0 / math.sqrt(fan_in)
    return {'w': std * jax.random.normal(kw_, (cout, cin) + tuple(ksize), jnp.float32),
            'b': std * jax.random.normal(kb, (cout,), jnp.float32)}


def _bn_params(key, c):
    k1, k2, k3, k4 = jax.random.split(key, 4)
    return {'gamma': 1.0 + 0.1 * jax.random.normal(k1, (c,), jnp.float32),
            'beta': 0.1 * jax.random.normal(k2, (c,), jnp.float32),
            'mean': 0.1 * jax.random.normal(k3, (c,), jnp.float32),
            'var': 1.0 + 0.1 * jnp.abs(jax.random.normal(k4, (c,), jnp.float32))}


def _st_conv_params(key, cin, cout, k):
    # R(2+1)D intermediate channel count
    inter = (k * k * k * cin * cout) // (k * k * cin + k * cout)
    k1, k2, k3 = jax.random.split(key, 3)
    return {'spatial': _conv_params(k1, cin, inter, (1, k, k)),
            'bn': _bn_params(k2, inter),
            'temporal': _conv_params(k3, inter, cout, (k, 1, 1))}


def make_block_params(key, cin, cmid, cout, k, downsample):
    keys = jax.random.split(key, 8)
    p = {'conv0': _conv_params(keys[0], cin, cmid, (1, 1, 1)),
         'bn0': _bn_params(keys[1], cmid),
         'conv1': _st_conv_params(keys[2], cmid, cmid, k),
         'bn1': _bn_params(keys[3], cmid),
         'conv2': _conv_params(keys[4], cmid, cout, (1, 1, 1)),
         'bn2': _bn_params(keys[5], cout)}
    if downsample:
        p['dsconv'] = _conv_params(keys[6], cin, cout, (1, 1, 1))
        p['dsbn'] = _bn_params(keys[7], cout)
    return p


def make_layer_params(key, cin, cmid, cout, k, layer_size, downsample):
    keys = jax.random.split(key, layer_size)
    raw = [make_block_params(keys[0], cin, cmid, cout, k, downsample)]
    for i in range(1, layer_size):
        raw.append(make_block_params(keys[i], cout, cmid, cout, k, False))
    return raw


def _fold_conv_bn(conv, bn, ksize):
    """Fold BN scale into weight columns and bias+BN shift into one f32 vector."""
    cout, cin = conv['w'].shape[0], conv['w'].shape[1]
    taps = ksize[0] * ksize[1] * ksize[2]
    w3 = conv['w'].reshape(cout, cin, taps).transpose(2, 1, 0)   # (T, Cin, Cout)
    if bn is None:
        scale = jnp.ones((cout,), jnp.float32)
        shift = conv['b']
    else:
        scale = bn['gamma'] / jnp.sqrt(bn['var'] + 1e-5)
        shift = (conv['b'] - bn['mean']) * scale + bn['beta']
    return ((w3 * scale[None, None, :]).astype(jnp.bfloat16),
            shift.astype(jnp.float32))


def prepare_block_params(raw, k, downsample):
    p = {'conv0': _fold_conv_bn(raw['conv0'], raw['bn0'], (1, 1, 1)),
         'spatial': _fold_conv_bn(raw['conv1']['spatial'], raw['conv1']['bn'], (1, k, k)),
         'temporal': _fold_conv_bn(raw['conv1']['temporal'], raw['bn1'], (k, 1, 1)),
         'conv2': _fold_conv_bn(raw['conv2'], raw['bn2'], (1, 1, 1))}
    if downsample:
        p['ds'] = _fold_conv_bn(raw['dsconv'], raw['dsbn'], (1, 1, 1))
    return p


# ---------------------------------------------------------------------------

if __name__ == "__main__":
    in_channels, mid_channels, out_channels = 64, 32, 128
    kernel_size, layer_size, downsample = 3, 2, True

    key = jax.random.PRNGKey(0)
    k_in, k_par = jax.random.split(key)

    # NCDHW input: batch=2, C=64, T=4, H=W=16
    x = jax.random.normal(k_in, (2, in_channels, 4, 16, 16), jnp.float32)

    raw = make_layer_params(k_par, in_channels, mid_channels, out_channels,
                            kernel_size, layer_size, downsample)
    ds_flags = (downsample,) + (False,) * (layer_size - 1)
    # Weight prep (BN folding, bf16 cast, tap-major layout) done ONCE, outside jit.
    params = [prepare_block_params(r, kernel_size, f) for r, f in zip(raw, ds_flags)]

    fwd = jax.jit(functools.partial(layer_forward,
                                    kernel_size=kernel_size,
                                    downsample_flags=ds_flags))
    out = jax.block_until_ready(fwd(x, params))

    d_out, h_out, w_out = (2, 8, 8) if downsample else (4, 16, 16)
    assert out.shape == (2, out_channels, d_out, h_out, w_out), out.shape
    assert bool(jnp.all(jnp.isfinite(out)))
    print("KERNEL_OK")
</pallas_src>

<mosaic_0001>
module attributes {stable_mosaic.version = 11 : i64} {
  func.func @_conv_kernel(%arg0: i32, %arg1: i32, %arg2: i32, %arg3: memref<1x512x64xbf16, #tpu.memory_space<vmem>>, %arg4: memref<1x64x32xbf16, #tpu.memory_space<vmem>>, %arg5: memref<1x32xf32, #tpu.memory_space<vmem>>, %arg6: memref<512x32xbf16, #tpu.memory_space<vmem>>, %arg7: memref<512x32xf32, #tpu.memory_space<vmem>>) attributes {dimension_semantics = [#tpu.dimension_semantics<parallel>, #tpu.dimension_semantics<parallel>, #tpu.dimension_semantics<arbitrary>], iteration_bounds = array<i64: 4, 1, 1>, scalar_prefetch = 0 : i64, scratch_operands = 1 : i64, tpu.core_type = #tpu.core_type<tc>, window_params = [{transform_indices = @transform_0, window_bounds = array<i64: 1, 512, 64>}, {transform_indices = @transform_1, window_bounds = array<i64: 1, 64, 32>}, {transform_indices = @transform_2, window_bounds = array<i64: 1, 32>}, {transform_indices = @transform_3, window_bounds = array<i64: 512, 32>}]} {
    %c0_i32 = arith.constant 0 : i32
    %0 = arith.cmpi eq, %arg2, %c0_i32 : i32
    %1 = arith.extui %0 : i1 to i32
    %c0_i32_0 = arith.constant 0 : i32
    %2 = arith.cmpi ne, %1, %c0_i32_0 : i32
    scf.if %2 {
      %cst_12 = arith.constant 0.000000e+00 : f32
      %14 = vector.broadcast %cst_12 : f32 to vector<512x32xf32>
      %c0_13 = arith.constant 0 : index
      %c0_14 = arith.constant 0 : index
      %15 = vector.load %arg7[%c0_13, %c0_14] : memref<512x32xf32, #tpu.memory_space<vmem>>, vector<512x32xf32>
      tpu.vector_store %arg7[%c0_13, %c0_14], %14 {strides = array<i32>} : memref<512x32xf32, #tpu.memory_space<vmem>>, vector<512x32xf32>,
    } else {
    }
    %c0 = arith.constant 0 : index
    %c0_1 = arith.constant 0 : index
    %3 = vector.load %arg7[%c0, %c0_1] : memref<512x32xf32, #tpu.memory_space<vmem>>, vector<512x32xf32>
    %c0_2 = arith.constant 0 : index
    %c0_3 = arith.constant 0 : index
    %c0_4 = arith.constant 0 : index
    %4 = vector.load %arg3[%c0_2, %c0_3, %c0_4] : memref<1x512x64xbf16, #tpu.memory_space<vmem>>, vector<1x512x64xbf16>
    %5 = vector.shape_cast %4 : vector<1x512x64xbf16> to vector<512x64xbf16>
    %c0_5 = arith.constant 0 : index
    %c0_6 = arith.constant 0 : index
    %c0_7 = arith.constant 0 : index
    %6 = vector.load %arg4[%c0_5, %c0_6, %c0_7] : memref<1x64x32xbf16, #tpu.memory_space<vmem>>, vector<1x64x32xbf16>
    %7 = vector.shape_cast %6 : vector<1x64x32xbf16> to vector<64x32xbf16>
    %cst = arith.constant dense<0.000000e+00> : vector<512x32xf32>
    %8 = tpu.matmul %5, %7, %cst {dimension_numbers = #tpu.dot_dimension_numbers<[1], [0], [0], [1], [0, 0, 1, 1], [], []>} : vector<512x64xbf16>, vector<64x32xbf16>, vector<512x32xf32> -> vector<512x32xf32>
    %9 = arith.addf %3, %8 : vector<512x32xf32>
    %c0_8 = arith.constant 0 : index
    %c0_9 = arith.constant 0 : index
    %10 = vector.load %arg7[%c0_8, %c0_9] : memref<512x32xf32, #tpu.memory_space<vmem>>, vector<512x32xf32>
    tpu.vector_store %arg7[%c0_8, %c0_9], %9 {strides = array<i32>} : memref<512x32xf32, #tpu.memory_space<vmem>>, vector<512x32xf32>,
    %c0_i32_10 = arith.constant 0 : i32
    %11 = arith.cmpi eq, %arg2, %c0_i32_10 : i32
    %12 = arith.extui %11 : i1 to i32
    %c0_i32_11 = arith.constant 0 : i32
    %13 = arith.cmpi ne, %12, %c0_i32_11 : i32
    scf.if %13 {
      %c0_12 = arith.constant 0 : index
      %c0_13 = arith.constant 0 : index
      %14 = vector.load %arg7[%c0_12, %c0_13] : memref<512x32xf32, #tpu.memory_space<vmem>>, vector<512x32xf32>
      %c0_14 = arith.constant 0 : index
      %c0_15 = arith.constant 0 : index
      %15 = vector.load %arg5[%c0_14, %c0_15] : memref<1x32xf32, #tpu.memory_space<vmem>>, vector<1x32xf32>
      %16 = vector.broadcast %15 : vector<1x32xf32> to vector<512x32xf32>
      %17 = arith.addf %14, %16 : vector<512x32xf32>
      %cst_16 = arith.constant 0.000000e+00 : f32
      %18 = vector.broadcast %cst_16 : f32 to vector<512x32xf32>
      %19 = arith.maximumf %17, %18 : vector<512x32xf32>
      %20 = arith.truncf %19 : vector<512x32xf32> to vector<512x32xbf16>
      %c0_17 = arith.constant 0 : index
      %c0_18 = arith.constant 0 : index
      %21 = vector.load %arg6[%c0_17, %c0_18] : memref<512x32xbf16, #tpu.memory_space<vmem>>, vector<512x32xbf16>
      tpu.vector_store %arg6[%c0_17, %c0_18], %20 {strides = array<i32>} : memref<512x32xbf16, #tpu.memory_space<vmem>>, vector<512x32xbf16>,
    } else {
    }
    return
  }
  func.func @transform_0(%arg0: i32, %arg1: i32, %arg2: i32) -> (i32, i32, i32) {
    %c0_i32 = arith.constant 0 : i32
    %c0_i32_0 = arith.constant 0 : i32
    return %arg2, %arg0, %c0_i32 : i32, i32, i32
  }
  func.func @transform_1(%arg0: i32, %arg1: i32, %arg2: i32) -> (i32, i32, i32) {
    %c0_i32 = arith.constant 0 : i32
    %c0_i32_0 = arith.constant 0 : i32
    return %arg2, %c0_i32, %arg1 : i32, i32, i32
  }
  func.func @transform_2(%arg0: i32, %arg1: i32, %arg2: i32) -> (i32, i32) {
    %c0_i32 = arith.constant 0 : i32
    %c0_i32_0 = arith.constant 0 : i32
    return %c0_i32, %arg1 : i32, i32
  }
  func.func @transform_3(%arg0: i32, %arg1: i32, %arg2: i32) -> (i32, i32) {
    %c0_i32 = arith.constant 0 : i32
    return %arg0, %arg1 : i32, i32
  }
}

module attributes {stable_mosaic.version = 11 : i64} {
  func.func @_conv_kernel(%arg0: i32, %arg1: i32, %arg2: i32, %arg3: memref<1x512x32xbf16, #tpu.memory_space<vmem>>, %arg4: memref<1x32x72xbf16, #tpu.memory_space<vmem>>, %arg5: memref<1x72xf32, #tpu.memory_space<vmem>>, %arg6: memref<512x72xbf16, #tpu.memory_space<vmem>>, %arg7: memref<512x72xf32, #tpu.memory_space<vmem>>) attributes {dimension_semantics = [#tpu.dimension_semantics<parallel>, #tpu.dimension_semantics<parallel>, #tpu.dimension_semantics<arbitrary>], iteration_bounds = array<i64: 1, 1, 9>, scalar_prefetch = 0 : i64, scratch_operands = 1 : i64, tpu.core_type = #tpu.core_type<tc>, window_params = [{transform_indices = @transform_0, window_bounds = array<i64: 1, 512, 32>}, {transform_indices = @transform_1, window_bounds = array<i64: 1, 32, 72>}, {transform_indices = @transform_2, window_bounds = array<i64: 1, 72>}, {transform_indices = @transform_3, window_bounds = array<i64: 512, 72>}]} {
    %c0_i32 = arith.constant 0 : i32
    %0 = arith.cmpi eq, %arg2, %c0_i32 : i32
    %1 = arith.extui %0 : i1 to i32
    %c0_i32_0 = arith.constant 0 : i32
    %2 = arith.cmpi ne, %1, %c0_i32_0 : i32
    scf.if %2 {
      %cst_11 = arith.constant 0.000000e+00 : f32
      %14 = vector.broadcast %cst_11 : f32 to vector<512x72xf32>
      %c0_12 = arith.constant 0 : index
      %c0_13 = arith.constant 0 : index
      %15 = vector.load %arg7[%c0_12, %c0_13] : memref<512x72xf32, #tpu.memory_space<vmem>>, vector<512x72xf32>
      tpu.vector_store %arg7[%c0_12, %c0_13], %14 {strides = array<i32>} : memref<512x72xf32, #tpu.memory_space<vmem>>, vector<512x72xf32>,
    } else {
    }
    %c0 = arith.constant 0 : index
    %c0_1 = arith.constant 0 : index
    %3 = vector.load %arg7[%c0, %c0_1] : memref<512x72xf32, #tpu.memory_space<vmem>>, vector<512x72xf32>
    %c0_2 = arith.constant 0 : index
    %c0_3 = arith.constant 0 : index
    %c0_4 = arith.constant 0 : index
    %4 = vector.load %arg3[%c0_2, %c0_3, %c0_4] : memref<1x512x32xbf16, #tpu.memory_space<vmem>>, vector<1x512x32xbf16>
    %5 = vector.shape_cast %4 : vector<1x512x32xbf16> to vector<512x32xbf16>
    %c0_5 = arith.constant 0 : index
    %c0_6 = arith.constant 0 : index
    %c0_7 = arith.constant 0 : index
    %6 = vector.load %arg4[%c0_5, %c0_6, %c0_7] : memref<1x32x72xbf16, #tpu.memory_space<vmem>>, vector<1x32x72xbf16>
    %7 = vector.shape_cast %6 : vector<1x32x72xbf16> to vector<32x72xbf16>
    %cst = arith.constant dense<0.000000e+00> : vector<512x72xf32>
    %8 = tpu.matmul %5, %7, %cst {dimension_numbers = #tpu.dot_dimension_numbers<[1], [0], [0], [1], [0, 0, 1, 1], [], []>} : vector<512x32xbf16>, vector<32x72xbf16>, vector<512x72xf32> -> vector<512x72xf32>
    %9 = arith.addf %3, %8 : vector<512x72xf32>
    %c0_8 = arith.constant 0 : index
    %c0_9 = arith.constant 0 : index
    %10 = vector.load %arg7[%c0_8, %c0_9] : memref<512x72xf32, #tpu.memory_space<vmem>>, vector<512x72xf32>
    tpu.vector_store %arg7[%c0_8, %c0_9], %9 {strides = array<i32>} : memref<512x72xf32, #tpu.memory_space<vmem>>, vector<512x72xf32>,
    %c8_i32 = arith.constant 8 : i32
    %11 = arith.cmpi eq, %arg2, %c8_i32 : i32
    %12 = arith.extui %11 : i1 to i32
    %c0_i32_10 = arith.constant 0 : i32
    %13 = arith.cmpi ne, %12, %c0_i32_10 : i32
    scf.if %13 {
      %c0_11 = arith.constant 0 : index
      %c0_12 = arith.constant 0 : index
      %14 = vector.load %arg7[%c0_11, %c0_12] : memref<512x72xf32, #tpu.memory_space<vmem>>, vector<512x72xf32>
      %c0_13 = arith.constant 0 : index
      %c0_14 = arith.constant 0 : index
      %15 = vector.load %arg5[%c0_13, %c0_14] : memref<1x72xf32, #tpu.memory_space<vmem>>, vector<1x72xf32>
      %16 = vector.broadcast %15 : vector<1x72xf32> to vector<512x72xf32>
      %17 = arith.addf %14, %16 : vector<512x72xf32>
      %cst_15 = arith.constant 0.000000e+00 : f32
      %18 = vector.broadcast %cst_15 : f32 to vector<512x72xf32>
      %19 = arith.maximumf %17, %18 : vector<512x72xf32>
      %20 = arith.truncf %19 : vector<512x72xf32> to vector<512x72xbf16>
      %c0_16 = arith.constant 0 : index
      %c0_17 = arith.constant 0 : index
      %21 = vector.load %arg6[%c0_16, %c0_17] : memref<512x72xbf16, #tpu.memory_space<vmem>>, vector<512x72xbf16>
      tpu.vector_store %arg6[%c0_16, %c0_17], %20 {strides = array<i32>} : memref<512x72xbf16, #tpu.memory_space<vmem>>, vector<512x72xbf16>,
    } else {
    }
    return
  }
  func.func @transform_0(%arg0: i32, %arg1: i32, %arg2: i32) -> (i32, i32, i32) {
    %c0_i32 = arith.constant 0 : i32
    %c0_i32_0 = arith.constant 0 : i32
    return %arg2, %arg0, %c0_i32 : i32, i32, i32
  }
  func.func @transform_1(%arg0: i32, %arg1: i32, %arg2: i32) -> (i32, i32, i32) {
    %c0_i32 = arith.constant 0 : i32
    %c0_i32_0 = arith.constant 0 : i32
    return %arg2, %c0_i32, %arg1 : i32, i32, i32
  }
  func.func @transform_2(%arg0: i32, %arg1: i32, %arg2: i32) -> (i32, i32) {
    %c0_i32 = arith.constant 0 : i32
    %c0_i32_0 = arith.constant 0 : i32
    return %c0_i32, %arg1 : i32, i32
  }
  func.func @transform_3(%arg0: i32, %arg1: i32, %arg2: i32) -> (i32, i32) {
    %c0_i32 = arith.constant 0 : i32
    return %arg0, %arg1 : i32, i32
  }
}

module attributes {stable_mosaic.version = 11 : i64} {
  func.func @_conv_kernel(%arg0: i32, %arg1: i32, %arg2: i32, %arg3: memref<1x256x72xbf16, #tpu.memory_space<vmem>>, %arg4: memref<1x72x32xbf16, #tpu.memory_space<vmem>>, %arg5: memref<1x32xf32, #tpu.memory_space<vmem>>, %arg6: memref<256x32xbf16, #tpu.memory_space<vmem>>, %arg7: memref<256x32xf32, #tpu.memory_space<vmem>>) attributes {dimension_semantics = [#tpu.dimension_semantics<parallel>, #tpu.dimension_semantics<parallel>, #tpu.dimension_semantics<arbitrary>], iteration_bounds = array<i64: 1, 1, 3>, scalar_prefetch = 0 : i64, scratch_operands = 1 : i64, tpu.core_type = #tpu.core_type<tc>, window_params = [{transform_indices = @transform_0, window_bounds = array<i64: 1, 256, 72>}, {transform_indices = @transform_1, window_bounds = array<i64: 1, 72, 32>}, {transform_indices = @transform_2, window_bounds = array<i64: 1, 32>}, {transform_indices = @transform_3, window_bounds = array<i64: 256, 32>}]} {
    %c0_i32 = arith.constant 0 : i32
    %0 = arith.cmpi eq, %arg2, %c0_i32 : i32
    %1 = arith.extui %0 : i1 to i32
    %c0_i32_0 = arith.constant 0 : i32
    %2 = arith.cmpi ne, %1, %c0_i32_0 : i32
    scf.if %2 {
      %cst_11 = arith.constant 0.000000e+00 : f32
      %14 = vector.broadcast %cst_11 : f32 to vector<256x32xf32>
      %c0_12 = arith.constant 0 : index
      %c0_13 = arith.constant 0 : index
      %15 = vector.load %arg7[%c0_12, %c0_13] : memref<256x32xf32, #tpu.memory_space<vmem>>, vector<256x32xf32>
      tpu.vector_store %arg7[%c0_12, %c0_13], %14 {strides = array<i32>} : memref<256x32xf32, #tpu.memory_space<vmem>>, vector<256x32xf32>,
    } else {
    }
    %c0 = arith.constant 0 : index
    %c0_1 = arith.constant 0 : index
    %3 = vector.load %arg7[%c0, %c0_1] : memref<256x32xf32, #tpu.memory_space<vmem>>, vector<256x32xf32>
    %c0_2 = arith.constant 0 : index
    %c0_3 = arith.constant 0 : index
    %c0_4 = arith.constant 0 : index
    %4 = vector.load %arg3[%c0_2, %c0_3, %c0_4] : memref<1x256x72xbf16, #tpu.memory_space<vmem>>, vector<1x256x72xbf16>
    %5 = vector.shape_cast %4 : vector<1x256x72xbf16> to vector<256x72xbf16>
    %c0_5 = arith.constant 0 : index
    %c0_6 = arith.constant 0 : index
    %c0_7 = arith.constant 0 : index
    %6 = vector.load %arg4[%c0_5, %c0_6, %c0_7] : memref<1x72x32xbf16, #tpu.memory_space<vmem>>, vector<1x72x32xbf16>
    %7 = vector.shape_cast %6 : vector<1x72x32xbf16> to vector<72x32xbf16>
    %cst = arith.constant dense<0.000000e+00> : vector<256x32xf32>
    %8 = tpu.matmul %5, %7, %cst {dimension_numbers = #tpu.dot_dimension_numbers<[1], [0], [0], [1], [0, 0, 1, 1], [], []>} : vector<256x72xbf16>, vector<72x32xbf16>, vector<256x32xf32> -> vector<256x32xf32>
    %9 = arith.addf %3, %8 : vector<256x32xf32>
    %c0_8 = arith.constant 0 : index
    %c0_9 = arith.constant 0 : index
    %10 = vector.load %arg7[%c0_8, %c0_9] : memref<256x32xf32, #tpu.memory_space<vmem>>, vector<256x32xf32>
    tpu.vector_store %arg7[%c0_8, %c0_9], %9 {strides = array<i32>} : memref<256x32xf32, #tpu.memory_space<vmem>>, vector<256x32xf32>,
    %c2_i32 = arith.constant 2 : i32
    %11 = arith.cmpi eq, %arg2, %c2_i32 : i32
    %12 = arith.extui %11 : i1 to i32
    %c0_i32_10 = arith.constant 0 : i32
    %13 = arith.cmpi ne, %12, %c0_i32_10 : i32
    scf.if %13 {
      %c0_11 = arith.constant 0 : index
      %c0_12 = arith.constant 0 : index
      %14 = vector.load %arg7[%c0_11, %c0_12] : memref<256x32xf32, #tpu.memory_space<vmem>>, vector<256x32xf32>
      %c0_13 = arith.constant 0 : index
      %c0_14 = arith.constant 0 : index
      %15 = vector.load %arg5[%c0_13, %c0_14] : memref<1x32xf32, #tpu.memory_space<vmem>>, vector<1x32xf32>
      %16 = vector.broadcast %15 : vector<1x32xf32> to vector<256x32xf32>
      %17 = arith.addf %14, %16 : vector<256x32xf32>
      %cst_15 = arith.constant 0.000000e+00 : f32
      %18 = vector.broadcast %cst_15 : f32 to vector<256x32xf32>
      %19 = arith.maximumf %17, %18 : vector<256x32xf32>
      %20 = arith.truncf %19 : vector<256x32xf32> to vector<256x32xbf16>
      %c0_16 = arith.constant 0 : index
      %c0_17 = arith.constant 0 : index
      %21 = vector.load %arg6[%c0_16, %c0_17] : memref<256x32xbf16, #tpu.memory_space<vmem>>, vector<256x32xbf16>
      tpu.vector_store %arg6[%c0_16, %c0_17], %20 {strides = array<i32>} : memref<256x32xbf16, #tpu.memory_space<vmem>>, vector<256x32xbf16>,
    } else {
    }
    return
  }
  func.func @transform_0(%arg0: i32, %arg1: i32, %arg2: i32) -> (i32, i32, i32) {
    %c0_i32 = arith.constant 0 : i32
    %c0_i32_0 = arith.constant 0 : i32
    return %arg2, %arg0, %c0_i32 : i32, i32, i32
  }
  func.func @transform_1(%arg0: i32, %arg1: i32, %arg2: i32) -> (i32, i32, i32) {
    %c0_i32 = arith.constant 0 : i32
    %c0_i32_0 = arith.constant 0 : i32
    return %arg2, %c0_i32, %arg1 : i32, i32, i32
  }
  func.func @transform_2(%arg0: i32, %arg1: i32, %arg2: i32) -> (i32, i32) {
    %c0_i32 = arith.constant 0 : i32
    %c0_i32_0 = arith.constant 0 : i32
    return %c0_i32, %arg1 : i32, i32
  }
  func.func @transform_3(%arg0: i32, %arg1: i32, %arg2: i32) -> (i32, i32) {
    %c0_i32 = arith.constant 0 : i32
    return %arg0, %arg1 : i32, i32
  }
}

module attributes {stable_mosaic.version = 11 : i64} {
  func.func @_conv_kernel(%arg0: i32, %arg1: i32, %arg2: i32, %arg3: memref<1x256x64xbf16, #tpu.memory_space<vmem>>, %arg4: memref<1x64x128xbf16, #tpu.memory_space<vmem>>, %arg5: memref<1x128xf32, #tpu.memory_space<vmem>>, %arg6: memref<256x128xbf16, #tpu.memory_space<vmem>>, %arg7: memref<256x128xf32, #tpu.memory_space<vmem>>) attributes {dimension_semantics = [#tpu.dimension_semantics<parallel>, #tpu.dimension_semantics<parallel>, #tpu.dimension_semantics<arbitrary>], iteration_bounds = array<i64: 1, 1, 1>, scalar_prefetch = 0 : i64, scratch_operands = 1 : i64, tpu.core_type = #tpu.core_type<tc>, window_params = [{transform_indices = @transform_0, window_bounds = array<i64: 1, 256, 64>}, {transform_indices = @transform_1, window_bounds = array<i64: 1, 64, 128>}, {transform_indices = @transform_2, window_bounds = array<i64: 1, 128>}, {transform_indices = @transform_3, window_bounds = array<i64: 256, 128>}]} {
    %c0_i32 = arith.constant 0 : i32
    %0 = arith.cmpi eq, %arg2, %c0_i32 : i32
    %1 = arith.extui %0 : i1 to i32
    %c0_i32_0 = arith.constant 0 : i32
    %2 = arith.cmpi ne, %1, %c0_i32_0 : i32
    scf.if %2 {
      %cst_12 = arith.constant 0.000000e+00 : f32
      %14 = vector.broadcast %cst_12 : f32 to vector<256x128xf32>
      %c0_13 = arith.constant 0 : index
      %c0_14 = arith.constant 0 : index
      %15 = vector.load %arg7[%c0_13, %c0_14] : memref<256x128xf32, #tpu.memory_space<vmem>>, vector<256x128xf32>
      tpu.vector_store %arg7[%c0_13, %c0_14], %14 {strides = array<i32>} : memref<256x128xf32, #tpu.memory_space<vmem>>, vector<256x128xf32>,
    } else {
    }
    %c0 = arith.constant 0 : index
    %c0_1 = arith.constant 0 : index
    %3 = vector.load %arg7[%c0, %c0_1] : memref<256x128xf32, #tpu.memory_space<vmem>>, vector<256x128xf32>
    %c0_2 = arith.constant 0 : index
    %c0_3 = arith.constant 0 : index
    %c0_4 = arith.constant 0 : index
    %4 = vector.load %arg3[%c0_2, %c0_3, %c0_4] : memref<1x256x64xbf16, #tpu.memory_space<vmem>>, vector<1x256x64xbf16>
    %5 = vector.shape_cast %4 : vector<1x256x64xbf16> to vector<256x64xbf16>
    %c0_5 = arith.constant 0 : index
    %c0_6 = arith.constant 0 : index
    %c0_7 = arith.constant 0 : index
    %6 = vector.load %arg4[%c0_5, %c0_6, %c0_7] : memref<1x64x128xbf16, #tpu.memory_space<vmem>>, vector<1x64x128xbf16>
    %7 = vector.shape_cast %6 : vector<1x64x128xbf16> to vector<64x128xbf16>
    %cst = arith.constant dense<0.000000e+00> : vector<256x128xf32>
    %8 = tpu.matmul %5, %7, %cst {dimension_numbers = #tpu.dot_dimension_numbers<[1], [0], [0], [1], [0, 0, 1, 1], [], []>} : vector<256x64xbf16>, vector<64x128xbf16>, vector<256x128xf32> -> vector<256x128xf32>
    %9 = arith.addf %3, %8 : vector<256x128xf32>
    %c0_8 = arith.constant 0 : index
    %c0_9 = arith.constant 0 : index
    %10 = vector.load %arg7[%c0_8, %c0_9] : memref<256x128xf32, #tpu.memory_space<vmem>>, vector<256x128xf32>
    tpu.vector_store %arg7[%c0_8, %c0_9], %9 {strides = array<i32>} : memref<256x128xf32, #tpu.memory_space<vmem>>, vector<256x128xf32>,
    %c0_i32_10 = arith.constant 0 : i32
    %11 = arith.cmpi eq, %arg2, %c0_i32_10 : i32
    %12 = arith.extui %11 : i1 to i32
    %c0_i32_11 = arith.constant 0 : i32
    %13 = arith.cmpi ne, %12, %c0_i32_11 : i32
    scf.if %13 {
      %c0_12 = arith.constant 0 : index
      %c0_13 = arith.constant 0 : index
      %14 = vector.load %arg7[%c0_12, %c0_13] : memref<256x128xf32, #tpu.memory_space<vmem>>, vector<256x128xf32>
      %c0_14 = arith.constant 0 : index
      %c0_15 = arith.constant 0 : index
      %15 = vector.load %arg5[%c0_14, %c0_15] : memref<1x128xf32, #tpu.memory_space<vmem>>, vector<1x128xf32>
      %16 = vector.broadcast %15 : vector<1x128xf32> to vector<256x128xf32>
      %17 = arith.addf %14, %16 : vector<256x128xf32>
      %18 = arith.truncf %17 : vector<256x128xf32> to vector<256x128xbf16>
      %c0_16 = arith.constant 0 : index
      %c0_17 = arith.constant 0 : index
      %19 = vector.load %arg6[%c0_16, %c0_17] : memref<256x128xbf16, #tpu.memory_space<vmem>>, vector<256x128xbf16>
      tpu.vector_store %arg6[%c0_16, %c0_17], %18 {strides = array<i32>} : memref<256x128xbf16, #tpu.memory_space<vmem>>, vector<256x128xbf16>,
    } else {
    }
    return
  }
  func.func @transform_0(%arg0: i32, %arg1: i32, %arg2: i32) -> (i32, i32, i32) {
    %c0_i32 = arith.constant 0 : i32
    %c0_i32_0 = arith.constant 0 : i32
    return %arg2, %arg0, %c0_i32 : i32, i32, i32
  }
  func.func @transform_1(%arg0: i32, %arg1: i32, %arg2: i32) -> (i32, i32, i32) {
    %c0_i32 = arith.constant 0 : i32
    %c0_i32_0 = arith.constant 0 : i32
    return %arg2, %c0_i32, %arg1 : i32, i32, i32
  }
  func.func @transform_2(%arg0: i32, %arg1: i32, %arg2: i32) -> (i32, i32) {
    %c0_i32 = arith.constant 0 : i32
    %c0_i32_0 = arith.constant 0 : i32
    return %c0_i32, %arg1 : i32, i32
  }
  func.func @transform_3(%arg0: i32, %arg1: i32, %arg2: i32) -> (i32, i32) {
    %c0_i32 = arith.constant 0 : i32
    return %arg0, %arg1 : i32, i32
  }
}

module attributes {stable_mosaic.version = 11 : i64} {
  func.func @_conv_res_kernel(%arg0: i32, %arg1: i32, %arg2: i32, %arg3: memref<1x256x32xbf16, #tpu.memory_space<vmem>>, %arg4: memref<1x32x128xbf16, #tpu.memory_space<vmem>>, %arg5: memref<1x128xf32, #tpu.memory_space<vmem>>, %arg6: memref<256x128xbf16, #tpu.memory_space<vmem>>, %arg7: memref<256x128xbf16, #tpu.memory_space<vmem>>, %arg8: memref<256x128xf32, #tpu.memory_space<vmem>>) attributes {dimension_semantics = [#tpu.dimension_semantics<parallel>, #tpu.dimension_semantics<parallel>, #tpu.dimension_semantics<arbitrary>], iteration_bounds = array<i64: 1, 1, 1>, scalar_prefetch = 0 : i64, scratch_operands = 1 : i64, tpu.core_type = #tpu.core_type<tc>, window_params = [{transform_indices = @transform_0, window_bounds = array<i64: 1, 256, 32>}, {transform_indices = @transform_1, window_bounds = array<i64: 1, 32, 128>}, {transform_indices = @transform_2, window_bounds = array<i64: 1, 128>}, {transform_indices = @transform_3, window_bounds = array<i64: 256, 128>}, {transform_indices = @transform_4, window_bounds = array<i64: 256, 128>}]} {
    %c0_i32 = arith.constant 0 : i32
    %0 = arith.cmpi eq, %arg2, %c0_i32 : i32
    %1 = arith.extui %0 : i1 to i32
    %c0_i32_0 = arith.constant 0 : i32
    %2 = arith.cmpi ne, %1, %c0_i32_0 : i32
    scf.if %2 {
      %cst_12 = arith.constant 0.000000e+00 : f32
      %14 = vector.broadcast %cst_12 : f32 to vector<256x128xf32>
      %c0_13 = arith.constant 0 : index
      %c0_14 = arith.constant 0 : index
      %15 = vector.load %arg8[%c0_13, %c0_14] : memref<256x128xf32, #tpu.memory_space<vmem>>, vector<256x128xf32>
      tpu.vector_store %arg8[%c0_13, %c0_14], %14 {strides = array<i32>} : memref<256x128xf32, #tpu.memory_space<vmem>>, vector<256x128xf32>,
    } else {
    }
    %c0 = arith.constant 0 : index
    %c0_1 = arith.constant 0 : index
    %3 = vector.load %arg8[%c0, %c0_1] : memref<256x128xf32, #tpu.memory_space<vmem>>, vector<256x128xf32>
    %c0_2 = arith.constant 0 : index
    %c0_3 = arith.constant 0 : index
    %c0_4 = arith.constant 0 : index
    %4 = vector.load %arg3[%c0_2, %c0_3, %c0_4] : memref<1x256x32xbf16, #tpu.memory_space<vmem>>, vector<1x256x32xbf16>
    %5 = vector.shape_cast %4 : vector<1x256x32xbf16> to vector<256x32xbf16>
    %c0_5 = arith.constant 0 : index
    %c0_6 = arith.constant 0 : index
    %c0_7 = arith.constant 0 : index
    %6 = vector.load %arg4[%c0_5, %c0_6, %c0_7] : memref<1x32x128xbf16, #tpu.memory_space<vmem>>, vector<1x32x128xbf16>
    %7 = vector.shape_cast %6 : vector<1x32x128xbf16> to vector<32x128xbf16>
    %cst = arith.constant dense<0.000000e+00> : vector<256x128xf32>
    %8 = tpu.matmul %5, %7, %cst {dimension_numbers = #tpu.dot_dimension_numbers<[1], [0], [0], [1], [0, 0, 1, 1], [], []>} : vector<256x32xbf16>, vector<32x128xbf16>, vector<256x128xf32> -> vector<256x128xf32>
    %9 = arith.addf %3, %8 : vector<256x128xf32>
    %c0_8 = arith.constant 0 : index
    %c0_9 = arith.constant 0 : index
    %10 = vector.load %arg8[%c0_8, %c0_9] : memref<256x128xf32, #tpu.memory_space<vmem>>, vector<256x128xf32>
    tpu.vector_store %arg8[%c0_8, %c0_9], %9 {strides = array<i32>} : memref<256x128xf32, #tpu.memory_space<vmem>>, vector<256x128xf32>,
    %c0_i32_10 = arith.constant 0 : i32
    %11 = arith.cmpi eq, %arg2, %c0_i32_10 : i32
    %12 = arith.extui %11 : i1 to i32
    %c0_i32_11 = arith.constant 0 : i32
    %13 = arith.cmpi ne, %12, %c0_i32_11 : i32
    scf.if %13 {
      %c0_12 = arith.constant 0 : index
      %c0_13 = arith.constant 0 : index
      %14 = vector.load %arg8[%c0_12, %c0_13] : memref<256x128xf32, #tpu.memory_space<vmem>>, vector<256x128xf32>
      %c0_14 = arith.constant 0 : index
      %c0_15 = arith.constant 0 : index
      %15 = vector.load %arg5[%c0_14, %c0_15] : memref<1x128xf32, #tpu.memory_space<vmem>>, vector<1x128xf32>
      %16 = vector.broadcast %15 : vector<1x128xf32> to vector<256x128xf32>
      %17 = arith.addf %14, %16 : vector<256x128xf32>
      %c0_16 = arith.constant 0 : index
      %c0_17 = arith.constant 0 : index
      %18 = vector.load %arg6[%c0_16, %c0_17] : memref<256x128xbf16, #tpu.memory_space<vmem>>, vector<256x128xbf16>
      %19 = arith.extf %18 : vector<256x128xbf16> to vector<256x128xf32>
      %20 = arith.addf %17, %19 : vector<256x128xf32>
      %cst_18 = arith.constant 0.000000e+00 : f32
      %21 = vector.broadcast %cst_18 : f32 to vector<256x128xf32>
      %22 = arith.maximumf %20, %21 : vector<256x128xf32>
      %23 = arith.truncf %22 : vector<256x128xf32> to vector<256x128xbf16>
      %c0_19 = arith.constant 0 : index
      %c0_20 = arith.constant 0 : index
      %24 = vector.load %arg7[%c0_19, %c0_20] : memref<256x128xbf16, #tpu.memory_space<vmem>>, vector<256x128xbf16>
      tpu.vector_store %arg7[%c0_19, %c0_20], %23 {strides = array<i32>} : memref<256x128xbf16, #tpu.memory_space<vmem>>, vector<256x128xbf16>,
    } else {
    }
    return
  }
  func.func @transform_0(%arg0: i32, %arg1: i32, %arg2: i32) -> (i32, i32, i32) {
    %c0_i32 = arith.constant 0 : i32
    %c0_i32_0 = arith.constant 0 : i32
    return %arg2, %arg0, %c0_i32 : i32, i32, i32
  }
  func.func @transform_1(%arg0: i32, %arg1: i32, %arg2: i32) -> (i32, i32, i32) {
    %c0_i32 = arith.constant 0 : i32
    %c0_i32_0 = arith.constant 0 : i32
    return %arg2, %c0_i32, %arg1 : i32, i32, i32
  }
  func.func @transform_2(%arg0: i32, %arg1: i32, %arg2: i32) -> (i32, i32) {
    %c0_i32 = arith.constant 0 : i32
    %c0_i32_0 = arith.constant 0 : i32
    return %c0_i32, %arg1 : i32, i32
  }
  func.func @transform_3(%arg0: i32, %arg1: i32, %arg2: i32) -> (i32, i32) {
    %c0_i32 = arith.constant 0 : i32
    return %arg0, %arg1 : i32, i32
  }
  func.func @transform_4(%arg0: i32, %arg1: i32, %arg2: i32) -> (i32, i32) {
    %c0_i32 = arith.constant 0 : i32
    return %arg0, %arg1 : i32, i32
  }
}

module attributes {stable_mosaic.version = 11 : i64} {
  func.func @_conv_kernel(%arg0: i32, %arg1: i32, %arg2: i32, %arg3: memref<1x256x128xbf16, #tpu.memory_space<vmem>>, %arg4: memref<1x128x32xbf16, #tpu.memory_space<vmem>>, %arg5: memref<1x32xf32, #tpu.memory_space<vmem>>, %arg6: memref<256x32xbf16, #tpu.memory_space<vmem>>, %arg7: memref<256x32xf32, #tpu.memory_space<vmem>>) attributes {dimension_semantics = [#tpu.dimension_semantics<parallel>, #tpu.dimension_semantics<parallel>, #tpu.dimension_semantics<arbitrary>], iteration_bounds = array<i64: 1, 1, 1>, scalar_prefetch = 0 : i64, scratch_operands = 1 : i64, tpu.core_type = #tpu.core_type<tc>, window_params = [{transform_indices = @transform_0, window_bounds = array<i64: 1, 256, 128>}, {transform_indices = @transform_1, window_bounds = array<i64: 1, 128, 32>}, {transform_indices = @transform_2, window_bounds = array<i64: 1, 32>}, {transform_indices = @transform_3, window_bounds = array<i64: 256, 32>}]} {
    %c0_i32 = arith.constant 0 : i32
    %0 = arith.cmpi eq, %arg2, %c0_i32 : i32
    %1 = arith.extui %0 : i1 to i32
    %c0_i32_0 = arith.constant 0 : i32
    %2 = arith.cmpi ne, %1, %c0_i32_0 : i32
    scf.if %2 {
      %cst_12 = arith.constant 0.000000e+00 : f32
      %14 = vector.broadcast %cst_12 : f32 to vector<256x32xf32>
      %c0_13 = arith.constant 0 : index
      %c0_14 = arith.constant 0 : index
      %15 = vector.load %arg7[%c0_13, %c0_14] : memref<256x32xf32, #tpu.memory_space<vmem>>, vector<256x32xf32>
      tpu.vector_store %arg7[%c0_13, %c0_14], %14 {strides = array<i32>} : memref<256x32xf32, #tpu.memory_space<vmem>>, vector<256x32xf32>,
    } else {
    }
    %c0 = arith.constant 0 : index
    %c0_1 = arith.constant 0 : index
    %3 = vector.load %arg7[%c0, %c0_1] : memref<256x32xf32, #tpu.memory_space<vmem>>, vector<256x32xf32>
    %c0_2 = arith.constant 0 : index
    %c0_3 = arith.constant 0 : index
    %c0_4 = arith.constant 0 : index
    %4 = vector.load %arg3[%c0_2, %c0_3, %c0_4] : memref<1x256x128xbf16, #tpu.memory_space<vmem>>, vector<1x256x128xbf16>
    %5 = vector.shape_cast %4 : vector<1x256x128xbf16> to vector<256x128xbf16>
    %c0_5 = arith.constant 0 : index
    %c0_6 = arith.constant 0 : index
    %c0_7 = arith.constant 0 : index
    %6 = vector.load %arg4[%c0_5, %c0_6, %c0_7] : memref<1x128x32xbf16, #tpu.memory_space<vmem>>, vector<1x128x32xbf16>
    %7 = vector.shape_cast %6 : vector<1x128x32xbf16> to vector<128x32xbf16>
    %cst = arith.constant dense<0.000000e+00> : vector<256x32xf32>
    %8 = tpu.matmul %5, %7, %cst {dimension_numbers = #tpu.dot_dimension_numbers<[1], [0], [0], [1], [0, 0, 1, 1], [], []>} : vector<256x128xbf16>, vector<128x32xbf16>, vector<256x32xf32> -> vector<256x32xf32>
    %9 = arith.addf %3, %8 : vector<256x32xf32>
    %c0_8 = arith.constant 0 : index
    %c0_9 = arith.constant 0 : index
    %10 = vector.load %arg7[%c0_8, %c0_9] : memref<256x32xf32, #tpu.memory_space<vmem>>, vector<256x32xf32>
    tpu.vector_store %arg7[%c0_8, %c0_9], %9 {strides = array<i32>} : memref<256x32xf32, #tpu.memory_space<vmem>>, vector<256x32xf32>,
    %c0_i32_10 = arith.constant 0 : i32
    %11 = arith.cmpi eq, %arg2, %c0_i32_10 : i32
    %12 = arith.extui %11 : i1 to i32
    %c0_i32_11 = arith.constant 0 : i32
    %13 = arith.cmpi ne, %12, %c0_i32_11 : i32
    scf.if %13 {
      %c0_12 = arith.constant 0 : index
      %c0_13 = arith.constant 0 : index
      %14 = vector.load %arg7[%c0_12, %c0_13] : memref<256x32xf32, #tpu.memory_space<vmem>>, vector<256x32xf32>
      %c0_14 = arith.constant 0 : index
      %c0_15 = arith.constant 0 : index
      %15 = vector.load %arg5[%c0_14, %c0_15] : memref<1x32xf32, #tpu.memory_space<vmem>>, vector<1x32xf32>
      %16 = vector.broadcast %15 : vector<1x32xf32> to vector<256x32xf32>
      %17 = arith.addf %14, %16 : vector<256x32xf32>
      %cst_16 = arith.constant 0.000000e+00 : f32
      %18 = vector.broadcast %cst_16 : f32 to vector<256x32xf32>
      %19 = arith.maximumf %17, %18 : vector<256x32xf32>
      %20 = arith.truncf %19 : vector<256x32xf32> to vector<256x32xbf16>
      %c0_17 = arith.constant 0 : index
      %c0_18 = arith.constant 0 : index
      %21 = vector.load %arg6[%c0_17, %c0_18] : memref<256x32xbf16, #tpu.memory_space<vmem>>, vector<256x32xbf16>
      tpu.vector_store %arg6[%c0_17, %c0_18], %20 {strides = array<i32>} : memref<256x32xbf16, #tpu.memory_space<vmem>>, vector<256x32xbf16>,
    } else {
    }
    return
  }
  func.func @transform_0(%arg0: i32, %arg1: i32, %arg2: i32) -> (i32, i32, i32) {
    %c0_i32 = arith.constant 0 : i32
    %c0_i32_0 = arith.constant 0 : i32
    return %arg2, %arg0, %c0_i32 : i32, i32, i32
  }
  func.func @transform_1(%arg0: i32, %arg1: i32, %arg2: i32) -> (i32, i32, i32) {
    %c0_i32 = arith.constant 0 : i32
    %c0_i32_0 = arith.constant 0 : i32
    return %arg2, %c0_i32, %arg1 : i32, i32, i32
  }
  func.func @transform_2(%arg0: i32, %arg1: i32, %arg2: i32) -> (i32, i32) {
    %c0_i32 = arith.constant 0 : i32
    %c0_i32_0 = arith.constant 0 : i32
    return %c0_i32, %arg1 : i32, i32
  }
  func.func @transform_3(%arg0: i32, %arg1: i32, %arg2: i32) -> (i32, i32) {
    %c0_i32 = arith.constant 0 : i32
    return %arg0, %arg1 : i32, i32
  }
}

module attributes {stable_mosaic.version = 11 : i64} {
  func.func @_conv_kernel(%arg0: i32, %arg1: i32, %arg2: i32, %arg3: memref<1x256x32xbf16, #tpu.memory_space<vmem>>, %arg4: memref<1x32x72xbf16, #tpu.memory_space<vmem>>, %arg5: memref<1x72xf32, #tpu.memory_space<vmem>>, %arg6: memref<256x72xbf16, #tpu.memory_space<vmem>>, %arg7: memref<256x72xf32, #tpu.memory_space<vmem>>) attributes {dimension_semantics = [#tpu.dimension_semantics<parallel>, #tpu.dimension_semantics<parallel>, #tpu.dimension_semantics<arbitrary>], iteration_bounds = array<i64: 1, 1, 9>, scalar_prefetch = 0 : i64, scratch_operands = 1 : i64, tpu.core_type = #tpu.core_type<tc>, window_params = [{transform_indices = @transform_0, window_bounds = array<i64: 1, 256, 32>}, {transform_indices = @transform_1, window_bounds = array<i64: 1, 32, 72>}, {transform_indices = @transform_2, window_bounds = array<i64: 1, 72>}, {transform_indices = @transform_3, window_bounds = array<i64: 256, 72>}]} {
    %c0_i32 = arith.constant 0 : i32
    %0 = arith.cmpi eq, %arg2, %c0_i32 : i32
    %1 = arith.extui %0 : i1 to i32
    %c0_i32_0 = arith.constant 0 : i32
    %2 = arith.cmpi ne, %1, %c0_i32_0 : i32
    scf.if %2 {
      %cst_11 = arith.constant 0.000000e+00 : f32
      %14 = vector.broadcast %cst_11 : f32 to vector<256x72xf32>
      %c0_12 = arith.constant 0 : index
      %c0_13 = arith.constant 0 : index
      %15 = vector.load %arg7[%c0_12, %c0_13] : memref<256x72xf32, #tpu.memory_space<vmem>>, vector<256x72xf32>
      tpu.vector_store %arg7[%c0_12, %c0_13], %14 {strides = array<i32>} : memref<256x72xf32, #tpu.memory_space<vmem>>, vector<256x72xf32>,
    } else {
    }
    %c0 = arith.constant 0 : index
    %c0_1 = arith.constant 0 : index
    %3 = vector.load %arg7[%c0, %c0_1] : memref<256x72xf32, #tpu.memory_space<vmem>>, vector<256x72xf32>
    %c0_2 = arith.constant 0 : index
    %c0_3 = arith.constant 0 : index
    %c0_4 = arith.constant 0 : index
    %4 = vector.load %arg3[%c0_2, %c0_3, %c0_4] : memref<1x256x32xbf16, #tpu.memory_space<vmem>>, vector<1x256x32xbf16>
    %5 = vector.shape_cast %4 : vector<1x256x32xbf16> to vector<256x32xbf16>
    %c0_5 = arith.constant 0 : index
    %c0_6 = arith.constant 0 : index
    %c0_7 = arith.constant 0 : index
    %6 = vector.load %arg4[%c0_5, %c0_6, %c0_7] : memref<1x32x72xbf16, #tpu.memory_space<vmem>>, vector<1x32x72xbf16>
    %7 = vector.shape_cast %6 : vector<1x32x72xbf16> to vector<32x72xbf16>
    %cst = arith.constant dense<0.000000e+00> : vector<256x72xf32>
    %8 = tpu.matmul %5, %7, %cst {dimension_numbers = #tpu.dot_dimension_numbers<[1], [0], [0], [1], [0, 0, 1, 1], [], []>} : vector<256x32xbf16>, vector<32x72xbf16>, vector<256x72xf32> -> vector<256x72xf32>
    %9 = arith.addf %3, %8 : vector<256x72xf32>
    %c0_8 = arith.constant 0 : index
    %c0_9 = arith.constant 0 : index
    %10 = vector.load %arg7[%c0_8, %c0_9] : memref<256x72xf32, #tpu.memory_space<vmem>>, vector<256x72xf32>
    tpu.vector_store %arg7[%c0_8, %c0_9], %9 {strides = array<i32>} : memref<256x72xf32, #tpu.memory_space<vmem>>, vector<256x72xf32>,
    %c8_i32 = arith.constant 8 : i32
    %11 = arith.cmpi eq, %arg2, %c8_i32 : i32
    %12 = arith.extui %11 : i1 to i32
    %c0_i32_10 = arith.constant 0 : i32
    %13 = arith.cmpi ne, %12, %c0_i32_10 : i32
    scf.if %13 {
      %c0_11 = arith.constant 0 : index
      %c0_12 = arith.constant 0 : index
      %14 = vector.load %arg7[%c0_11, %c0_12] : memref<256x72xf32, #tpu.memory_space<vmem>>, vector<256x72xf32>
      %c0_13 = arith.constant 0 : index
      %c0_14 = arith.constant 0 : index
      %15 = vector.load %arg5[%c0_13, %c0_14] : memref<1x72xf32, #tpu.memory_space<vmem>>, vector<1x72xf32>
      %16 = vector.broadcast %15 : vector<1x72xf32> to vector<256x72xf32>
      %17 = arith.addf %14, %16 : vector<256x72xf32>
      %cst_15 = arith.constant 0.000000e+00 : f32
      %18 = vector.broadcast %cst_15 : f32 to vector<256x72xf32>
      %19 = arith.maximumf %17, %18 : vector<256x72xf32>
      %20 = arith.truncf %19 : vector<256x72xf32> to vector<256x72xbf16>
      %c0_16 = arith.constant 0 : index
      %c0_17 = arith.constant 0 : index
      %21 = vector.load %arg6[%c0_16, %c0_17] : memref<256x72xbf16, #tpu.memory_space<vmem>>, vector<256x72xbf16>
      tpu.vector_store %arg6[%c0_16, %c0_17], %20 {strides = array<i32>} : memref<256x72xbf16, #tpu.memory_space<vmem>>, vector<256x72xbf16>,
    } else {
    }
    return
  }
  func.func @transform_0(%arg0: i32, %arg1: i32, %arg2: i32) -> (i32, i32, i32) {
    %c0_i32 = arith.constant 0 : i32
    %c0_i32_0 = arith.constant 0 : i32
    return %arg2, %arg0, %c0_i32 : i32, i32, i32
  }
  func.func @transform_1(%arg0: i32, %arg1: i32, %arg2: i32) -> (i32, i32, i32) {
    %c0_i32 = arith.constant 0 : i32
    %c0_i32_0 = arith.constant 0 : i32
    return %arg2, %c0_i32, %arg1 : i32, i32, i32
  }
  func.func @transform_2(%arg0: i32, %arg1: i32, %arg2: i32) -> (i32, i32) {
    %c0_i32 = arith.constant 0 : i32
    %c0_i32_0 = arith.constant 0 : i32
    return %c0_i32, %arg1 : i32, i32
  }
  func.func @transform_3(%arg0: i32, %arg1: i32, %arg2: i32) -> (i32, i32) {
    %c0_i32 = arith.constant 0 : i32
    return %arg0, %arg1 : i32, i32
  }
}

</mosaic_0001>

<bundles_post_ra>
// kernel: layer_forward.9
= control target key start
LH: loop header
LB: loop body
LE: loop exit
PB: predicated region body
PF: predicated region fallthrough
CT: control target
= control target key end

     0   :  { %s1799_s12 = smov 0   ;;  %s1801_s13 = smov 0   ;;  %s2336_s0 = inlined_call_operand.vmem [shape: bf16[1,2048,64], index: 0, kind: input, shape index: {}]   ;;  %s2337_s1 = inlined_call_operand.vmem [shape: bf16[1,64,32], index: 1, kind: input, shape index: {}]   ;;  %s2338_s2 = inlined_call_operand.vmem [shape: f32[1,32], index: 2, kind: input, shape index: {}]   ;;  %s2339_s3 = inlined_call_operand.vmem [shape: bf16[2048,32], index: 3, kind: output, shape index: {}]  }
   0x1   :  { %s1803_s14 = smov 0  }
   0x2 LB: > { %s32_s15 = sadd.s32 1, %s1772_s13  ;;  %p1496_p0 = scmp.ge.s32.totalorder %s1776_s14, 1  ;;  %s1776_s14 = sphi %s1803_s14, %s13_s14   ;;  %s1772_s13 = sphi %s1801_s13, %s2341_s13   ;;  %s1768_s12 = sphi %s1799_s12, %s2340_s12  }
   0x3   : > { %p34_p1 = scmp.ge.s32.totalorder %s32_s15, 4  ;;  %p188_p2 = scmp.lt.s32.totalorder %s1776_s14, 5 }
   0x5   : > { %s2343_s15 = smov (%p34_p1, %s32_s15), 0  ;;  %p189_p3 = pnand %p1496_p0, %p188_p2 }
   0x6   : > { %s1497_s18 = sshll.u32 (!%p189_p3), %s1768_s12, 6 }
   0x7   : > { %192 = sbr.rel (%p189_p3) target bundleno = 305 (0x131), region = 32  ;;  %p233_p4 = scmp.lt.s32.totalorder (!%p189_p3), %s1497_s18, 255 }
   0xc   : > { %v1714_v0 = vld [vmem:[%s2337_s1 + $0x18] sm:$0xff]  ;;  %v1713_v1 = vld [vmem:[%s2337_s1 + $0x10] sm:$0xff]  ;;  %s2345_s18 = smov (!%p233_p4, %s1497_s18), 255  ;;  %v1712_v2 = vld [vmem:[%s2337_s1 + $0x8] sm:$0xff]  ;;  %vm650_vm0 = vcmask 523264   ;;  %vm265_vm1 = vcmask 261120  }
   0xd   : > { %751 = vmatpush.bf16.msra.mxu0 %v1714_v0  ;;  %1715 = vmatpush.bf16.msra.mxu1 %v1714_v0  ;;  %s1498_s23 = sshll.u32 %s2345_s18, 2  ;;  %v1711_v3 = vld [vmem:[%s2337_s1] sm:$0xff]  ;;  %v1778_v28 = vmov 0.0   ;;  %vm1308_vm2 = vcmask 257024  }
   0xe   : > { %1716 = vmatpush.bf16.msra.mxu2 %v1714_v0  ;;  %1717 = vmatpush.bf16.msra.mxu3 %v1714_v0  ;;  %s1837_s28 = scalar_lea.vmem %s2336_s0, %s1498_s23  ;;  %266 = vst.msk [vmem:[#allocation2] sm:$0xff] %vm265_vm1, %v1778_v28  ;;  %v2005_v41 = vld [vmem:[%s2338_s2] ss:$0 sm:$0xff]  ;;  %s2027_s6 = scalar_lea.vmem %s2339_s3, %s1498_s23 }
   0xf   : > { %v1679_v4 = vld [vmem:[%s1837_s28] sm:$0xff]  ;;  %v1680_v8 = vld [vmem:[%s1837_s28 + $0x8] sm:$0xff]  ;;  %v1681_v12 = vld [vmem:[%s1837_s28 + $0x10] sm:$0xff]  ;;  %267 = vst.msk [vmem:[#allocation2 + $0x8] sm:$0xff] %vm265_vm1, %v1778_v28 }
  0x10   : > { %v1687_v5 = vld [vmem:[%s1837_s28 + $0x40] sm:$0xff]  ;;  %v1688_v9 = vld [vmem:[%s1837_s28 + $0x48] sm:$0xff]  ;;  %v1689_v13 = vld [vmem:[%s1837_s28 + $0x50] sm:$0xff]  ;;  %268 = vst.msk [vmem:[#allocation2 + $0x10] sm:$0xff] %vm265_vm1, %v1778_v28 }
  0x11   : > { %752 = vmatpush.bf16.msra.mxu0 %v1713_v1  ;;  %1718 = vmatpush.bf16.msra.mxu1 %v1713_v1  ;;  %v1695_v6 = vld [vmem:[%s1837_s28 + $0x80] sm:$0xff]  ;;  %v1696_v10 = vld [vmem:[%s1837_s28 + $0x88] sm:$0xff]  ;;  %v1697_v14 = vld [vmem:[%s1837_s28 + $0x90] sm:$0xff]  ;;  %269 = vst.msk [vmem:[#allocation2 + $0x18] sm:$0xff] %vm265_vm1, %v1778_v28 }
  0x12   : > { %1719 = vmatpush.bf16.msra.mxu2 %v1713_v1  ;;  %1720 = vmatpush.bf16.msra.mxu3 %v1713_v1  ;;  %v1703_v7 = vld [vmem:[%s1837_s28 + $0xc0] sm:$0xff]  ;;  %v1704_v11 = vld [vmem:[%s1837_s28 + $0xc8] sm:$0xff]  ;;  %v1705_v15 = vld [vmem:[%s1837_s28 + $0xd0] sm:$0xff]  ;;  %270 = vst.msk [vmem:[#allocation2 + $0x20] sm:$0xff] %vm265_vm1, %v1778_v28 }
  0x13   : > { %v1682_v16 = vld [vmem:[%s1837_s28 + $0x18] sm:$0xff]  ;;  %v1683_v20 = vld [vmem:[%s1837_s28 + $0x20] sm:$0xff]  ;;  %v1684_v24 = vld [vmem:[%s1837_s28 + $0x28] sm:$0xff]  ;;  %271 = vst.msk [vmem:[#allocation2 + $0x28] sm:$0xff] %vm265_vm1, %v1778_v28 }
  0x14   : > { %v1690_v17 = vld [vmem:[%s1837_s28 + $0x58] sm:$0xff]  ;;  %v1691_v21 = vld [vmem:[%s1837_s28 + $0x60] sm:$0xff]  ;;  %v1692_v25 = vld [vmem:[%s1837_s28 + $0x68] sm:$0xff]  ;;  %272 = vst.msk [vmem:[#allocation2 + $0x30] sm:$0xff] %vm265_vm1, %v1778_v28 }
  0x15   : > { %753 = vmatpush.bf16.msra.mxu0 %v1712_v2  ;;  %1721 = vmatpush.bf16.msra.mxu1 %v1712_v2  ;;  %v1698_v18 = vld [vmem:[%s1837_s28 + $0x98] sm:$0xff]  ;;  %v1699_v22 = vld [vmem:[%s1837_s28 + $0xa0] sm:$0xff]  ;;  %v1700_v26 = vld [vmem:[%s1837_s28 + $0xa8] sm:$0xff]  ;;  %273 = vst.msk [vmem:[#allocation2 + $0x38] sm:$0xff] %vm265_vm1, %v1778_v28 }
  0x16   : > { %1722 = vmatpush.bf16.msra.mxu2 %v1712_v2  ;;  %1723 = vmatpush.bf16.msra.mxu3 %v1712_v2  ;;  %v1706_v19 = vld [vmem:[%s1837_s28 + $0xd8] sm:$0xff]  ;;  %v1707_v23 = vld [vmem:[%s1837_s28 + $0xe0] sm:$0xff]  ;;  %v1708_v27 = vld [vmem:[%s1837_s28 + $0xe8] sm:$0xff]  ;;  %274 = vst.msk [vmem:[#allocation2 + $0x40] sm:$0xff] %vm265_vm1, %v1778_v28 }
  0x17   : > { %275 = vst.msk [vmem:[#allocation2 + $0x48] sm:$0xff] %vm265_vm1, %v1778_v28  ;;  %v1685_v29 = vld [vmem:[%s1837_s28 + $0x30] sm:$0xff]  ;;  %v1686_v33 = vld [vmem:[%s1837_s28 + $0x38] sm:$0xff]  ;;  %v330_v37 = vld [vmem:[#allocation2] sm:$0xff] }
  0x18   : > { %v1693_v30 = vld [vmem:[%s1837_s28 + $0x70] sm:$0xff]  ;;  %276 = vst.msk [vmem:[#allocation2 + $0x50] sm:$0xff] %vm265_vm1, %v1778_v28  ;;  %v1694_v34 = vld [vmem:[%s1837_s28 + $0x78] sm:$0xff]  ;;  %v331_v58 = vld [vmem:[#allocation2 + $0x8] sm:$0xff] }
  0x19   : > { %754 = vmatpush.bf16.msra.mxu0 %v1711_v3  ;;  %1724 = vmatpush.bf16.msra.mxu1 %v1711_v3  ;;  %v1701_v31 = vld [vmem:[%s1837_s28 + $0xb0] sm:$0xff]  ;;  %277 = vst.msk [vmem:[#allocation2 + $0x58] sm:$0xff] %vm265_vm1, %v1778_v28  ;;  %v1702_v35 = vld [vmem:[%s1837_s28 + $0xb8] sm:$0xff] }
  0x1a   : > { %1725 = vmatpush.bf16.msra.mxu2 %v1711_v3  ;;  %1726 = vmatpush.bf16.msra.mxu3 %v1711_v3  ;;  %v1709_v32 = vld [vmem:[%s1837_s28 + $0xf0] sm:$0xff]  ;;  %278 = vst.msk [vmem:[#allocation2 + $0x60] sm:$0xff] %vm265_vm1, %v1778_v28  ;;  %v1710_v36 = vld [vmem:[%s1837_s28 + $0xf8] sm:$0xff] }
  0x1b   : > { %279 = vst.msk [vmem:[#allocation2 + $0x68] sm:$0xff] %vm265_vm1, %v1778_v28  ;;  %v332_v2 = vld [vmem:[#allocation2 + $0x10] sm:$0xff] }
  0x1c   : > { %1645 = vmatmul.msk.bf16.vlgmr.msra.gmra.mxu0 %vm650_vm0, %v1679_v4  ;;  %1653 = vmatmul.msk.bf16.vlgmr.msra.gmra.mxu1 %vm650_vm0, %v1687_v5  ;;  %280 = vst.msk [vmem:[#allocation2 + $0x70] sm:$0xff] %vm265_vm1, %v1778_v28 }
  0x1d   : > { %1661 = vmatmul.msk.bf16.vlgmr.msra.gmra.mxu2 %vm650_vm0, %v1695_v6  ;;  %1669 = vmatmul.msk.bf16.vlgmr.msra.gmra.mxu3 %vm650_vm0, %v1703_v7  ;;  %281 = vst.msk [vmem:[#allocation2 + $0x78] sm:$0xff] %vm265_vm1, %v1778_v28 }
  0x1e   : > { %282 = vst.msk [vmem:[#allocation2 + $0x80] sm:$0xff] %vm265_vm1, %v1778_v28 }
  0x1f   : > { %283 = vst.msk [vmem:[#allocation2 + $0x88] sm:$0xff] %vm265_vm1, %v1778_v28 }
  0x20   : > { %284 = vst.msk [vmem:[#allocation2 + $0x90] sm:$0xff] %vm265_vm1, %v1778_v28 }
  0x21   : > { %285 = vst.msk [vmem:[#allocation2 + $0x98] sm:$0xff] %vm265_vm1, %v1778_v28 }
  0x22   : > { %286 = vst.msk [vmem:[#allocation2 + $0xa0] sm:$0xff] %vm265_vm1, %v1778_v28 }
  0x23   : > { %287 = vst.msk [vmem:[#allocation2 + $0xa8] sm:$0xff] %vm265_vm1, %v1778_v28 }
  0x24   : > { %288 = vst.msk [vmem:[#allocation2 + $0xb0] sm:$0xff] %vm265_vm1, %v1778_v28 }
  0x25   : > { %289 = vst.msk [vmem:[#allocation2 + $0xb8] sm:$0xff] %vm265_vm1, %v1778_v28  ;;  %v346_v52 = vld [vmem:[#allocation2 + $0x80] sm:$0xff] }
  0x26   : > { %290 = vst.msk [vmem:[#allocation2 + $0xc0] sm:$0xff] %vm265_vm1, %v1778_v28  ;;  %v347_v60 = vld [vmem:[#allocation2 + $0x88] sm:$0xff] }
  0x27   : > { %291 = vst.msk [vmem:[#allocation2 + $0xc8] sm:$0xff] %vm265_vm1, %v1778_v28  ;;  %v348_v6 = vld [vmem:[#allocation2 + $0x90] sm:$0xff] }
  0x28   : > { %292 = vst.msk [vmem:[#allocation2 + $0xd0] sm:$0xff] %vm265_vm1, %v1778_v28 }
  0x29   : > { %293 = vst.msk [vmem:[#allocation2 + $0xd8] sm:$0xff] %vm265_vm1, %v1778_v28 }
  0x2a   : > { %294 = vst.msk [vmem:[#allocation2 + $0xe0] sm:$0xff] %vm265_vm1, %v1778_v28 }
  0x2b   : > { %295 = vst.msk [vmem:[#allocation2 + $0xe8] sm:$0xff] %vm265_vm1, %v1778_v28 }
  0x2c   : > { %1646 = vmatmul.msk.bf16.gmra.mxu0 %vm650_vm0, %v1680_v8  ;;  %1654 = vmatmul.msk.bf16.gmra.mxu1 %vm650_vm0, %v1688_v9  ;;  %296 = vst.msk [vmem:[#allocation2 + $0xf0] sm:$0xff] %vm265_vm1, %v1778_v28 }
  0x2d   : > { %1662 = vmatmul.msk.bf16.gmra.mxu2 %vm650_vm0, %v1696_v10  ;;  %1670 = vmatmul.msk.bf16.gmra.mxu3 %vm650_vm0, %v1704_v11  ;;  %297 = vst.msk [vmem:[#allocation2 + $0xf8] sm:$0xff] %vm265_vm1, %v1778_v28 }
  0x2e   : > { %298 = vst.msk [vmem:[#allocation2 + $0x100] sm:$0xff] %vm265_vm1, %v1778_v28 }
  0x2f   : > { %299 = vst.msk [vmem:[#allocation2 + $0x108] sm:$0xff] %vm265_vm1, %v1778_v28 }
  0x30   : > { %300 = vst.msk [vmem:[#allocation2 + $0x110] sm:$0xff] %vm265_vm1, %v1778_v28 }
  0x31   : > { %301 = vst.msk [vmem:[#allocation2 + $0x118] sm:$0xff] %vm265_vm1, %v1778_v28 }
  0x32   : > { %302 = vst.msk [vmem:[#allocation2 + $0x120] sm:$0xff] %vm265_vm1, %v1778_v28 }
  0x33   : > { %303 = vst.msk [vmem:[#allocation2 + $0x128] sm:$0xff] %vm265_vm1, %v1778_v28 }
  0x34   : > { %304 = vst.msk [vmem:[#allocation2 + $0x130] sm:$0xff] %vm265_vm1, %v1778_v28 }
  0x35   : > { %305 = vst.msk [vmem:[#allocation2 + $0x138] sm:$0xff] %vm265_vm1, %v1778_v28  ;;  %v362_v55 = vld [vmem:[#allocation2 + $0x100] sm:$0xff] }
  0x36   : > { %306 = vst.msk [vmem:[#allocation2 + $0x140] sm:$0xff] %vm265_vm1, %v1778_v28  ;;  %v363_v62 = vld [vmem:[#allocation2 + $0x108] sm:$0xff] }
  0x37   : > { %307 = vst.msk [vmem:[#allocation2 + $0x148] sm:$0xff] %vm265_vm1, %v1778_v28  ;;  %v364_v10 = vld [vmem:[#allocation2 + $0x110] sm:$0xff] }
  0x38   : > { %308 = vst.msk [vmem:[#allocation2 + $0x150] sm:$0xff] %vm265_vm1, %v1778_v28 }
  0x39   : > { %309 = vst.msk [vmem:[#allocation2 + $0x158] sm:$0xff] %vm265_vm1, %v1778_v28 }
  0x3a   : > { %310 = vst.msk [vmem:[#allocation2 + $0x160] sm:$0xff] %vm265_vm1, %v1778_v28 }
  0x3b   : > { %311 = vst.msk [vmem:[#allocation2 + $0x168] sm:$0xff] %vm265_vm1, %v1778_v28 }
  0x3c   : > { %1647 = vmatmul.msk.bf16.gmra.mxu0 %vm650_vm0, %v1681_v12  ;;  %1655 = vmatmul.msk.bf16.gmra.mxu1 %vm650_vm0, %v1689_v13  ;;  %312 = vst.msk [vmem:[#allocation2 + $0x170] sm:$0xff] %vm265_vm1, %v1778_v28 }
  0x3d   : > { %1663 = vmatmul.msk.bf16.gmra.mxu2 %vm650_vm0, %v1697_v14  ;;  %1671 = vmatmul.msk.bf16.gmra.mxu3 %vm650_vm0, %v1705_v15  ;;  %313 = vst.msk [vmem:[#allocation2 + $0x178] sm:$0xff] %vm265_vm1, %v1778_v28  ;;  %v333_v14 = vld [vmem:[#allocation2 + $0x18] sm:$0xff] }
  0x3e   : > { %314 = vst.msk [vmem:[#allocation2 + $0x180] sm:$0xff] %vm265_vm1, %v1778_v28 }
  0x3f   : > { %315 = vst.msk [vmem:[#allocation2 + $0x188] sm:$0xff] %vm265_vm1, %v1778_v28 }
  0x40   : > { %316 = vst.msk [vmem:[#allocation2 + $0x190] sm:$0xff] %vm265_vm1, %v1778_v28 }
  0x41   : > { %317 = vst.msk [vmem:[#allocation2 + $0x198] sm:$0xff] %vm265_vm1, %v1778_v28 }
  0x42   : > { %318 = vst.msk [vmem:[#allocation2 + $0x1a0] sm:$0xff] %vm265_vm1, %v1778_v28 }
  0x43   : > { %319 = vst.msk [vmem:[#allocation2 + $0x1a8] sm:$0xff] %vm265_vm1, %v1778_v28 }
  0x44   : > { %320 = vst.msk [vmem:[#allocation2 + $0x1b0] sm:$0xff] %vm265_vm1, %v1778_v28 }
  0x45   : > { %321 = vst.msk [vmem:[#allocation2 + $0x1b8] sm:$0xff] %vm265_vm1, %v1778_v28  ;;  %v378_v56 = vld [vmem:[#allocation2 + $0x180] sm:$0xff] }
  0x46   : > { %322 = vst.msk [vmem:[#allocation2 + $0x1c0] sm:$0xff] %vm265_vm1, %v1778_v28  ;;  %v379_v0 = vld [vmem:[#allocation2 + $0x188] sm:$0xff] }
  0x47   : > { %323 = vst.msk [vmem:[#allocation2 + $0x1c8] sm:$0xff] %vm265_vm1, %v1778_v28  ;;  %v380_v12 = vld [vmem:[#allocation2 + $0x190] sm:$0xff] }
  0x48   : > { %324 = vst.msk [vmem:[#allocation2 + $0x1d0] sm:$0xff] %vm265_vm1, %v1778_v28 }
  0x49   : > { %325 = vst.msk [vmem:[#allocation2 + $0x1d8] sm:$0xff] %vm265_vm1, %v1778_v28 }
  0x4a   : > { %326 = vst.msk [vmem:[#allocation2 + $0x1e0] sm:$0xff] %vm265_vm1, %v1778_v28 }
  0x4b   : > { %327 = vst.msk [vmem:[#allocation2 + $0x1e8] sm:$0xff] %vm265_vm1, %v1778_v28 }
  0x4c   : > { %1648 = vmatmul.msk.bf16.gmra.mxu0 %vm650_vm0, %v1682_v16  ;;  %1656 = vmatmul.msk.bf16.gmra.mxu1 %vm650_vm0, %v1690_v17  ;;  %328 = vst.msk [vmem:[#allocation2 + $0x1f0] sm:$0xff] %vm265_vm1, %v1778_v28  ;;  %v349_v16 = vld [vmem:[#allocation2 + $0x98] sm:$0xff] }
  0x4d   : > { %1664 = vmatmul.msk.bf16.gmra.mxu2 %vm650_vm0, %v1698_v18  ;;  %1672 = vmatmul.msk.bf16.gmra.mxu3 %vm650_vm0, %v1706_v19  ;;  %329 = vst.msk [vmem:[#allocation2 + $0x1f8] sm:$0xff] %vm265_vm1, %v1778_v28  ;;  %v365_v18 = vld [vmem:[#allocation2 + $0x118] sm:$0xff] }
  0x5c   : > { %1649 = vmatmul.msk.bf16.gmra.mxu0 %vm650_vm0, %v1683_v20  ;;  %1657 = vmatmul.msk.bf16.gmra.mxu1 %vm650_vm0, %v1691_v21 }
  0x5d   : > { %1665 = vmatmul.msk.bf16.gmra.mxu2 %vm650_vm0, %v1699_v22  ;;  %1673 = vmatmul.msk.bf16.gmra.mxu3 %vm650_vm0, %v1707_v23 }
  0x6c   : > { %1650 = vmatmul.msk.bf16.gmra.mxu0 %vm650_vm0, %v1684_v24  ;;  %1658 = vmatmul.msk.bf16.gmra.mxu1 %vm650_vm0, %v1692_v25 }
  0x6d   : > { %1666 = vmatmul.msk.bf16.gmra.mxu2 %vm650_vm0, %v1700_v26  ;;  %1674 = vmatmul.msk.bf16.gmra.mxu3 %vm650_vm0, %v1708_v27 }
  0x7c   : > { %1651 = vmatmul.msk.bf16.gmra.mxu0 %vm650_vm0, %v1685_v29  ;;  %1659 = vmatmul.msk.bf16.gmra.mxu1 %vm650_vm0, %v1693_v30 }
  0x7d   : > { %1667 = vmatmul.msk.bf16.gmra.mxu2 %vm650_vm0, %v1701_v31  ;;  %1675 = vmatmul.msk.bf16.gmra.mxu3 %vm650_vm0, %v1709_v32 }
  0x8c   : > { %1652 = vmatmul.msk.bf16.gmra.mxu0 %vm650_vm0, %v1686_v33  ;;  %1660 = vmatmul.msk.bf16.gmra.mxu1 %vm650_vm0, %v1694_v34 }
  0x8d   : > { %1668 = vmatmul.msk.bf16.gmra.mxu2 %vm650_vm0, %v1702_v35  ;;  %1676 = vmatmul.msk.bf16.gmra.mxu3 %vm650_vm0, %v1710_v36 }
  0x99   : > { %v756_v38 = vpop.f32.mrf.mxu0  ;;  %v796_v39 = vpop.f32.mrf.mxu1 }
  0x9a   : > { %v916_v40 = vadd.f32 %v756_v38, %v330_v37  ;;  %v932_v57 = vadd.f32 %v796_v39, %v346_v52 }
  0x9c   : > { %981 = vst.msk [vmem:[#allocation2] sm:$0xff] %vm265_vm1, %v916_v40 }
  0x9d   : > { %997 = vst.msk [vmem:[#allocation2 + $0x80] sm:$0xff] %vm265_vm1, %v932_v57 }
  0xa0   : > { %v836_v42 = vpop.f32.mrf.mxu2  ;;  %v876_v43 = vpop.f32.mrf.mxu3 }
  0xa1   : > { %v758_v44 = vpop.f32.mrf.mxu0  ;;  %v798_v45 = vpop.f32.mrf.mxu1  ;;  %v948_v59 = vadd.f32 %v836_v42, %v362_v55  ;;  %v964_v61 = vadd.f32 %v876_v43, %v378_v56 }
  0xa2   : > { %v917_v63 = vadd.f32 %v758_v44, %v331_v58  ;;  %v933_v1 = vadd.f32 %v798_v45, %v347_v60 }
  0xa3   : > { %v1048_v46 = vld [vmem:[#allocation2] sm:$0xff]  ;;  %1013 = vst.msk [vmem:[#allocation2 + $0x100] sm:$0xff] %vm265_vm1, %v948_v59 }
  0xa4   : > { %v1116_v47 = vadd.f32 %v2005_v41, %v1048_v46  ;;  %1029 = vst.msk [vmem:[#allocation2 + $0x180] sm:$0xff] %vm265_vm1, %v964_v61  ;;  %v1064_v19 = vld [vmem:[#allocation2 + $0x80] sm:$0xff] }
  0xa5   : > { %982 = vst.msk [vmem:[#allocation2 + $0x8] sm:$0xff] %vm265_vm1, %v917_v63  ;;  %v1132_v21 = vadd.f32 %v2005_v41, %v1064_v19 }
  0xa6   : > { %v1180_v48 = vmax.f32 %v1116_v47, 0.0  ;;  %998 = vst.msk [vmem:[#allocation2 + $0x88] sm:$0xff] %vm265_vm1, %v933_v1 }
  0xa7   : > { %v1196_v31 = vmax.f32 %v1132_v21, 0.0 }
  0xa8   : > { %v1244_v49 = vpack.c.bf16 %v1180_v48, %v1180_v48  ;;  %v838_v50 = vpop.f32.mrf.mxu2  ;;  %v878_v51 = vpop.f32.mrf.mxu3 }
  0xa9   : > { %v761_v53 = vpop.f32.mrf.mxu0  ;;  %v801_v54 = vpop.f32.mrf.mxu1  ;;  %v949_v5 = vadd.f32 %v838_v50, %v363_v62  ;;  %v965_v9 = vadd.f32 %v878_v51, %v379_v0  ;;  %v1260_v37 = vpack.c.bf16 %v1196_v31, %v1196_v31 }
  0xaa   : > { %1309 = vst.msk [vmem:[%s2027_s6] sm:$0xf] %vm1308_vm2, %v1244_v49  ;;  %v918_v11 = vadd.f32 %v761_v53, %v332_v2  ;;  %v934_v13 = vadd.f32 %v801_v54, %v348_v6  ;;  %v1080_v22 = vld [vmem:[#allocation2 + $0x100] sm:$0xff] }
  0xab   : > { %1014 = vst.msk [vmem:[#allocation2 + $0x108] sm:$0xff] %vm265_vm1, %v949_v5  ;;  %v1148_v26 = vadd.f32 %v2005_v41, %v1080_v22  ;;  %v1096_v27 = vld [vmem:[#allocation2 + $0x180] sm:$0xff] }
  0xac   : > { %1030 = vst.msk [vmem:[#allocation2 + $0x188] sm:$0xff] %vm265_vm1, %v965_v9  ;;  %v1164_v32 = vadd.f32 %v2005_v41, %v1096_v27  ;;  %v1049_v33 = vld [vmem:[#allocation2 + $0x8] sm:$0xff]  ;;  %v366_v27 = vld [vmem:[#allocation2 + $0x120] sm:$0xff] }
  0xad   : > { %983 = vst.msk [vmem:[#allocation2 + $0x10] sm:$0xff] %vm265_vm1, %v918_v11  ;;  %v1212_v34 = vmax.f32 %v1148_v26, 0.0  ;;  %v1117_v35 = vadd.f32 %v2005_v41, %v1049_v33  ;;  %v1065_v36 = vld [vmem:[#allocation2 + $0x88] sm:$0xff] }
  0xae   : > { %999 = vst.msk [vmem:[#allocation2 + $0x90] sm:$0xff] %vm265_vm1, %v934_v13  ;;  %v1228_v38 = vmax.f32 %v1164_v32, 0.0  ;;  %v1133_v39 = vadd.f32 %v2005_v41, %v1065_v36 }
  0xaf   : > { %v1276_v42 = vpack.c.bf16 %v1212_v34, %v1212_v34  ;;  %v1181_v43 = vmax.f32 %v1117_v35, 0.0  ;;  %1325 = vst.msk [vmem:[%s2027_s6 + $0x40] sm:$0xf] %vm1308_vm2, %v1260_v37  ;;  %v382_v34 = vld [vmem:[#allocation2 + $0x1a0] sm:$0xff] }
  0xb0   : > { %v841_v3 = vpop.f32.mrf.mxu2  ;;  %v881_v4 = vpop.f32.mrf.mxu3  ;;  %v1292_v46 = vpack.c.bf16 %v1228_v38, %v1228_v38  ;;  %v1197_v47 = vmax.f32 %v1133_v39, 0.0  ;;  %v335_v38 = vld [vmem:[#allocation2 + $0x28] sm:$0xff] }
  0xb1   : > { %v763_v7 = vpop.f32.mrf.mxu0  ;;  %v803_v8 = vpop.f32.mrf.mxu1  ;;  %v950_v15 = vadd.f32 %v841_v3, %v364_v10  ;;  %v966_v17 = vadd.f32 %v881_v4, %v380_v12  ;;  %1341 = vst.msk [vmem:[%s2027_s6 + $0x80] sm:$0xf] %vm1308_vm2, %v1276_v42  ;;  %v1245_v50 = vpack.c.bf16 %v1181_v43, %v1181_v43  ;;  %v367_v42 = vld [vmem:[#allocation2 + $0x128] sm:$0xff] }
  0xb2   : > { %v919_v20 = vadd.f32 %v763_v7, %v333_v14  ;;  %v935_v23 = vadd.f32 %v803_v8, %v349_v16  ;;  %v1081_v40 = vld [vmem:[#allocation2 + $0x108] sm:$0xff]  ;;  %1357 = vst.msk [vmem:[%s2027_s6 + $0xc0] sm:$0xf] %vm1308_vm2, %v1292_v46  ;;  %v1261_v54 = vpack.c.bf16 %v1197_v47, %v1197_v47  ;;  %v352_v46 = vld [vmem:[#allocation2 + $0xb0] sm:$0xff] }
  0xb3   : > { %1015 = vst.msk [vmem:[#allocation2 + $0x110] sm:$0xff] %vm265_vm1, %v950_v15  ;;  %v1149_v44 = vadd.f32 %v2005_v41, %v1081_v40  ;;  %v1097_v45 = vld [vmem:[#allocation2 + $0x188] sm:$0xff] }
  0xb4   : > { %1031 = vst.msk [vmem:[#allocation2 + $0x190] sm:$0xff] %vm265_vm1, %v966_v17  ;;  %v1165_v48 = vadd.f32 %v2005_v41, %v1097_v45  ;;  %v1050_v49 = vld [vmem:[#allocation2 + $0x10] sm:$0xff]  ;;  %v381_v17 = vld [vmem:[#allocation2 + $0x198] sm:$0xff] }
  0xb5   : > { %984 = vst.msk [vmem:[#allocation2 + $0x18] sm:$0xff] %vm265_vm1, %v919_v20  ;;  %v1213_v51 = vmax.f32 %v1149_v44, 0.0  ;;  %v1118_v52 = vadd.f32 %v2005_v41, %v1050_v49  ;;  %v1066_v53 = vld [vmem:[#allocation2 + $0x90] sm:$0xff]  ;;  %v334_v20 = vld [vmem:[#allocation2 + $0x20] sm:$0xff] }
  0xb6   : > { %1000 = vst.msk [vmem:[#allocation2 + $0x98] sm:$0xff] %vm265_vm1, %v935_v23  ;;  %v1229_v55 = vmax.f32 %v1165_v48, 0.0  ;;  %v1134_v56 = vadd.f32 %v2005_v41, %v1066_v53  ;;  %v350_v23 = vld [vmem:[#allocation2 + $0xa0] sm:$0xff]  ;;  %v336_v45 = vld [vmem:[#allocation2 + $0x30] sm:$0xff] }
  0xb7   : > { %1310 = vst.msk [vmem:[%s2027_s6 + $0x4] sm:$0xf] %vm1308_vm2, %v1245_v50  ;;  %v1277_v60 = vpack.c.bf16 %v1213_v51, %v1213_v51  ;;  %v1182_v61 = vmax.f32 %v1118_v52, 0.0  ;;  %v368_v48 = vld [vmem:[#allocation2 + $0x130] sm:$0xff] }
  0xb8   : > { %v843_v24 = vpop.f32.mrf.mxu2  ;;  %v2057_v25 = vpop.f32.mrf.mxu3  ;;  %1326 = vst.msk [vmem:[%s2027_s6 + $0x44] sm:$0xf] %vm1308_vm2, %v1261_v54  ;;  %v1293_v2 = vpack.c.bf16 %v1229_v55, %v1229_v55  ;;  %v1198_v3 = vmax.f32 %v1134_v56, 0.0  ;;  %v384_v52 = vld [vmem:[#allocation2 + $0x1b0] sm:$0xff]  ;;  %v337_v56 = vld [vmem:[#allocation2 + $0x38] sm:$0xff] }
  0xb9   : > { %v951_v28 = vadd.f32 %v843_v24, %v365_v18  ;;  %v2061_v29 = vpop.f32.mrf.mxu0  ;;  %v2063_v30 = vpop.f32.mrf.mxu1  ;;  %1342 = vst.msk [vmem:[%s2027_s6 + $0x84] sm:$0xf] %vm1308_vm2, %v1277_v60  ;;  %v1246_v6 = vpack.c.bf16 %v1182_v61, %v1182_v61  ;;  %v967_v26 = vadd.f32 %v2057_v25, %v381_v17  ;;  %v351_v25 = vld [vmem:[#allocation2 + $0xa8] sm:$0xff] }
  0xba   : > { %v1082_v57 = vld [vmem:[#allocation2 + $0x110] sm:$0xff]  ;;  %1358 = vst.msk [vmem:[%s2027_s6 + $0xc4] sm:$0xf] %vm1308_vm2, %v1293_v2  ;;  %v1262_v10 = vpack.c.bf16 %v1198_v3, %v1198_v3  ;;  %v920_v33 = vadd.f32 %v2061_v29, %v334_v20  ;;  %v936_v37 = vadd.f32 %v2063_v30, %v350_v23  ;;  %v383_v29 = vld [vmem:[#allocation2 + $0x1a8] sm:$0xff] }
  0xbb   : > { %1016 = vst.msk [vmem:[#allocation2 + $0x118] sm:$0xff] %vm265_vm1, %v951_v28  ;;  %v1150_v62 = vadd.f32 %v2005_v41, %v1082_v57  ;;  %v1098_v63 = vld [vmem:[#allocation2 + $0x190] sm:$0xff] }
  0xbc   : > { %v1166_v4 = vadd.f32 %v2005_v41, %v1098_v63  ;;  %v1051_v5 = vld [vmem:[#allocation2 + $0x18] sm:$0xff]  ;;  %1311 = vst.msk [vmem:[%s2027_s6 + $0x8] sm:$0xf] %vm1308_vm2, %v1246_v6 }
  0xbd   : > { %v1214_v7 = vmax.f32 %v1150_v62, 0.0  ;;  %v1119_v8 = vadd.f32 %v2005_v41, %v1051_v5  ;;  %v1067_v9 = vld [vmem:[#allocation2 + $0x98] sm:$0xff]  ;;  %1327 = vst.msk [vmem:[%s2027_s6 + $0x48] sm:$0xf] %vm1308_vm2, %v1262_v10 }
  0xbe   : > { %v1230_v11 = vmax.f32 %v1166_v4, 0.0  ;;  %v1135_v12 = vadd.f32 %v2005_v41, %v1067_v9  ;;  %1032 = vst.msk [vmem:[#allocation2 + $0x198] sm:$0xff] %vm265_vm1, %v967_v26 }
  0xbf   : > { %v1278_v14 = vpack.c.bf16 %v1214_v7, %v1214_v7  ;;  %v1183_v15 = vmax.f32 %v1119_v8, 0.0  ;;  %985 = vst.msk [vmem:[#allocation2 + $0x20] sm:$0xff] %vm265_vm1, %v920_v33 }
  0xc0   : > { %v846_v58 = vpop.f32.mrf.mxu2  ;;  %v886_v59 = vpop.f32.mrf.mxu3  ;;  %v1294_v18 = vpack.c.bf16 %v1230_v11, %v1230_v11  ;;  %v1199_v19 = vmax.f32 %v1135_v12, 0.0  ;;  %1001 = vst.msk [vmem:[#allocation2 + $0xa0] sm:$0xff] %vm265_vm1, %v936_v37 }
  0xc1   : > { %v768_v0 = vpop.f32.mrf.mxu0  ;;  %v808_v1 = vpop.f32.mrf.mxu1  ;;  %1343 = vst.msk [vmem:[%s2027_s6 + $0x88] sm:$0xf] %vm1308_vm2, %v1278_v14  ;;  %v1247_v21 = vpack.c.bf16 %v1183_v15, %v1183_v15  ;;  %v952_v39 = vadd.f32 %v846_v58, %v366_v27  ;;  %v968_v40 = vadd.f32 %v886_v59, %v382_v34 }
  0xc2   : > { %v1083_v13 = vld [vmem:[#allocation2 + $0x118] sm:$0xff]  ;;  %1359 = vst.msk [vmem:[%s2027_s6 + $0xc8] sm:$0xf] %vm1308_vm2, %v1294_v18  ;;  %v1263_v24 = vpack.c.bf16 %v1199_v19, %v1199_v19  ;;  %v921_v43 = vadd.f32 %v768_v0, %v335_v38  ;;  %v937_v44 = vadd.f32 %v808_v1, %v351_v25 }
  0xc3   : > { %v1151_v16 = vadd.f32 %v2005_v41, %v1083_v13  ;;  %1312 = vst.msk [vmem:[%s2027_s6 + $0xc] sm:$0xf] %vm1308_vm2, %v1247_v21 }
  0xc4   : > { %1328 = vst.msk [vmem:[%s2027_s6 + $0x4c] sm:$0xf] %vm1308_vm2, %v1263_v24 }
  0xc5   : > { %v1215_v22 = vmax.f32 %v1151_v16, 0.0  ;;  %1017 = vst.msk [vmem:[#allocation2 + $0x120] sm:$0xff] %vm265_vm1, %v952_v39  ;;  %v1099_v57 = vld [vmem:[#allocation2 + $0x198] sm:$0xff] }
  0xc6   : > { %1033 = vst.msk [vmem:[#allocation2 + $0x1a0] sm:$0xff] %vm265_vm1, %v968_v40  ;;  %v1167_v59 = vadd.f32 %v2005_v41, %v1099_v57  ;;  %v1052_v60 = vld [vmem:[#allocation2 + $0x20] sm:$0xff] }
  0xc7   : > { %v1279_v32 = vpack.c.bf16 %v1215_v22, %v1215_v22  ;;  %986 = vst.msk [vmem:[#allocation2 + $0x28] sm:$0xff] %vm265_vm1, %v921_v43  ;;  %v1120_v62 = vadd.f32 %v2005_v41, %v1052_v60  ;;  %v1068_v63 = vld [vmem:[#allocation2 + $0xa0] sm:$0xff] }
  0xc8   : > { %v848_v28 = vpop.f32.mrf.mxu2  ;;  %v888_v31 = vpop.f32.mrf.mxu3  ;;  %1002 = vst.msk [vmem:[#allocation2 + $0xa8] sm:$0xff] %vm265_vm1, %v937_v44  ;;  %v1231_v1 = vmax.f32 %v1167_v59, 0.0  ;;  %v1136_v2 = vadd.f32 %v2005_v41, %v1068_v63  ;;  %v369_v59 = vld [vmem:[#allocation2 + $0x138] sm:$0xff] }
  0xc9   : > { %v771_v35 = vpop.f32.mrf.mxu0  ;;  %v811_v36 = vpop.f32.mrf.mxu1  ;;  %1344 = vst.msk [vmem:[%s2027_s6 + $0x8c] sm:$0xf] %vm1308_vm2, %v1279_v32  ;;  %v953_v30 = vadd.f32 %v848_v28, %v367_v42  ;;  %v969_v47 = vadd.f32 %v888_v31, %v383_v29  ;;  %v1184_v4 = vmax.f32 %v1120_v62, 0.0  ;;  %v385_v62 = vld [vmem:[#allocation2 + $0x1b8] sm:$0xff] }
  0xca   : > { %v922_v51 = vadd.f32 %v771_v35, %v336_v45  ;;  %v938_v55 = vadd.f32 %v811_v36, %v352_v46  ;;  %v1295_v7 = vpack.c.bf16 %v1231_v1, %v1231_v1  ;;  %v1200_v8 = vmax.f32 %v1136_v2, 0.0  ;;  %v338_v1 = vld [vmem:[#allocation2 + $0x40] sm:$0xff] }
  0xcb   : > { %1018 = vst.msk [vmem:[#allocation2 + $0x128] sm:$0xff] %vm265_vm1, %v953_v30  ;;  %v1248_v13 = vpack.c.bf16 %v1184_v4, %v1184_v4  ;;  %v354_v4 = vld [vmem:[#allocation2 + $0xc0] sm:$0xff] }
  0xcc   : > { %1034 = vst.msk [vmem:[#allocation2 + $0x1a8] sm:$0xff] %vm265_vm1, %v969_v47  ;;  %v1084_v3 = vld [vmem:[#allocation2 + $0x120] sm:$0xff]  ;;  %v1264_v19 = vpack.c.bf16 %v1200_v8, %v1200_v8 }
  0xcd   : > { %987 = vst.msk [vmem:[#allocation2 + $0x30] sm:$0xff] %vm265_vm1, %v922_v51  ;;  %v1152_v5 = vadd.f32 %v2005_v41, %v1084_v3  ;;  %v1100_v6 = vld [vmem:[#allocation2 + $0x1a0] sm:$0xff] }
  0xce   : > { %1003 = vst.msk [vmem:[#allocation2 + $0xb0] sm:$0xff] %vm265_vm1, %v938_v55  ;;  %v1168_v9 = vadd.f32 %v2005_v41, %v1100_v6  ;;  %v1053_v10 = vld [vmem:[#allocation2 + $0x28] sm:$0xff]  ;;  %v370_v6 = vld [vmem:[#allocation2 + $0x140] sm:$0xff] }
  0xcf   : > { %v1216_v14 = vmax.f32 %v1152_v5, 0.0  ;;  %v1121_v15 = vadd.f32 %v2005_v41, %v1053_v10  ;;  %v1069_v16 = vld [vmem:[#allocation2 + $0xa8] sm:$0xff]  ;;  %1360 = vst.msk [vmem:[%s2027_s6 + $0xcc] sm:$0xf] %vm1308_vm2, %v1295_v7  ;;  %v386_v8 = vld [vmem:[#allocation2 + $0x1c0] sm:$0xff] }
  0xd0   : > { %v851_v49 = vpop.f32.mrf.mxu2  ;;  %v891_v50 = vpop.f32.mrf.mxu3  ;;  %v1232_v20 = vmax.f32 %v1168_v9, 0.0  ;;  %v1137_v21 = vadd.f32 %v2005_v41, %v1069_v16  ;;  %1313 = vst.msk [vmem:[%s2027_s6 + $0x10] sm:$0xf] %vm1308_vm2, %v1248_v13  ;;  %v339_v9 = vld [vmem:[#allocation2 + $0x48] sm:$0xff] }
  0xd1   : > { %v773_v53 = vpop.f32.mrf.mxu0  ;;  %v2118_v54 = vpop.f32.mrf.mxu1  ;;  %v954_v58 = vadd.f32 %v851_v49, %v368_v48  ;;  %v970_v61 = vadd.f32 %v891_v50, %v384_v52  ;;  %v1280_v23 = vpack.c.bf16 %v1216_v14, %v1216_v14  ;;  %v1185_v24 = vmax.f32 %v1121_v15, 0.0  ;;  %1329 = vst.msk [vmem:[%s2027_s6 + $0x50] sm:$0xf] %vm1308_vm2, %v1264_v19  ;;  %v355_v14 = vld [vmem:[#allocation2 + $0xc8] sm:$0xff] }
  0xd2   : > { %v923_v0 = vadd.f32 %v773_v53, %v337_v56  ;;  %v1085_v22 = vld [vmem:[#allocation2 + $0x128] sm:$0xff]  ;;  %v1296_v28 = vpack.c.bf16 %v1232_v20, %v1232_v20  ;;  %v1201_v31 = vmax.f32 %v1137_v21, 0.0  ;;  %v353_v53 = vld [vmem:[#allocation2 + $0xb8] sm:$0xff]  ;;  %v340_v21 = vld [vmem:[#allocation2 + $0x50] sm:$0xff] }
  0xd3   : > { %1019 = vst.msk [vmem:[#allocation2 + $0x130] sm:$0xff] %vm265_vm1, %v954_v58  ;;  %v1153_v26 = vadd.f32 %v2005_v41, %v1085_v22  ;;  %v1101_v27 = vld [vmem:[#allocation2 + $0x1a8] sm:$0xff]  ;;  %v1249_v34 = vpack.c.bf16 %v1185_v24, %v1185_v24 }
  0xd4   : > { %1035 = vst.msk [vmem:[#allocation2 + $0x1b0] sm:$0xff] %vm265_vm1, %v970_v61  ;;  %v1169_v32 = vadd.f32 %v2005_v41, %v1101_v27  ;;  %v1054_v33 = vld [vmem:[#allocation2 + $0x30] sm:$0xff]  ;;  %v1265_v38 = vpack.c.bf16 %v1201_v31, %v1201_v31  ;;  %v371_v19 = vld [vmem:[#allocation2 + $0x148] sm:$0xff] }
  0xd5   : > { %988 = vst.msk [vmem:[#allocation2 + $0x38] sm:$0xff] %vm265_vm1, %v923_v0  ;;  %v1217_v35 = vmax.f32 %v1153_v26, 0.0  ;;  %v1122_v36 = vadd.f32 %v2005_v41, %v1054_v33  ;;  %v1070_v37 = vld [vmem:[#allocation2 + $0xb0] sm:$0xff]  ;;  %v939_v0 = vadd.f32 %v2118_v54, %v353_v53  ;;  %v387_v20 = vld [vmem:[#allocation2 + $0x1c8] sm:$0xff] }
  0xd6   : > { %1345 = vst.msk [vmem:[%s2027_s6 + $0x90] sm:$0xf] %vm1308_vm2, %v1280_v23  ;;  %v1233_v39 = vmax.f32 %v1169_v32, 0.0  ;;  %v1138_v25 = vadd.f32 %v2005_v41, %v1070_v37  ;;  %v356_v23 = vld [vmem:[#allocation2 + $0xd0] sm:$0xff] }
  0xd7   : > { %1361 = vst.msk [vmem:[%s2027_s6 + $0xd0] sm:$0xf] %vm1308_vm2, %v1296_v28  ;;  %v1281_v42 = vpack.c.bf16 %v1217_v35, %v1217_v35  ;;  %v1186_v43 = vmax.f32 %v1122_v36, 0.0  ;;  %v372_v26 = vld [vmem:[#allocation2 + $0x150] sm:$0xff] }
  0xd8   : > { %v2132_v11 = vpop.f32.mrf.mxu2  ;;  %v2134_v12 = vpop.f32.mrf.mxu3  ;;  %1314 = vst.msk [vmem:[%s2027_s6 + $0x14] sm:$0xf] %vm1308_vm2, %v1249_v34  ;;  %v1297_v45 = vpack.c.bf16 %v1233_v39, %v1233_v39  ;;  %v1202_v30 = vmax.f32 %v1138_v25, 0.0 }
  0xd9   : > { %v2138_v17 = vpop.f32.mrf.mxu0  ;;  %v2140_v18 = vpop.f32.mrf.mxu1  ;;  %1330 = vst.msk [vmem:[%s2027_s6 + $0x54] sm:$0xf] %vm1308_vm2, %v1265_v38  ;;  %v1250_v50 = vpack.c.bf16 %v1186_v43, %v1186_v43  ;;  %v955_v3 = vadd.f32 %v2132_v11, %v369_v59  ;;  %v971_v5 = vadd.f32 %v2134_v12, %v385_v62 }
  0xda   : > { %v1086_v40 = vld [vmem:[#allocation2 + $0x130] sm:$0xff]  ;;  %1346 = vst.msk [vmem:[%s2027_s6 + $0x94] sm:$0xf] %vm1308_vm2, %v1281_v42  ;;  %v1266_v57 = vpack.c.bf16 %v1202_v30, %v1202_v30  ;;  %v924_v7 = vadd.f32 %v2138_v17, %v338_v1  ;;  %v940_v54 = vadd.f32 %v2140_v18, %v354_v4 }
  0xdb   : > { %v1154_v29 = vadd.f32 %v2005_v41, %v1086_v40  ;;  %v1102_v44 = vld [vmem:[#allocation2 + $0x1b0] sm:$0xff]  ;;  %1362 = vst.msk [vmem:[%s2027_s6 + $0xd4] sm:$0xf] %vm1308_vm2, %v1297_v45 }
  0xdc   : > { %v1170_v46 = vadd.f32 %v2005_v41, %v1102_v44  ;;  %v1055_v47 = vld [vmem:[#allocation2 + $0x38] sm:$0xff]  ;;  %1315 = vst.msk [vmem:[%s2027_s6 + $0x18] sm:$0xf] %vm1308_vm2, %v1250_v50 }
  0xdd   : > { %v1218_v51 = vmax.f32 %v1154_v29, 0.0  ;;  %v1123_v52 = vadd.f32 %v2005_v41, %v1055_v47  ;;  %1331 = vst.msk [vmem:[%s2027_s6 + $0x58] sm:$0xf] %vm1308_vm2, %v1266_v57 }
  0xde   : > { %v1234_v58 = vmax.f32 %v1170_v46, 0.0  ;;  %1004 = vst.msk [vmem:[#allocation2 + $0xb8] sm:$0xff] %vm265_vm1, %v939_v0 }
  0xdf   : > { %v1282_v60 = vpack.c.bf16 %v1218_v51, %v1218_v51  ;;  %v1187_v61 = vmax.f32 %v1123_v52, 0.0  ;;  %1020 = vst.msk [vmem:[#allocation2 + $0x138] sm:$0xff] %vm265_vm1, %v955_v3 }
  0xe0   : > { %v856_v48 = vpop.f32.mrf.mxu2  ;;  %v896_v49 = vpop.f32.mrf.mxu3  ;;  %v1298_v63 = vpack.c.bf16 %v1234_v58, %v1234_v58  ;;  %1036 = vst.msk [vmem:[#allocation2 + $0x1b8] sm:$0xff] %vm265_vm1, %v971_v5 }
  0xe1   : > { %v778_v55 = vpop.f32.mrf.mxu0  ;;  %v818_v56 = vpop.f32.mrf.mxu1  ;;  %1347 = vst.msk [vmem:[%s2027_s6 + $0x98] sm:$0xf] %vm1308_vm2, %v1282_v60  ;;  %v1251_v2 = vpack.c.bf16 %v1187_v61, %v1187_v61  ;;  %v956_v11 = vadd.f32 %v856_v48, %v370_v6  ;;  %v972_v12 = vadd.f32 %v896_v49, %v386_v8 }
  0xe2   : > { %1363 = vst.msk [vmem:[%s2027_s6 + $0xd8] sm:$0xf] %vm1308_vm2, %v1298_v63  ;;  %v925_v17 = vadd.f32 %v778_v55, %v339_v9  ;;  %v941_v18 = vadd.f32 %v818_v56, %v355_v14 }
  0xe3   : > { %1316 = vst.msk [vmem:[%s2027_s6 + $0x1c] sm:$0xf] %vm1308_vm2, %v1251_v2 }
  0xe4   : > { %989 = vst.msk [vmem:[#allocation2 + $0x40] sm:$0xff] %vm265_vm1, %v924_v7 }
  0xe5   : > { %1005 = vst.msk [vmem:[#allocation2 + $0xc0] sm:$0xff] %vm265_vm1, %v940_v54  ;;  %v1071_v27 = vld [vmem:[#allocation2 + $0xb8] sm:$0xff] }
  0xe6   : > { %1021 = vst.msk [vmem:[#allocation2 + $0x140] sm:$0xff] %vm265_vm1, %v956_v11  ;;  %v1139_v31 = vadd.f32 %v2005_v41, %v1071_v27  ;;  %v1087_v32 = vld [vmem:[#allocation2 + $0x138] sm:$0xff] }
  0xe7   : > { %1037 = vst.msk [vmem:[#allocation2 + $0x1c0] sm:$0xff] %vm265_vm1, %v972_v12  ;;  %v1155_v36 = vadd.f32 %v2005_v41, %v1087_v32  ;;  %v1103_v37 = vld [vmem:[#allocation2 + $0x1b8] sm:$0xff] }
  0xe8   : > { %v858_v10 = vpop.f32.mrf.mxu2  ;;  %v898_v13 = vpop.f32.mrf.mxu3  ;;  %990 = vst.msk [vmem:[#allocation2 + $0x48] sm:$0xff] %vm265_vm1, %v925_v17  ;;  %v1203_v25 = vmax.f32 %v1139_v31, 0.0  ;;  %v1171_v40 = vadd.f32 %v2005_v41, %v1103_v37  ;;  %v373_v37 = vld [vmem:[#allocation2 + $0x158] sm:$0xff] }
  0xe9   : > { %v781_v15 = vpop.f32.mrf.mxu0  ;;  %v821_v16 = vpop.f32.mrf.mxu1  ;;  %v957_v22 = vadd.f32 %v858_v10, %v371_v19  ;;  %v973_v24 = vadd.f32 %v898_v13, %v387_v20  ;;  %1006 = vst.msk [vmem:[#allocation2 + $0xc8] sm:$0xff] %vm265_vm1, %v941_v18  ;;  %v1219_v43 = vmax.f32 %v1155_v36, 0.0 }
  0xea   : > { %v926_v28 = vadd.f32 %v781_v15, %v340_v21  ;;  %v942_v33 = vadd.f32 %v821_v16, %v356_v23  ;;  %v1267_v30 = vpack.c.bf16 %v1203_v25, %v1203_v25  ;;  %v1235_v46 = vmax.f32 %v1171_v40, 0.0  ;;  %v388_v23 = vld [vmem:[#allocation2 + $0x1d0] sm:$0xff] }
  0xeb   : > { %1022 = vst.msk [vmem:[#allocation2 + $0x148] sm:$0xff] %vm265_vm1, %v957_v22  ;;  %v1056_v42 = vld [vmem:[#allocation2 + $0x40] sm:$0xff]  ;;  %v1283_v49 = vpack.c.bf16 %v1219_v43, %v1219_v43  ;;  %v389_v43 = vld [vmem:[#allocation2 + $0x1d8] sm:$0xff] }
  0xec   : > { %1038 = vst.msk [vmem:[#allocation2 + $0x1c8] sm:$0xff] %vm265_vm1, %v973_v24  ;;  %v1124_v29 = vadd.f32 %v2005_v41, %v1056_v42  ;;  %v1072_v44 = vld [vmem:[#allocation2 + $0xc0] sm:$0xff]  ;;  %v1299_v53 = vpack.c.bf16 %v1235_v46, %v1235_v46 }
  0xed   : > { %991 = vst.msk [vmem:[#allocation2 + $0x50] sm:$0xff] %vm265_vm1, %v926_v28  ;;  %v1140_v47 = vadd.f32 %v2005_v41, %v1072_v44  ;;  %v1088_v48 = vld [vmem:[#allocation2 + $0x140] sm:$0xff]  ;;  %v341_v28 = vld [vmem:[#allocation2 + $0x58] sm:$0xff] }
  0xee   : > { %1007 = vst.msk [vmem:[#allocation2 + $0xd0] sm:$0xff] %vm265_vm1, %v942_v33  ;;  %v1188_v50 = vmax.f32 %v1124_v29, 0.0  ;;  %v1156_v51 = vadd.f32 %v2005_v41, %v1088_v48  ;;  %v1104_v52 = vld [vmem:[#allocation2 + $0x1c0] sm:$0xff]  ;;  %v357_v33 = vld [vmem:[#allocation2 + $0xd8] sm:$0xff] }
  0xef   : > { %1332 = vst.msk [vmem:[%s2027_s6 + $0x5c] sm:$0xf] %vm1308_vm2, %v1267_v30  ;;  %v1204_v55 = vmax.f32 %v1140_v47, 0.0  ;;  %v1172_v56 = vadd.f32 %v2005_v41, %v1104_v52  ;;  %v1057_v57 = vld [vmem:[#allocation2 + $0x48] sm:$0xff]  ;;  %v342_v44 = vld [vmem:[#allocation2 + $0x60] sm:$0xff] }
  0xf0   : > { %v861_v34 = vpop.f32.mrf.mxu2  ;;  %v2193_v35 = vpop.f32.mrf.mxu3  ;;  %1348 = vst.msk [vmem:[%s2027_s6 + $0x9c] sm:$0xf] %vm1308_vm2, %v1283_v49  ;;  %v1252_v58 = vpack.c.bf16 %v1188_v50, %v1188_v50  ;;  %v1220_v59 = vmax.f32 %v1156_v51, 0.0  ;;  %v1125_v60 = vadd.f32 %v2005_v41, %v1057_v57  ;;  %v1073_v61 = vld [vmem:[#allocation2 + $0xc8] sm:$0xff]  ;;  %v358_v47 = vld [vmem:[#allocation2 + $0xe0] sm:$0xff] }
  0xf1   : > { %v958_v38 = vadd.f32 %v861_v34, %v372_v26  ;;  %v2197_v39 = vpop.f32.mrf.mxu0  ;;  %v2203_v45 = vpop.f32.mrf.mxu1  ;;  %1364 = vst.msk [vmem:[%s2027_s6 + $0xdc] sm:$0xf] %vm1308_vm2, %v1299_v53  ;;  %v1268_v62 = vpack.c.bf16 %v1204_v55, %v1204_v55  ;;  %v1236_v63 = vmax.f32 %v1172_v56, 0.0  ;;  %v1141_v0 = vadd.f32 %v2005_v41, %v1073_v61  ;;  %v374_v48 = vld [vmem:[#allocation2 + $0x160] sm:$0xff]  ;;  %v343_v51 = vld [vmem:[#allocation2 + $0x68] sm:$0xff] }
  0xf2   : > { %v1089_v1 = vld [vmem:[#allocation2 + $0x148] sm:$0xff]  ;;  %1317 = vst.msk [vmem:[%s2027_s6 + $0x20] sm:$0xf] %vm1308_vm2, %v1252_v58  ;;  %v1284_v4 = vpack.c.bf16 %v1220_v59, %v1220_v59  ;;  %v1189_v5 = vmax.f32 %v1125_v60, 0.0  ;;  %v974_v36 = vadd.f32 %v2193_v35, %v388_v23  ;;  %v927_v42 = vadd.f32 %v2197_v39, %v341_v28  ;;  %v390_v50 = vld [vmem:[#allocation2 + $0x1e0] sm:$0xff] }
  0xf3   : > { %1023 = vst.msk [vmem:[#allocation2 + $0x150] sm:$0xff] %vm265_vm1, %v958_v38  ;;  %v1157_v6 = vadd.f32 %v2005_v41, %v1089_v1  ;;  %v1105_v7 = vld [vmem:[#allocation2 + $0x1c8] sm:$0xff]  ;;  %v1300_v54 = vpack.c.bf16 %v1236_v63, %v1236_v63  ;;  %v1205_v9 = vmax.f32 %v1141_v0, 0.0  ;;  %v943_v29 = vadd.f32 %v2203_v45, %v357_v33 }
  0xf4   : > { %1333 = vst.msk [vmem:[%s2027_s6 + $0x60] sm:$0xf] %vm1308_vm2, %v1268_v62  ;;  %v1173_v10 = vadd.f32 %v2005_v41, %v1105_v7  ;;  %v1058_v13 = vld [vmem:[#allocation2 + $0x50] sm:$0xff]  ;;  %v1253_v11 = vpack.c.bf16 %v1189_v5, %v1189_v5  ;;  %v359_v52 = vld [vmem:[#allocation2 + $0xe8] sm:$0xff] }
  0xf5   : > { %1349 = vst.msk [vmem:[%s2027_s6 + $0xa0] sm:$0xf] %vm1308_vm2, %v1284_v4  ;;  %v1221_v14 = vmax.f32 %v1157_v6, 0.0  ;;  %v1126_v15 = vadd.f32 %v2005_v41, %v1058_v13  ;;  %v1074_v16 = vld [vmem:[#allocation2 + $0xd0] sm:$0xff]  ;;  %v1269_v12 = vpack.c.bf16 %v1205_v9, %v1205_v9  ;;  %v375_v56 = vld [vmem:[#allocation2 + $0x168] sm:$0xff] }
  0xf6   : > { %1365 = vst.msk [vmem:[%s2027_s6 + $0xe0] sm:$0xf] %vm1308_vm2, %v1300_v54  ;;  %v1237_v19 = vmax.f32 %v1173_v10, 0.0  ;;  %v1142_v17 = vadd.f32 %v2005_v41, %v1074_v16  ;;  %v391_v59 = vld [vmem:[#allocation2 + $0x1e8] sm:$0xff]  ;;  %v344_v62 = vld [vmem:[#allocation2 + $0x70] sm:$0xff] }
  0xf7   : > { %1318 = vst.msk [vmem:[%s2027_s6 + $0x24] sm:$0xf] %vm1308_vm2, %v1253_v11  ;;  %v1285_v18 = vpack.c.bf16 %v1221_v14, %v1221_v14  ;;  %v1190_v21 = vmax.f32 %v1126_v15, 0.0 }
  0xf8   : > { %v863_v2 = vpop.f32.mrf.mxu2  ;;  %v903_v3 = vpop.f32.mrf.mxu3  ;;  %1334 = vst.msk [vmem:[%s2027_s6 + $0x64] sm:$0xf] %vm1308_vm2, %v1269_v12  ;;  %v1301_v26 = vpack.c.bf16 %v1237_v19, %v1237_v19  ;;  %v1206_v27 = vmax.f32 %v1142_v17, 0.0 }
  0xf9   : > { %v786_v8 = vpop.f32.mrf.mxu0  ;;  %v826_v24 = vpop.f32.mrf.mxu1  ;;  %1350 = vst.msk [vmem:[%s2027_s6 + $0xa4] sm:$0xf] %vm1308_vm2, %v1285_v18  ;;  %v1254_v31 = vpack.c.bf16 %v1190_v21, %v1190_v21  ;;  %v959_v46 = vadd.f32 %v863_v2, %v373_v37  ;;  %v975_v35 = vadd.f32 %v903_v3, %v389_v43 }
  0xfa   : > { %v1090_v20 = vld [vmem:[#allocation2 + $0x150] sm:$0xff]  ;;  %1366 = vst.msk [vmem:[%s2027_s6 + $0xe4] sm:$0xf] %vm1308_vm2, %v1301_v26  ;;  %v1270_v34 = vpack.c.bf16 %v1206_v27, %v1206_v27  ;;  %v928_v49 = vadd.f32 %v786_v8, %v342_v44  ;;  %v944_v39 = vadd.f32 %v826_v24, %v358_v47 }
  0xfb   : > { %v1158_v22 = vadd.f32 %v2005_v41, %v1090_v20  ;;  %1319 = vst.msk [vmem:[%s2027_s6 + $0x28] sm:$0xf] %vm1308_vm2, %v1254_v31 }
  0xfc   : > { %1335 = vst.msk [vmem:[%s2027_s6 + $0x68] sm:$0xf] %vm1308_vm2, %v1270_v34 }
  0xfd   : > { %v1222_v32 = vmax.f32 %v1158_v22, 0.0  ;;  %1039 = vst.msk [vmem:[#allocation2 + $0x1d0] sm:$0xff] %vm265_vm1, %v974_v36 }
  0xfe   : > { %992 = vst.msk [vmem:[#allocation2 + $0x58] sm:$0xff] %vm265_vm1, %v927_v42 }
  0xff   : > { %v1286_v40 = vpack.c.bf16 %v1222_v32, %v1222_v32  ;;  %1008 = vst.msk [vmem:[#allocation2 + $0xd8] sm:$0xff] %vm265_vm1, %v943_v29 }
 0x100   : > { %v866_v38 = vpop.f32.mrf.mxu2  ;;  %v906_v25 = vpop.f32.mrf.mxu3  ;;  %1024 = vst.msk [vmem:[#allocation2 + $0x158] sm:$0xff] %vm265_vm1, %v959_v46 }
 0x101   : > { %v788_v30 = vpop.f32.mrf.mxu0  ;;  %1351 = vst.msk [vmem:[%s2027_s6 + $0xa8] sm:$0xf] %vm1308_vm2, %v1286_v40  ;;  %v960_v45 = vadd.f32 %v866_v38, %v374_v48  ;;  %v828_v53 = vpop.f32.mrf.mxu1  ;;  %v976_v55 = vadd.f32 %v906_v25, %v390_v50 }
 0x102   : > { %1040 = vst.msk [vmem:[#allocation2 + $0x1d8] sm:$0xff] %vm265_vm1, %v975_v35  ;;  %v929_v58 = vadd.f32 %v788_v30, %v343_v51  ;;  %v945_v61 = vadd.f32 %v828_v53, %v359_v52 }
 0x103   : > { %993 = vst.msk [vmem:[#allocation2 + $0x60] sm:$0xff] %vm265_vm1, %v928_v49 }
 0x104   : > { %1009 = vst.msk [vmem:[#allocation2 + $0xe0] sm:$0xff] %vm265_vm1, %v944_v39  ;;  %v1106_v63 = vld [vmem:[#allocation2 + $0x1d0] sm:$0xff] }
 0x105   : > { %1025 = vst.msk [vmem:[#allocation2 + $0x160] sm:$0xff] %vm265_vm1, %v960_v45  ;;  %v1174_v1 = vadd.f32 %v2005_v41, %v1106_v63  ;;  %v1059_v2 = vld [vmem:[#allocation2 + $0x58] sm:$0xff]  ;;  %v392_v63 = vld [vmem:[#allocation2 + $0x1f0] sm:$0xff] }
 0x106   : > { %1041 = vst.msk [vmem:[#allocation2 + $0x1e0] sm:$0xff] %vm265_vm1, %v976_v55  ;;  %v1127_v5 = vadd.f32 %v2005_v41, %v1059_v2  ;;  %v1075_v6 = vld [vmem:[#allocation2 + $0xd8] sm:$0xff] }
 0x107   : > { %994 = vst.msk [vmem:[#allocation2 + $0x68] sm:$0xff] %vm265_vm1, %v929_v58  ;;  %v1238_v8 = vmax.f32 %v1174_v1, 0.0  ;;  %v1143_v54 = vadd.f32 %v2005_v41, %v1075_v6  ;;  %v1091_v9 = vld [vmem:[#allocation2 + $0x158] sm:$0xff]  ;;  %v360_v58 = vld [vmem:[#allocation2 + $0xf0] sm:$0xff] }
 0x108   : > { %v868_v57 = vpop.f32.mrf.mxu2  ;;  %v908_v60 = vpop.f32.mrf.mxu3  ;;  %1010 = vst.msk [vmem:[#allocation2 + $0xe8] sm:$0xff] %vm265_vm1, %v945_v61  ;;  %v1191_v10 = vmax.f32 %v1127_v5, 0.0  ;;  %v1159_v13 = vadd.f32 %v2005_v41, %v1091_v9  ;;  %v376_v61 = vld [vmem:[#allocation2 + $0x170] sm:$0xff]  ;;  %v345_v2 = vld [vmem:[#allocation2 + $0x78] sm:$0xff] }
 0x109   : > { %v961_v0 = vadd.f32 %v868_v57, %v375_v56  ;;  %v977_v3 = vadd.f32 %v908_v60, %v391_v59  ;;  %v791_v4 = vpop.f32.mrf.mxu0  ;;  %v1107_v11 = vld [vmem:[#allocation2 + $0x1d8] sm:$0xff]  ;;  %v1302_v14 = vpack.c.bf16 %v1238_v8, %v1238_v8  ;;  %v1207_v15 = vmax.f32 %v1143_v54, 0.0  ;;  %v831_v32 = vpop.f32.mrf.mxu1  ;;  %v1753_v56 = vld [vmem:[%s2338_s2] ss:$0 sm:$0xff] }
 0x10a   : > { %v930_v7 = vadd.f32 %v791_v4, %v344_v62  ;;  %v1175_v16 = vadd.f32 %v2005_v41, %v1107_v11  ;;  %v1060_v12 = vld [vmem:[#allocation2 + $0x60] sm:$0xff]  ;;  %v1255_v19 = vpack.c.bf16 %v1191_v10, %v1191_v10  ;;  %v1223_v17 = vmax.f32 %v1159_v13, 0.0  ;;  %v361_v6 = vld [vmem:[#allocation2 + $0xf8] sm:$0xff] }
 0x10b   : > { %1026 = vst.msk [vmem:[#allocation2 + $0x168] sm:$0xff] %vm265_vm1, %v961_v0  ;;  %v1128_v20 = vadd.f32 %v2005_v41, %v1060_v12  ;;  %v1076_v18 = vld [vmem:[#allocation2 + $0xe0] sm:$0xff]  ;;  %v1271_v21 = vpack.c.bf16 %v1207_v15, %v1207_v15  ;;  %v946_v1 = vadd.f32 %v831_v32, %v360_v58  ;;  %v377_v54 = vld [vmem:[#allocation2 + $0x178] sm:$0xff] }
 0x10c   : > { %1042 = vst.msk [vmem:[#allocation2 + $0x1e8] sm:$0xff] %vm265_vm1, %v977_v3  ;;  %v1239_v22 = vmax.f32 %v1175_v16, 0.0  ;;  %v1144_v23 = vadd.f32 %v2005_v41, %v1076_v18  ;;  %v1092_v24 = vld [vmem:[#allocation2 + $0x160] sm:$0xff]  ;;  %v1287_v26 = vpack.c.bf16 %v1223_v17, %v1223_v17  ;;  %v393_v13 = vld [vmem:[#allocation2 + $0x1f8] sm:$0xff] }
 0x10d   : > { %995 = vst.msk [vmem:[#allocation2 + $0x70] sm:$0xff] %vm265_vm1, %v930_v7  ;;  %v1192_v27 = vmax.f32 %v1128_v20, 0.0  ;;  %v1160_v28 = vadd.f32 %v2005_v41, %v1092_v24  ;;  %v1108_v31 = vld [vmem:[#allocation2 + $0x1e0] sm:$0xff] }
 0x10e   : > { %1367 = vst.msk [vmem:[%s2027_s6 + $0xe8] sm:$0xf] %vm1308_vm2, %v1302_v14  ;;  %v1303_v33 = vpack.c.bf16 %v1239_v22, %v1239_v22  ;;  %v1208_v34 = vmax.f32 %v1144_v23, 0.0  ;;  %v1176_v36 = vadd.f32 %v2005_v41, %v1108_v31  ;;  %v1061_v37 = vld [vmem:[#allocation2 + $0x68] sm:$0xff] }
 0x10f   : > { %1320 = vst.msk [vmem:[%s2027_s6 + $0x2c] sm:$0xf] %vm1308_vm2, %v1255_v19  ;;  %v1256_v25 = vpack.c.bf16 %v1192_v27, %v1192_v27  ;;  %v1224_v40 = vmax.f32 %v1160_v28, 0.0  ;;  %v1129_v42 = vadd.f32 %v2005_v41, %v1061_v37  ;;  %v1077_v43 = vld [vmem:[#allocation2 + $0xe8] sm:$0xff] }
 0x110   : > { %1336 = vst.msk [vmem:[%s2027_s6 + $0x6c] sm:$0xf] %vm1308_vm2, %v1271_v21  ;;  %v871_v38 = vpop.f32.mrf.mxu2  ;;  %v911_v29 = vpop.f32.mrf.mxu3  ;;  %v1272_v44 = vpack.c.bf16 %v1208_v34, %v1208_v34  ;;  %v1240_v30 = vmax.f32 %v1176_v36, 0.0  ;;  %v1145_v46 = vadd.f32 %v2005_v41, %v1077_v43 }
 0x111   : > { %1352 = vst.msk [vmem:[%s2027_s6 + $0xac] sm:$0xf] %vm1308_vm2, %v1287_v26  ;;  %v1288_v35 = vpack.c.bf16 %v1224_v40, %v1224_v40  ;;  %v1193_v48 = vmax.f32 %v1129_v42, 0.0  ;;  %v793_v3 = vpop.f32.mrf.mxu0  ;;  %v962_v5 = vadd.f32 %v871_v38, %v376_v61  ;;  %v833_v7 = vpop.f32.mrf.mxu1  ;;  %v978_v8 = vadd.f32 %v911_v29, %v392_v63 }
 0x112   : > { %1368 = vst.msk [vmem:[%s2027_s6 + $0xec] sm:$0xf] %vm1308_vm2, %v1303_v33  ;;  %v1093_v47 = vld [vmem:[#allocation2 + $0x168] sm:$0xff]  ;;  %v1304_v39 = vpack.c.bf16 %v1240_v30, %v1240_v30  ;;  %v1209_v51 = vmax.f32 %v1145_v46, 0.0  ;;  %v931_v10 = vadd.f32 %v793_v3, %v345_v2  ;;  %v947_v14 = vadd.f32 %v833_v7, %v361_v6 }
 0x113   : > { %1321 = vst.msk [vmem:[%s2027_s6 + $0x30] sm:$0xf] %vm1308_vm2, %v1256_v25  ;;  %v1161_v49 = vadd.f32 %v2005_v41, %v1093_v47  ;;  %v1109_v50 = vld [vmem:[#allocation2 + $0x1e8] sm:$0xff]  ;;  %v1257_v53 = vpack.c.bf16 %v1193_v48, %v1193_v48 }
 0x114   : > { %1337 = vst.msk [vmem:[%s2027_s6 + $0x70] sm:$0xf] %vm1308_vm2, %v1272_v44  ;;  %v1177_v45 = vadd.f32 %v2005_v41, %v1109_v50  ;;  %v1062_v52 = vld [vmem:[#allocation2 + $0x70] sm:$0xff]  ;;  %v1273_v59 = vpack.c.bf16 %v1209_v51, %v1209_v51 }
 0x115   : > { %1353 = vst.msk [vmem:[%s2027_s6 + $0xb0] sm:$0xf] %vm1308_vm2, %v1288_v35  ;;  %v1225_v55 = vmax.f32 %v1161_v49, 0.0  ;;  %v1130_v57 = vadd.f32 %v1753_v56, %v1062_v52 }
 0x116   : > { %1369 = vst.msk [vmem:[%s2027_s6 + $0xf0] sm:$0xf] %vm1308_vm2, %v1304_v39  ;;  %v1241_v60 = vmax.f32 %v1177_v45, 0.0 }
 0x117   : > { %1322 = vst.msk [vmem:[%s2027_s6 + $0x34] sm:$0xf] %vm1308_vm2, %v1257_v53  ;;  %v1289_v41 = vpack.c.bf16 %v1225_v55, %v1225_v55  ;;  %v1194_v62 = vmax.f32 %v1130_v57, 0.0 }
 0x118   : > { %1338 = vst.msk [vmem:[%s2027_s6 + $0x74] sm:$0xf] %vm1308_vm2, %v1273_v59  ;;  %v1305_v0 = vpack.c.bf16 %v1241_v60, %v1241_v60  ;;  %v873_v9 = vpop.f32.mrf.mxu2  ;;  %v913_v11 = vpop.f32.mrf.mxu3 }
 0x119   : > { %1354 = vst.msk [vmem:[%s2027_s6 + $0xb4] sm:$0xf] %vm1308_vm2, %v1289_v41  ;;  %v1258_v4 = vpack.c.bf16 %v1194_v62, %v1194_v62  ;;  %v963_v15 = vadd.f32 %v873_v9, %v377_v54  ;;  %v979_v16 = vadd.f32 %v913_v11, %v393_v13 }
 0x11a   : > { %1370 = vst.msk [vmem:[%s2027_s6 + $0xf4] sm:$0xf] %vm1308_vm2, %v1305_v0 }
 0x11b   : > { %1323 = vst.msk [vmem:[%s2027_s6 + $0x38] sm:$0xf] %vm1308_vm2, %v1258_v4 }
 0x11c   : > { %1011 = vst.msk [vmem:[#allocation2 + $0xf0] sm:$0xff] %vm265_vm1, %v946_v1 }
 0x11d   : > { %1027 = vst.msk [vmem:[#allocation2 + $0x170] sm:$0xff] %vm265_vm1, %v962_v5 }
 0x11e   : > { %1043 = vst.msk [vmem:[#allocation2 + $0x1f0] sm:$0xff] %vm265_vm1, %v978_v8 }
 0x11f   : > { %996 = vst.msk [vmem:[#allocation2 + $0x78] sm:$0xff] %vm265_vm1, %v931_v10 }
 0x120   : > { %1012 = vst.msk [vmem:[#allocation2 + $0xf8] sm:$0xff] %vm265_vm1, %v947_v14 }
 0x121   : > { %1028 = vst.msk [vmem:[#allocation2 + $0x178] sm:$0xff] %vm265_vm1, %v963_v15 }
 0x122   : > { %1044 = vst.msk [vmem:[#allocation2 + $0x1f8] sm:$0xff] %vm265_vm1, %v979_v16 }
 0x123   : > { %v1078_v12 = vld [vmem:[#allocation2 + $0xf0] sm:$0xff] }
 0x124   : > { %v1146_v19 = vadd.f32 %v1753_v56, %v1078_v12  ;;  %v1094_v17 = vld [vmem:[#allocation2 + $0x170] sm:$0xff] }
 0x125   : > { %v1162_v20 = vadd.f32 %v1753_v56, %v1094_v17  ;;  %v1110_v18 = vld [vmem:[#allocation2 + $0x1f0] sm:$0xff] }
 0x126   : > { %v1210_v21 = vmax.f32 %v1146_v19, 0.0  ;;  %v1178_v22 = vadd.f32 %v1753_v56, %v1110_v18  ;;  %v1063_v23 = vld [vmem:[#allocation2 + $0x78] sm:$0xff] }
 0x127   : > { %v1226_v24 = vmax.f32 %v1162_v20, 0.0  ;;  %v1131_v26 = vadd.f32 %v1753_v56, %v1063_v23  ;;  %v1079_v27 = vld [vmem:[#allocation2 + $0xf8] sm:$0xff] }
 0x128   : > { %v1274_v28 = vpack.c.bf16 %v1210_v21, %v1210_v21  ;;  %v1242_v31 = vmax.f32 %v1178_v22, 0.0  ;;  %v1147_v32 = vadd.f32 %v1753_v56, %v1079_v27  ;;  %v1095_v33 = vld [vmem:[#allocation2 + $0x178] sm:$0xff] }
 0x129   : > { %v1290_v34 = vpack.c.bf16 %v1226_v24, %v1226_v24  ;;  %v1195_v36 = vmax.f32 %v1131_v26, 0.0  ;;  %v1163_v37 = vadd.f32 %v1753_v56, %v1095_v33  ;;  %v1111_v38 = vld [vmem:[#allocation2 + $0x1f8] sm:$0xff] }
 0x12a   : > { %1339 = vst.msk [vmem:[%s2027_s6 + $0x78] sm:$0xf] %vm1308_vm2, %v1274_v28  ;;  %v1306_v25 = vpack.c.bf16 %v1242_v31, %v1242_v31  ;;  %v1211_v40 = vmax.f32 %v1147_v32, 0.0  ;;  %v1179_v42 = vadd.f32 %v1753_v56, %v1111_v38 }
 0x12b   : > { %1355 = vst.msk [vmem:[%s2027_s6 + $0xb8] sm:$0xf] %vm1308_vm2, %v1290_v34  ;;  %v1259_v43 = vpack.c.bf16 %v1195_v36, %v1195_v36  ;;  %v1227_v29 = vmax.f32 %v1163_v37, 0.0 }
 0x12c   : > { %1371 = vst.msk [vmem:[%s2027_s6 + $0xf8] sm:$0xf] %vm1308_vm2, %v1306_v25  ;;  %v1275_v44 = vpack.c.bf16 %v1211_v40, %v1211_v40  ;;  %v1243_v30 = vmax.f32 %v1179_v42, 0.0 }
 0x12d   : > { %1324 = vst.msk [vmem:[%s2027_s6 + $0x3c] sm:$0xf] %vm1308_vm2, %v1259_v43  ;;  %v1291_v46 = vpack.c.bf16 %v1227_v29, %v1227_v29 }
 0x12e   : > { %1340 = vst.msk [vmem:[%s2027_s6 + $0x7c] sm:$0xf] %vm1308_vm2, %v1275_v44  ;;  %v1307_v47 = vpack.c.bf16 %v1243_v30, %v1243_v30 }
 0x12f   : > { %1356 = vst.msk [vmem:[%s2027_s6 + $0xbc] sm:$0xf] %vm1308_vm2, %v1291_v46 }
 0x130   : > { %1372 = vst.msk [vmem:[%s2027_s6 + $0xfc] sm:$0xf] %vm1308_vm2, %v1307_v47 }
 0x131 PF: > { %s13_s14 = sadd.s32 1, %s1776_s14   ;;  %s2340_s12 = smov %s1772_s13 }
 0x132   : > { %p10_p5 = scmp.ge.s32.totalorder %s13_s14, 6   ;;  %s2341_s13 = smov %s2343_s15 }
 0x134   :  { %12 = sbr.rel (!%p10_p5) target bundleno = 2 (0x2), region = 76 }

// kernel: layer_forward.11
= control target key start
LH: loop header
LB: loop body
LE: loop exit
PB: predicated region body
PF: predicated region fallthrough
CT: control target
= control target key end

     0   :  { %s1183_s12 = smov 0   ;;  %s1185_s13 = smov 0   ;;  %s1492_s0 = inlined_call_operand.vmem [shape: bf16[3,256,72], index: 0, kind: input, shape index: {}]   ;;  %s1493_s1 = inlined_call_operand.vmem [shape: bf16[3,72,32], index: 1, kind: input, shape index: {}]   ;;  %s1494_s2 = inlined_call_operand.vmem [shape: f32[1,32], index: 2, kind: input, shape index: {}]   ;;  %s1495_s3 = inlined_call_operand.vmem [shape: bf16[256,32], index: 3, kind: output, shape index: {}]  }
   0x1   :  { %s1187_s14 = smov 0  }
   0x2 LB: > { %s25_s15 = sadd.s32 1, %s1156_s13  ;;  %p969_p0 = scmp.ge.s32.totalorder %s1160_s14, 1  ;;  %s1160_s14 = sphi %s1187_s14, %s13_s14   ;;  %s1156_s13 = sphi %s1185_s13, %s1497_s13   ;;  %s1152_s12 = sphi %s1183_s12, %s1496_s12  }
   0x3   : > { %p26_p1 = scmp.ge.s32.totalorder %s25_s15, 3  ;;  %p188_p2 = scmp.lt.s32.totalorder %s1160_s14, 4 }
   0x5   : > { %s1499_s15 = smov (%p26_p1, %s25_s15), 0  ;;  %p189_p3 = pnand %p969_p0, %p188_p2 }
   0x6   : > { %p231_p4 = scmp.lt.s32.totalorder (!%p189_p3), %s1152_s12, 2  ;;  %p973_p5 = scmp.ne.s32.totalorder (!%p189_p3), %s1152_s12, 0 }
   0x7   : > { %192 = sbr.rel (%p189_p3) target bundleno = 309 (0x135), region = 32 }
   0xc   : > { %s232_s16 = scalar_select %p231_p4, %s1152_s12, 2 }
   0xd   : > { %264 = sbr.rel (%p973_p5) target bundleno = 51 (0x33), region = 36 }
   0xe   : > { %s1075_s17 = sshll.u32 %s232_s16, 7  ;;  %s1111_s18 = smul.u32 36, %s232_s16 }
   0xf   : > { %s1208_s21 = scalar_lea.vmem %s1492_s0, %s1075_s17 }
  0x10   : > { %s1213_s24 = scalar_lea.vmem %s1493_s1, %s1111_s18 }
  0x12   : > { %vm265_vm0 = vcmask 261120   ;;  %v1162_v0 = vmov 0.0  }
  0x13   : > { %266 = vst.msk [vmem:[#allocation2] sm:$0xff] %vm265_vm0, %v1162_v0 }
  0x14   : > { %267 = vst.msk [vmem:[#allocation2 + $0x8] sm:$0xff] %vm265_vm0, %v1162_v0 }
  0x15   : > { %268 = vst.msk [vmem:[#allocation2 + $0x10] sm:$0xff] %vm265_vm0, %v1162_v0 }
  0x16   : > { %269 = vst.msk [vmem:[#allocation2 + $0x18] sm:$0xff] %vm265_vm0, %v1162_v0 }
  0x17   : > { %270 = vst.msk [vmem:[#allocation2 + $0x20] sm:$0xff] %vm265_vm0, %v1162_v0 }
  0x18   : > { %271 = vst.msk [vmem:[#allocation2 + $0x28] sm:$0xff] %vm265_vm0, %v1162_v0 }
  0x19   : > { %272 = vst.msk [vmem:[#allocation2 + $0x30] sm:$0xff] %vm265_vm0, %v1162_v0 }
  0x1a   : > { %273 = vst.msk [vmem:[#allocation2 + $0x38] sm:$0xff] %vm265_vm0, %v1162_v0 }
  0x1b   : > { %274 = vst.msk [vmem:[#allocation2 + $0x40] sm:$0xff] %vm265_vm0, %v1162_v0 }
  0x1c   : > { %275 = vst.msk [vmem:[#allocation2 + $0x48] sm:$0xff] %vm265_vm0, %v1162_v0 }
  0x1d   : > { %276 = vst.msk [vmem:[#allocation2 + $0x50] sm:$0xff] %vm265_vm0, %v1162_v0 }
  0x1e   : > { %277 = vst.msk [vmem:[#allocation2 + $0x58] sm:$0xff] %vm265_vm0, %v1162_v0 }
  0x1f   : > { %278 = vst.msk [vmem:[#allocation2 + $0x60] sm:$0xff] %vm265_vm0, %v1162_v0 }
  0x20   : > { %279 = vst.msk [vmem:[#allocation2 + $0x68] sm:$0xff] %vm265_vm0, %v1162_v0 }
  0x21   : > { %280 = vst.msk [vmem:[#allocation2 + $0x70] sm:$0xff] %vm265_vm0, %v1162_v0 }
  0x22   : > { %281 = vst.msk [vmem:[#allocation2 + $0x78] sm:$0xff] %vm265_vm0, %v1162_v0 }
  0x23   : > { %282 = vst.msk [vmem:[#allocation2 + $0x80] sm:$0xff] %vm265_vm0, %v1162_v0 }
  0x24   : > { %283 = vst.msk [vmem:[#allocation2 + $0x88] sm:$0xff] %vm265_vm0, %v1162_v0 }
  0x25   : > { %284 = vst.msk [vmem:[#allocation2 + $0x90] sm:$0xff] %vm265_vm0, %v1162_v0 }
  0x26   : > { %285 = vst.msk [vmem:[#allocation2 + $0x98] sm:$0xff] %vm265_vm0, %v1162_v0 }
  0x27   : > { %286 = vst.msk [vmem:[#allocation2 + $0xa0] sm:$0xff] %vm265_vm0, %v1162_v0 }
  0x28   : > { %287 = vst.msk [vmem:[#allocation2 + $0xa8] sm:$0xff] %vm265_vm0, %v1162_v0 }
  0x29   : > { %288 = vst.msk [vmem:[#allocation2 + $0xb0] sm:$0xff] %vm265_vm0, %v1162_v0 }
  0x2a   : > { %289 = vst.msk [vmem:[#allocation2 + $0xb8] sm:$0xff] %vm265_vm0, %v1162_v0 }
  0x2b   : > { %290 = vst.msk [vmem:[#allocation2 + $0xc0] sm:$0xff] %vm265_vm0, %v1162_v0 }
  0x2c   : > { %291 = vst.msk [vmem:[#allocation2 + $0xc8] sm:$0xff] %vm265_vm0, %v1162_v0 }
  0x2d   : > { %292 = vst.msk [vmem:[#allocation2 + $0xd0] sm:$0xff] %vm265_vm0, %v1162_v0 }
  0x2e   : > { %293 = vst.msk [vmem:[#allocation2 + $0xd8] sm:$0xff] %vm265_vm0, %v1162_v0 }
  0x2f   : > { %294 = vst.msk [vmem:[#allocation2 + $0xe0] sm:$0xff] %vm265_vm0, %v1162_v0 }
  0x30   : > { %295 = vst.msk [vmem:[#allocation2 + $0xe8] sm:$0xff] %vm265_vm0, %v1162_v0 }
  0x31   : > { %296 = vst.msk [vmem:[#allocation2 + $0xf0] sm:$0xff] %vm265_vm0, %v1162_v0 }
  0x32   : > { %297 = vst.msk [vmem:[#allocation2 + $0xf8] sm:$0xff] %vm265_vm0, %v1162_v0 }
  0x33 PF: > { %v370_v1 = vld [vmem:[%s1213_s24 + $0x20] sm:$0xf]  ;;  %vm527_vm1 = vcmask 1043456   ;;  %v1095_v5 = vld [vmem:[%s1213_s24 + $0x18] sm:$0xff]  ;;  %v1094_v6 = vld [vmem:[%s1213_s24 + $0x10] sm:$0xff]  ;;  %vm478_vm2 = vcmask 588800  }
  0x34   : > { %v468_v2 = vunpack.c.l.b16 %v370_v1  ;;  %v1093_v7 = vld [vmem:[%s1213_s24 + $0x8] sm:$0xff]  ;;  %v1092_v8 = vld [vmem:[%s1213_s24] sm:$0xff]  ;;  %v1078_v17 = vld [vmem:[%s1208_s21 + $0x10] sm:$0xff]  ;;  %vm652_vm3 = vcmask 261120   ;;  %p1070_p6 = scmp.ne.s32.totalorder %s1152_s12, 2 }
  0x35   : > { %v1076_v9 = vld [vmem:[%s1208_s21] sm:$0xff]  ;;  %v1077_v13 = vld [vmem:[%s1208_s21 + $0x8] sm:$0xff]  ;;  %v1082_v18 = vld [vmem:[%s1208_s21 + $0x30] sm:$0xff] }
  0x36   : > { %v473_v3 = vpack.c.b16 %v468_v2, %v468_v2  ;;  %v1080_v10 = vld [vmem:[%s1208_s21 + $0x20] sm:$0xff]  ;;  %v1081_v14 = vld [vmem:[%s1208_s21 + $0x28] sm:$0xff]  ;;  %v1086_v19 = vld [vmem:[%s1208_s21 + $0x50] sm:$0xff] }
  0x37   : > { %v1084_v11 = vld [vmem:[%s1208_s21 + $0x40] sm:$0xff]  ;;  %v1085_v15 = vld [vmem:[%s1208_s21 + $0x48] sm:$0xff]  ;;  %v1090_v20 = vld [vmem:[%s1208_s21 + $0x70] sm:$0xff] }
  0x38   : > { %v529_v4 = vsel %vm527_vm1, %v473_v3, 0  ;;  %v1088_v12 = vld [vmem:[%s1208_s21 + $0x60] sm:$0xff]  ;;  %v1089_v16 = vld [vmem:[%s1208_s21 + $0x68] sm:$0xff]  ;;  %v1079_v21 = vld [vmem:[%s1208_s21 + $0x18] sm:$0xff] }
  0x39   : > { %534 = vmatpush.bf16.msra.mxu0 %v529_v4  ;;  %1096 = vmatpush.bf16.msra.mxu1 %v529_v4  ;;  %v1083_v22 = vld [vmem:[%s1208_s21 + $0x38] sm:$0xff]  ;;  %v298_v25 = vld [vmem:[#allocation2] sm:$0xff]  ;;  %v299_v33 = vld [vmem:[#allocation2 + $0x8] sm:$0xff] }
  0x3a   : > { %1097 = vmatpush.bf16.msra.mxu2 %v529_v4  ;;  %1098 = vmatpush.bf16.msra.mxu3 %v529_v4  ;;  %v1087_v23 = vld [vmem:[%s1208_s21 + $0x58] sm:$0xff]  ;;  %v306_v26 = vld [vmem:[#allocation2 + $0x40] sm:$0xff]  ;;  %v307_v34 = vld [vmem:[#allocation2 + $0x48] sm:$0xff] }
  0x3b   : > { %v1091_v24 = vld [vmem:[%s1208_s21 + $0x78] sm:$0xff]  ;;  %v314_v31 = vld [vmem:[#allocation2 + $0x80] sm:$0xff]  ;;  %v315_v43 = vld [vmem:[#allocation2 + $0x88] sm:$0xff] }
  0x3c   : > { %v322_v32 = vld [vmem:[#allocation2 + $0xc0] sm:$0xff]  ;;  %v323_v44 = vld [vmem:[#allocation2 + $0xc8] sm:$0xff]  ;;  %v300_v45 = vld [vmem:[#allocation2 + $0x10] sm:$0xff] }
  0x3d   : > { %535 = vmatpush.bf16.msra.mxu0 %v1095_v5  ;;  %1099 = vmatpush.bf16.msra.mxu1 %v1095_v5  ;;  %v308_v46 = vld [vmem:[#allocation2 + $0x50] sm:$0xff]  ;;  %v301_v57 = vld [vmem:[#allocation2 + $0x18] sm:$0xff] }
  0x3e   : > { %1100 = vmatpush.bf16.msra.mxu2 %v1095_v5  ;;  %1101 = vmatpush.bf16.msra.mxu3 %v1095_v5  ;;  %v316_v55 = vld [vmem:[#allocation2 + $0x90] sm:$0xff]  ;;  %v309_v58 = vld [vmem:[#allocation2 + $0x58] sm:$0xff]  ;;  %v302_v5 = vld [vmem:[#allocation2 + $0x20] sm:$0xff] }
  0x3f   : > { %v324_v56 = vld [vmem:[#allocation2 + $0xd0] sm:$0xff]  ;;  %v317_v3 = vld [vmem:[#allocation2 + $0x98] sm:$0xff] }
  0x40   : > { %v325_v4 = vld [vmem:[#allocation2 + $0xd8] sm:$0xff] }
  0x41   : > { %536 = vmatpush.bf16.msra.mxu0 %v1094_v6  ;;  %1102 = vmatpush.bf16.msra.mxu1 %v1094_v6 }
  0x42   : > { %1103 = vmatpush.bf16.msra.mxu2 %v1094_v6  ;;  %1104 = vmatpush.bf16.msra.mxu3 %v1094_v6  ;;  %v310_v6 = vld [vmem:[#allocation2 + $0x60] sm:$0xff] }
  0x45   : > { %537 = vmatpush.bf16.msra.mxu0 %v1093_v7  ;;  %1105 = vmatpush.bf16.msra.mxu1 %v1093_v7 }
  0x46   : > { %1106 = vmatpush.bf16.msra.mxu2 %v1093_v7  ;;  %1107 = vmatpush.bf16.msra.mxu3 %v1093_v7 }
  0x49   : > { %538 = vmatpush.bf16.msra.mxu0 %v1092_v8  ;;  %1108 = vmatpush.bf16.msra.mxu1 %v1092_v8 }
  0x4a   : > { %1109 = vmatpush.bf16.msra.mxu2 %v1092_v8  ;;  %1110 = vmatpush.bf16.msra.mxu3 %v1092_v8 }
  0x4c   : > { %1054 = vmatmul.msk.bf16.vlgmr.msra.gmra.mxu0 %vm478_vm2, %v1076_v9  ;;  %1058 = vmatmul.msk.bf16.vlgmr.msra.gmra.mxu1 %vm478_vm2, %v1080_v10 }
  0x4d   : > { %1062 = vmatmul.msk.bf16.vlgmr.msra.gmra.mxu2 %vm478_vm2, %v1084_v11  ;;  %1066 = vmatmul.msk.bf16.vlgmr.msra.gmra.mxu3 %vm478_vm2, %v1088_v12 }
  0x5c   : > { %1055 = vmatmul.msk.bf16.gmra.mxu0 %vm478_vm2, %v1077_v13  ;;  %1059 = vmatmul.msk.bf16.gmra.mxu1 %vm478_vm2, %v1081_v14 }
  0x5d   : > { %1063 = vmatmul.msk.bf16.gmra.mxu2 %vm478_vm2, %v1085_v15  ;;  %1067 = vmatmul.msk.bf16.gmra.mxu3 %vm478_vm2, %v1089_v16  ;;  %v318_v15 = vld [vmem:[#allocation2 + $0xa0] sm:$0xff] }
  0x5e   : > { %v326_v16 = vld [vmem:[#allocation2 + $0xe0] sm:$0xff] }
  0x6c   : > { %1056 = vmatmul.msk.bf16.gmra.mxu0 %vm478_vm2, %v1078_v17  ;;  %1060 = vmatmul.msk.bf16.gmra.mxu1 %vm478_vm2, %v1082_v18  ;;  %v303_v17 = vld [vmem:[#allocation2 + $0x28] sm:$0xff] }
  0x6d   : > { %1064 = vmatmul.msk.bf16.gmra.mxu2 %vm478_vm2, %v1086_v19  ;;  %1068 = vmatmul.msk.bf16.gmra.mxu3 %vm478_vm2, %v1090_v20  ;;  %v311_v18 = vld [vmem:[#allocation2 + $0x68] sm:$0xff] }
  0x7c   : > { %1057 = vmatmul.msk.bf16.gmra.mxu0 %vm478_vm2, %v1079_v21  ;;  %1061 = vmatmul.msk.bf16.gmra.mxu1 %vm478_vm2, %v1083_v22 }
  0x7d   : > { %1065 = vmatmul.msk.bf16.gmra.mxu2 %vm478_vm2, %v1087_v23  ;;  %1069 = vmatmul.msk.bf16.gmra.mxu3 %vm478_vm2, %v1091_v24 }
  0xc9   : > { %v540_v27 = vpop.f32.mrf.mxu0  ;;  %v560_v28 = vpop.f32.mrf.mxu1 }
  0xca   : > { %v620_v29 = vadd.f32 %v540_v27, %v298_v25  ;;  %v628_v30 = vadd.f32 %v560_v28, %v306_v26  ;;  %v319_v27 = vld [vmem:[#allocation2 + $0xa8] sm:$0xff] }
  0xcb   : > { %v327_v28 = vld [vmem:[#allocation2 + $0xe8] sm:$0xff] }
  0xcc   : > { %653 = vst.msk [vmem:[#allocation2] sm:$0xff] %vm652_vm3, %v620_v29  ;;  %v304_v29 = vld [vmem:[#allocation2 + $0x30] sm:$0xff] }
  0xcd   : > { %661 = vst.msk [vmem:[#allocation2 + $0x40] sm:$0xff] %vm652_vm3, %v628_v30  ;;  %v312_v30 = vld [vmem:[#allocation2 + $0x70] sm:$0xff] }
  0xd0   : > { %v580_v35 = vpop.f32.mrf.mxu2  ;;  %v600_v36 = vpop.f32.mrf.mxu3 }
  0xd1   : > { %v636_v37 = vadd.f32 %v580_v35, %v314_v31  ;;  %v644_v38 = vadd.f32 %v600_v36, %v322_v32  ;;  %v542_v39 = vpop.f32.mrf.mxu0  ;;  %v562_v40 = vpop.f32.mrf.mxu1 }
  0xd2   : > { %v621_v41 = vadd.f32 %v542_v39, %v299_v33  ;;  %v629_v42 = vadd.f32 %v562_v40, %v307_v34  ;;  %v320_v39 = vld [vmem:[#allocation2 + $0xb0] sm:$0xff] }
  0xd3   : > { %669 = vst.msk [vmem:[#allocation2 + $0x80] sm:$0xff] %vm652_vm3, %v636_v37  ;;  %v328_v40 = vld [vmem:[#allocation2 + $0xf0] sm:$0xff] }
  0xd4   : > { %677 = vst.msk [vmem:[#allocation2 + $0xc0] sm:$0xff] %vm652_vm3, %v644_v38 }
  0xd5   : > { %654 = vst.msk [vmem:[#allocation2 + $0x8] sm:$0xff] %vm652_vm3, %v621_v41  ;;  %v305_v41 = vld [vmem:[#allocation2 + $0x38] sm:$0xff] }
  0xd6   : > { %662 = vst.msk [vmem:[#allocation2 + $0x48] sm:$0xff] %vm652_vm3, %v629_v42  ;;  %v313_v42 = vld [vmem:[#allocation2 + $0x78] sm:$0xff] }
  0xd8   : > { %v582_v47 = vpop.f32.mrf.mxu2  ;;  %v602_v48 = vpop.f32.mrf.mxu3 }
  0xd9   : > { %v637_v49 = vadd.f32 %v582_v47, %v315_v43  ;;  %v645_v50 = vadd.f32 %v602_v48, %v323_v44  ;;  %v545_v51 = vpop.f32.mrf.mxu0  ;;  %v565_v52 = vpop.f32.mrf.mxu1 }
  0xda   : > { %v622_v53 = vadd.f32 %v545_v51, %v300_v45  ;;  %v630_v54 = vadd.f32 %v565_v52, %v308_v46  ;;  %v321_v51 = vld [vmem:[#allocation2 + $0xb8] sm:$0xff] }
  0xdb   : > { %670 = vst.msk [vmem:[#allocation2 + $0x88] sm:$0xff] %vm652_vm3, %v637_v49  ;;  %v329_v52 = vld [vmem:[#allocation2 + $0xf8] sm:$0xff] }
  0xdc   : > { %678 = vst.msk [vmem:[#allocation2 + $0xc8] sm:$0xff] %vm652_vm3, %v645_v50 }
  0xdd   : > { %655 = vst.msk [vmem:[#allocation2 + $0x10] sm:$0xff] %vm652_vm3, %v622_v53 }
  0xde   : > { %663 = vst.msk [vmem:[#allocation2 + $0x50] sm:$0xff] %vm652_vm3, %v630_v54 }
  0xe0   : > { %v585_v59 = vpop.f32.mrf.mxu2  ;;  %v605_v60 = vpop.f32.mrf.mxu3 }
  0xe1   : > { %v638_v61 = vadd.f32 %v585_v59, %v316_v55  ;;  %v646_v62 = vadd.f32 %v605_v60, %v324_v56  ;;  %v547_v63 = vpop.f32.mrf.mxu0  ;;  %v567_v0 = vpop.f32.mrf.mxu1 }
  0xe2   : > { %v623_v1 = vadd.f32 %v547_v63, %v301_v57  ;;  %v631_v2 = vadd.f32 %v567_v0, %v309_v58 }
  0xe3   : > { %671 = vst.msk [vmem:[#allocation2 + $0x90] sm:$0xff] %vm652_vm3, %v638_v61 }
  0xe4   : > { %679 = vst.msk [vmem:[#allocation2 + $0xd0] sm:$0xff] %vm652_vm3, %v646_v62 }
  0xe5   : > { %656 = vst.msk [vmem:[#allocation2 + $0x18] sm:$0xff] %vm652_vm3, %v623_v1 }
  0xe6   : > { %664 = vst.msk [vmem:[#allocation2 + $0x58] sm:$0xff] %vm652_vm3, %v631_v2 }
  0xe8   : > { %v587_v7 = vpop.f32.mrf.mxu2  ;;  %v607_v8 = vpop.f32.mrf.mxu3 }
  0xe9   : > { %v639_v9 = vadd.f32 %v587_v7, %v317_v3  ;;  %v647_v10 = vadd.f32 %v607_v8, %v325_v4  ;;  %v550_v11 = vpop.f32.mrf.mxu0  ;;  %v570_v12 = vpop.f32.mrf.mxu1 }
  0xea   : > { %v624_v13 = vadd.f32 %v550_v11, %v302_v5  ;;  %v632_v14 = vadd.f32 %v570_v12, %v310_v6 }
  0xeb   : > { %672 = vst.msk [vmem:[#allocation2 + $0x98] sm:$0xff] %vm652_vm3, %v639_v9 }
  0xec   : > { %680 = vst.msk [vmem:[#allocation2 + $0xd8] sm:$0xff] %vm652_vm3, %v647_v10 }
  0xed   : > { %657 = vst.msk [vmem:[#allocation2 + $0x20] sm:$0xff] %vm652_vm3, %v624_v13 }
  0xee   : > { %665 = vst.msk [vmem:[#allocation2 + $0x60] sm:$0xff] %vm652_vm3, %v632_v14 }
  0xf0   : > { %v590_v19 = vpop.f32.mrf.mxu2  ;;  %v610_v20 = vpop.f32.mrf.mxu3 }
  0xf1   : > { %v640_v21 = vadd.f32 %v590_v19, %v318_v15  ;;  %v648_v22 = vadd.f32 %v610_v20, %v326_v16  ;;  %v552_v23 = vpop.f32.mrf.mxu0  ;;  %v572_v24 = vpop.f32.mrf.mxu1 }
  0xf2   : > { %v625_v25 = vadd.f32 %v552_v23, %v303_v17  ;;  %v633_v26 = vadd.f32 %v572_v24, %v311_v18 }
  0xf3   : > { %673 = vst.msk [vmem:[#allocation2 + $0xa0] sm:$0xff] %vm652_vm3, %v640_v21 }
  0xf4   : > { %681 = vst.msk [vmem:[#allocation2 + $0xe0] sm:$0xff] %vm652_vm3, %v648_v22 }
  0xf5   : > { %658 = vst.msk [vmem:[#allocation2 + $0x28] sm:$0xff] %vm652_vm3, %v625_v25 }
  0xf6   : > { %666 = vst.msk [vmem:[#allocation2 + $0x68] sm:$0xff] %vm652_vm3, %v633_v26 }
  0xf8   : > { %v592_v31 = vpop.f32.mrf.mxu2  ;;  %v612_v32 = vpop.f32.mrf.mxu3 }
  0xf9   : > { %v641_v33 = vadd.f32 %v592_v31, %v319_v27  ;;  %v649_v34 = vadd.f32 %v612_v32, %v327_v28  ;;  %v555_v35 = vpop.f32.mrf.mxu0  ;;  %v575_v36 = vpop.f32.mrf.mxu1 }
  0xfa   : > { %v626_v37 = vadd.f32 %v555_v35, %v304_v29  ;;  %v634_v38 = vadd.f32 %v575_v36, %v312_v30 }
  0xfb   : > { %674 = vst.msk [vmem:[#allocation2 + $0xa8] sm:$0xff] %vm652_vm3, %v641_v33 }
  0xfc   : > { %682 = vst.msk [vmem:[#allocation2 + $0xe8] sm:$0xff] %vm652_vm3, %v649_v34 }
  0xfd   : > { %659 = vst.msk [vmem:[#allocation2 + $0x30] sm:$0xff] %vm652_vm3, %v626_v37 }
  0xfe   : > { %667 = vst.msk [vmem:[#allocation2 + $0x70] sm:$0xff] %vm652_vm3, %v634_v38 }
 0x100   : > { %v595_v43 = vpop.f32.mrf.mxu2  ;;  %v615_v44 = vpop.f32.mrf.mxu3 }
 0x101   : > { %v642_v45 = vadd.f32 %v595_v43, %v320_v39  ;;  %v650_v46 = vadd.f32 %v615_v44, %v328_v40  ;;  %v557_v47 = vpop.f32.mrf.mxu0  ;;  %v577_v48 = vpop.f32.mrf.mxu1 }
 0x102   : > { %v627_v49 = vadd.f32 %v557_v47, %v305_v41  ;;  %v635_v50 = vadd.f32 %v577_v48, %v313_v42 }
 0x103   : > { %675 = vst.msk [vmem:[#allocation2 + $0xb0] sm:$0xff] %vm652_vm3, %v642_v45 }
 0x104   : > { %683 = vst.msk [vmem:[#allocation2 + $0xf0] sm:$0xff] %vm652_vm3, %v650_v46 }
 0x105   : > { %660 = vst.msk [vmem:[#allocation2 + $0x38] sm:$0xff] %vm652_vm3, %v627_v49 }
 0x106   : > { %668 = vst.msk [vmem:[#allocation2 + $0x78] sm:$0xff] %vm652_vm3, %v635_v50 }
 0x108   : > { %v597_v53 = vpop.f32.mrf.mxu2  ;;  %v617_v54 = vpop.f32.mrf.mxu3  ;;  %688 = sbr.rel (%p1070_p6) target bundleno = 309 (0x135), region = 40 }
 0x109   : > { %v643_v55 = vadd.f32 %v597_v53, %v321_v51  ;;  %v651_v56 = vadd.f32 %v617_v54, %v329_v52 }
 0x10b   : > { %676 = vst.msk [vmem:[#allocation2 + $0xb8] sm:$0xff] %vm652_vm3, %v643_v55 }
 0x10c   : > { %684 = vst.msk [vmem:[#allocation2 + $0xf8] sm:$0xff] %vm652_vm3, %v651_v56 }
 0x10d   : > { %v689_v57 = vld [vmem:[#allocation2] sm:$0xff]  ;;  %v690_v59 = vld [vmem:[#allocation2 + $0x8] sm:$0xff]  ;;  %v691_v60 = vld [vmem:[#allocation2 + $0x10] sm:$0xff]  ;;  %vm821_vm4 = vcmask 257024  }
 0x10e   : > { %v1321_v58 = vld [vmem:[%s1494_s2] ss:$0 sm:$0xff]  ;;  %v692_v61 = vld [vmem:[#allocation2 + $0x18] sm:$0xff]  ;;  %v694_v3 = vld [vmem:[#allocation2 + $0x28] sm:$0xff] }
 0x10f   : > { %v725_v62 = vadd.f32 %v1321_v58, %v689_v57  ;;  %v726_v63 = vadd.f32 %v1321_v58, %v690_v59  ;;  %v727_v0 = vadd.f32 %v1321_v58, %v691_v60  ;;  %v728_v1 = vadd.f32 %v1321_v58, %v692_v61  ;;  %v693_v2 = vld [vmem:[#allocation2 + $0x20] sm:$0xff]  ;;  %v695_v4 = vld [vmem:[#allocation2 + $0x30] sm:$0xff]  ;;  %v696_v8 = vld [vmem:[#allocation2 + $0x38] sm:$0xff] }
 0x110   : > { %v729_v5 = vadd.f32 %v1321_v58, %v693_v2  ;;  %v730_v6 = vadd.f32 %v1321_v58, %v694_v3  ;;  %v731_v7 = vadd.f32 %v1321_v58, %v695_v4  ;;  %v697_v13 = vld [vmem:[#allocation2 + $0x40] sm:$0xff]  ;;  %v732_v16 = vadd.f32 %v1321_v58, %v696_v8  ;;  %v698_v17 = vld [vmem:[#allocation2 + $0x48] sm:$0xff]  ;;  %v699_v18 = vld [vmem:[#allocation2 + $0x50] sm:$0xff] }
 0x111   : > { %v757_v9 = vmax.f32 %v725_v62, 0.0  ;;  %v758_v10 = vmax.f32 %v726_v63, 0.0  ;;  %v759_v11 = vmax.f32 %v727_v0, 0.0  ;;  %v760_v12 = vmax.f32 %v728_v1, 0.0  ;;  %v700_v19 = vld [vmem:[#allocation2 + $0x58] sm:$0xff]  ;;  %v701_v24 = vld [vmem:[#allocation2 + $0x60] sm:$0xff] }
 0x112   : > { %v761_v14 = vmax.f32 %v729_v5, 0.0  ;;  %v762_v15 = vmax.f32 %v730_v6, 0.0  ;;  %v763_v23 = vmax.f32 %v731_v7, 0.0  ;;  %v702_v25 = vld [vmem:[#allocation2 + $0x68] sm:$0xff]  ;;  %v703_v26 = vld [vmem:[#allocation2 + $0x70] sm:$0xff]  ;;  %v764_v29 = vmax.f32 %v732_v16, 0.0 }
 0x113   : > { %v789_v20 = vpack.c.bf16 %v757_v9, %v757_v9  ;;  %v790_v21 = vpack.c.bf16 %v758_v10, %v758_v10  ;;  %v791_v22 = vpack.c.bf16 %v759_v11, %v759_v11  ;;  %v792_v27 = vpack.c.bf16 %v760_v12, %v760_v12  ;;  %v704_v34 = vld [vmem:[#allocation2 + $0x78] sm:$0xff]  ;;  %v705_v46 = vld [vmem:[#allocation2 + $0x80] sm:$0xff]  ;;  %v706_v47 = vld [vmem:[#allocation2 + $0x88] sm:$0xff] }
 0x114   : > { %v793_v28 = vpack.c.bf16 %v761_v14, %v761_v14  ;;  %v733_v30 = vadd.f32 %v1321_v58, %v697_v13  ;;  %v734_v31 = vadd.f32 %v1321_v58, %v698_v17  ;;  %v735_v32 = vadd.f32 %v1321_v58, %v699_v18  ;;  %v707_v48 = vld [vmem:[#allocation2 + $0x90] sm:$0xff]  ;;  %v708_v51 = vld [vmem:[#allocation2 + $0x98] sm:$0xff]  ;;  %v709_v55 = vld [vmem:[#allocation2 + $0xa0] sm:$0xff] }
 0x115   : > { %822 = vst.msk [vmem:[%s1495_s3] sm:$0xf] %vm821_vm4, %v789_v20  ;;  %v736_v33 = vadd.f32 %v1321_v58, %v700_v19  ;;  %v794_v35 = vpack.c.bf16 %v762_v15, %v762_v15  ;;  %v737_v36 = vadd.f32 %v1321_v58, %v701_v24  ;;  %v738_v37 = vadd.f32 %v1321_v58, %v702_v25  ;;  %v710_v61 = vld [vmem:[#allocation2 + $0xa8] sm:$0xff]  ;;  %v711_v1 = vld [vmem:[#allocation2 + $0xb0] sm:$0xff]  ;;  %v712_v5 = vld [vmem:[#allocation2 + $0xb8] sm:$0xff] }
 0x116   : > { %823 = vst.msk [vmem:[%s1495_s3 + $0x4] sm:$0xf] %vm821_vm4, %v790_v21  ;;  %v739_v38 = vadd.f32 %v1321_v58, %v703_v26  ;;  %v795_v39 = vpack.c.bf16 %v763_v23, %v763_v23  ;;  %v765_v40 = vmax.f32 %v733_v30, 0.0  ;;  %v766_v41 = vmax.f32 %v734_v31, 0.0  ;;  %v713_v9 = vld [vmem:[#allocation2 + $0xc0] sm:$0xff]  ;;  %v714_v13 = vld [vmem:[#allocation2 + $0xc8] sm:$0xff] }
 0x117   : > { %824 = vst.msk [vmem:[%s1495_s3 + $0x8] sm:$0xf] %vm821_vm4, %v791_v22  ;;  %v767_v42 = vmax.f32 %v735_v32, 0.0  ;;  %v796_v43 = vpack.c.bf16 %v764_v29, %v764_v29  ;;  %v768_v44 = vmax.f32 %v736_v33, 0.0  ;;  %v740_v45 = vadd.f32 %v1321_v58, %v704_v34  ;;  %v715_v17 = vld [vmem:[#allocation2 + $0xd0] sm:$0xff]  ;;  %v716_v21 = vld [vmem:[#allocation2 + $0xd8] sm:$0xff] }
 0x118   : > { %825 = vst.msk [vmem:[%s1495_s3 + $0xc] sm:$0xf] %vm821_vm4, %v792_v27  ;;  %v797_v49 = vpack.c.bf16 %v765_v40, %v765_v40  ;;  %v769_v50 = vmax.f32 %v737_v36, 0.0  ;;  %v798_v52 = vpack.c.bf16 %v766_v41, %v766_v41  ;;  %v770_v53 = vmax.f32 %v738_v37, 0.0  ;;  %v717_v25 = vld [vmem:[#allocation2 + $0xe0] sm:$0xff]  ;;  %v718_v29 = vld [vmem:[#allocation2 + $0xe8] sm:$0xff] }
 0x119   : > { %826 = vst.msk [vmem:[%s1495_s3 + $0x10] sm:$0xf] %vm821_vm4, %v793_v28  ;;  %v771_v54 = vmax.f32 %v739_v38, 0.0  ;;  %v799_v56 = vpack.c.bf16 %v767_v42, %v767_v42  ;;  %v741_v57 = vadd.f32 %v1321_v58, %v705_v46  ;;  %v742_v59 = vadd.f32 %v1321_v58, %v706_v47  ;;  %v719_v33 = vld [vmem:[#allocation2 + $0xf0] sm:$0xff]  ;;  %v720_v37 = vld [vmem:[#allocation2 + $0xf8] sm:$0xff] }
 0x11a   : > { %827 = vst.msk [vmem:[%s1495_s3 + $0x14] sm:$0xf] %vm821_vm4, %v794_v35  ;;  %v743_v60 = vadd.f32 %v1321_v58, %v707_v48  ;;  %v800_v62 = vpack.c.bf16 %v768_v44, %v768_v44  ;;  %v772_v63 = vmax.f32 %v740_v45, 0.0  ;;  %v744_v0 = vadd.f32 %v1321_v58, %v708_v51 }
 0x11b   : > { %828 = vst.msk [vmem:[%s1495_s3 + $0x18] sm:$0xf] %vm821_vm4, %v795_v39  ;;  %v801_v2 = vpack.c.bf16 %v769_v50, %v769_v50  ;;  %v773_v3 = vmax.f32 %v741_v57, 0.0  ;;  %v745_v4 = vadd.f32 %v1321_v58, %v709_v55  ;;  %v802_v6 = vpack.c.bf16 %v770_v53, %v770_v53 }
 0x11c   : > { %829 = vst.msk [vmem:[%s1495_s3 + $0x1c] sm:$0xf] %vm821_vm4, %v796_v43  ;;  %v774_v7 = vmax.f32 %v742_v59, 0.0  ;;  %v746_v8 = vadd.f32 %v1321_v58, %v710_v61  ;;  %v803_v10 = vpack.c.bf16 %v771_v54, %v771_v54  ;;  %v775_v11 = vmax.f32 %v743_v60, 0.0 }
 0x11d   : > { %830 = vst.msk [vmem:[%s1495_s3 + $0x20] sm:$0xf] %vm821_vm4, %v797_v49  ;;  %v747_v12 = vadd.f32 %v1321_v58, %v711_v1  ;;  %v804_v14 = vpack.c.bf16 %v772_v63, %v772_v63  ;;  %v776_v15 = vmax.f32 %v744_v0, 0.0  ;;  %v748_v16 = vadd.f32 %v1321_v58, %v712_v5 }
 0x11e   : > { %831 = vst.msk [vmem:[%s1495_s3 + $0x24] sm:$0xf] %vm821_vm4, %v798_v52  ;;  %v805_v18 = vpack.c.bf16 %v773_v3, %v773_v3  ;;  %v777_v19 = vmax.f32 %v745_v4, 0.0  ;;  %v749_v20 = vadd.f32 %v1321_v58, %v713_v9  ;;  %v806_v22 = vpack.c.bf16 %v774_v7, %v774_v7 }
 0x11f   : > { %832 = vst.msk [vmem:[%s1495_s3 + $0x28] sm:$0xf] %vm821_vm4, %v799_v56  ;;  %v778_v23 = vmax.f32 %v746_v8, 0.0  ;;  %v750_v24 = vadd.f32 %v1321_v58, %v714_v13  ;;  %v807_v26 = vpack.c.bf16 %v775_v11, %v775_v11  ;;  %v779_v27 = vmax.f32 %v747_v12, 0.0 }
 0x120   : > { %833 = vst.msk [vmem:[%s1495_s3 + $0x2c] sm:$0xf] %vm821_vm4, %v800_v62  ;;  %v751_v28 = vadd.f32 %v1321_v58, %v715_v17  ;;  %v808_v30 = vpack.c.bf16 %v776_v15, %v776_v15  ;;  %v780_v31 = vmax.f32 %v748_v16, 0.0  ;;  %v752_v32 = vadd.f32 %v1321_v58, %v716_v21 }
 0x121   : > { %834 = vst.msk [vmem:[%s1495_s3 + $0x30] sm:$0xf] %vm821_vm4, %v801_v2  ;;  %v809_v34 = vpack.c.bf16 %v777_v19, %v777_v19  ;;  %v781_v35 = vmax.f32 %v749_v20, 0.0  ;;  %v753_v36 = vadd.f32 %v1321_v58, %v717_v25  ;;  %v810_v38 = vpack.c.bf16 %v778_v23, %v778_v23 }
 0x122   : > { %835 = vst.msk [vmem:[%s1495_s3 + $0x34] sm:$0xf] %vm821_vm4, %v802_v6  ;;  %v782_v39 = vmax.f32 %v750_v24, 0.0  ;;  %v754_v40 = vadd.f32 %v1321_v58, %v718_v29  ;;  %v811_v41 = vpack.c.bf16 %v779_v27, %v779_v27  ;;  %v783_v42 = vmax.f32 %v751_v28, 0.0 }
 0x123   : > { %836 = vst.msk [vmem:[%s1495_s3 + $0x38] sm:$0xf] %vm821_vm4, %v803_v10  ;;  %v755_v43 = vadd.f32 %v1321_v58, %v719_v33  ;;  %v812_v44 = vpack.c.bf16 %v780_v31, %v780_v31  ;;  %v784_v45 = vmax.f32 %v752_v32, 0.0  ;;  %v756_v46 = vadd.f32 %v1321_v58, %v720_v37 }
 0x124   : > { %837 = vst.msk [vmem:[%s1495_s3 + $0x3c] sm:$0xf] %vm821_vm4, %v804_v14  ;;  %v813_v47 = vpack.c.bf16 %v781_v35, %v781_v35  ;;  %v785_v48 = vmax.f32 %v753_v36, 0.0  ;;  %v814_v49 = vpack.c.bf16 %v782_v39, %v782_v39  ;;  %v786_v50 = vmax.f32 %v754_v40, 0.0 }
 0x125   : > { %838 = vst.msk [vmem:[%s1495_s3 + $0x40] sm:$0xf] %vm821_vm4, %v805_v18  ;;  %v815_v58 = vpack.c.bf16 %v783_v42, %v783_v42  ;;  %v787_v51 = vmax.f32 %v755_v43, 0.0  ;;  %v816_v52 = vpack.c.bf16 %v784_v45, %v784_v45  ;;  %v788_v53 = vmax.f32 %v756_v46, 0.0 }
 0x126   : > { %839 = vst.msk [vmem:[%s1495_s3 + $0x44] sm:$0xf] %vm821_vm4, %v806_v22  ;;  %v817_v54 = vpack.c.bf16 %v785_v48, %v785_v48  ;;  %v818_v55 = vpack.c.bf16 %v786_v50, %v786_v50 }
 0x127   : > { %840 = vst.msk [vmem:[%s1495_s3 + $0x48] sm:$0xf] %vm821_vm4, %v807_v26  ;;  %v819_v56 = vpack.c.bf16 %v787_v51, %v787_v51  ;;  %v820_v57 = vpack.c.bf16 %v788_v53, %v788_v53 }
 0x128   : > { %841 = vst.msk [vmem:[%s1495_s3 + $0x4c] sm:$0xf] %vm821_vm4, %v808_v30 }
 0x129   : > { %842 = vst.msk [vmem:[%s1495_s3 + $0x50] sm:$0xf] %vm821_vm4, %v809_v34 }
 0x12a   : > { %843 = vst.msk [vmem:[%s1495_s3 + $0x54] sm:$0xf] %vm821_vm4, %v810_v38 }
 0x12b   : > { %844 = vst.msk [vmem:[%s1495_s3 + $0x58] sm:$0xf] %vm821_vm4, %v811_v41 }
 0x12c   : > { %845 = vst.msk [vmem:[%s1495_s3 + $0x5c] sm:$0xf] %vm821_vm4, %v812_v44 }
 0x12d   : > { %846 = vst.msk [vmem:[%s1495_s3 + $0x60] sm:$0xf] %vm821_vm4, %v813_v47 }
 0x12e   : > { %847 = vst.msk [vmem:[%s1495_s3 + $0x64] sm:$0xf] %vm821_vm4, %v814_v49 }
 0x12f   : > { %848 = vst.msk [vmem:[%s1495_s3 + $0x68] sm:$0xf] %vm821_vm4, %v815_v58 }
 0x130   : > { %849 = vst.msk [vmem:[%s1495_s3 + $0x6c] sm:$0xf] %vm821_vm4, %v816_v52 }
 0x131   : > { %850 = vst.msk [vmem:[%s1495_s3 + $0x70] sm:$0xf] %vm821_vm4, %v817_v54 }
 0x132   : > { %851 = vst.msk [vmem:[%s1495_s3 + $0x74] sm:$0xf] %vm821_vm4, %v818_v55 }
 0x133   : > { %852 = vst.msk [vmem:[%s1495_s3 + $0x78] sm:$0xf] %vm821_vm4, %v819_v56 }
 0x134   : > { %853 = vst.msk [vmem:[%s1495_s3 + $0x7c] sm:$0xf] %vm821_vm4, %v820_v57 }
 0x135 PF: > { %s13_s14 = sadd.s32 1, %s1160_s14   ;;  %s1496_s12 = smov %s1156_s13 }
 0x136   : > { %p10_p7 = scmp.ge.s32.totalorder %s13_s14, 5   ;;  %s1497_s13 = smov %s1499_s15 }
 0x138   :  { %12 = sbr.rel (!%p10_p7) target bundleno = 2 (0x2), region = 76 }

// kernel: layer_forward.10
= control target key start
LH: loop header
LB: loop body
LE: loop exit
PB: predicated region body
PF: predicated region fallthrough
CT: control target
= control target key end

     0   :  { %s1765_s12 = smov 0   ;;  %s1767_s13 = smov 0   ;;  %s2391_s0 = inlined_call_operand.vmem [shape: bf16[9,512,32], index: 0, kind: input, shape index: {}]   ;;  %s2392_s1 = inlined_call_operand.vmem [shape: bf16[9,32,72], index: 1, kind: input, shape index: {}]   ;;  %s2393_s2 = inlined_call_operand.vmem [shape: f32[1,72], index: 2, kind: input, shape index: {}]   ;;  %s2394_s3 = inlined_call_operand.vmem [shape: bf16[512,72], index: 3, kind: output, shape index: {}]  }
   0x1   :  { %s1769_s14 = smov 0  }
   0x2 LB: > { %s25_s15 = sadd.s32 1, %s1738_s13  ;;  %p1473_p0 = scmp.ge.s32.totalorder %s1742_s14, 1  ;;  %s1742_s14 = sphi %s1769_s14, %s13_s14   ;;  %s1738_s13 = sphi %s1767_s13, %s2396_s13   ;;  %s1734_s12 = sphi %s1765_s12, %s2395_s12  }
   0x3   : > { %p26_p1 = scmp.ge.s32.totalorder %s25_s15, 9  ;;  %p188_p2 = scmp.lt.s32.totalorder %s1742_s14, 10 }
   0x5   : > { %s2398_s15 = smov (%p26_p1, %s25_s15), 0  ;;  %p189_p3 = pnand %p1473_p0, %p188_p2 }
   0x6   : > { %p231_p4 = scmp.lt.s32.totalorder (!%p189_p3), %s1734_s12, 8  ;;  %p1478_p5 = scmp.ne.s32.totalorder (!%p189_p3), %s1734_s12, 0 }
   0x7   : > { %192 = sbr.rel (%p189_p3) target bundleno = 420 (0x1a4), region = 32 }
   0xc   : > { %s232_s16 = scalar_select %p231_p4, %s1734_s12, 8 }
   0xd   : > { %264 = sbr.rel (%p1478_p5) target bundleno = 83 (0x53), region = 36 }
   0xe   : > { %s1652_s17 = sshll.u32 %s232_s16, 8  ;;  %s1653_s18 = sshll.u32 %s232_s16, 4 }
   0xf   : > { %s1790_s21 = scalar_lea.vmem %s2391_s0, %s1652_s17  ;;  %s1795_s24 = scalar_lea.vmem %s2392_s1, %s1653_s18 }
  0x12   : > { %vm265_vm0 = vcmask 588800   ;;  %v1744_v0 = vmov 0.0  }
  0x13   : > { %266 = vst.msk [vmem:[#allocation2] sm:$0xff] %vm265_vm0, %v1744_v0 }
  0x14   : > { %267 = vst.msk [vmem:[#allocation2 + $0x8] sm:$0xff] %vm265_vm0, %v1744_v0 }
  0x15   : > { %268 = vst.msk [vmem:[#allocation2 + $0x10] sm:$0xff] %vm265_vm0, %v1744_v0 }
  0x16   : > { %269 = vst.msk [vmem:[#allocation2 + $0x18] sm:$0xff] %vm265_vm0, %v1744_v0 }
  0x17   : > { %270 = vst.msk [vmem:[#allocation2 + $0x20] sm:$0xff] %vm265_vm0, %v1744_v0 }
  0x18   : > { %271 = vst.msk [vmem:[#allocation2 + $0x28] sm:$0xff] %vm265_vm0, %v1744_v0 }
  0x19   : > { %272 = vst.msk [vmem:[#allocation2 + $0x30] sm:$0xff] %vm265_vm0, %v1744_v0 }
  0x1a   : > { %273 = vst.msk [vmem:[#allocation2 + $0x38] sm:$0xff] %vm265_vm0, %v1744_v0 }
  0x1b   : > { %274 = vst.msk [vmem:[#allocation2 + $0x40] sm:$0xff] %vm265_vm0, %v1744_v0 }
  0x1c   : > { %275 = vst.msk [vmem:[#allocation2 + $0x48] sm:$0xff] %vm265_vm0, %v1744_v0 }
  0x1d   : > { %276 = vst.msk [vmem:[#allocation2 + $0x50] sm:$0xff] %vm265_vm0, %v1744_v0 }
  0x1e   : > { %277 = vst.msk [vmem:[#allocation2 + $0x58] sm:$0xff] %vm265_vm0, %v1744_v0 }
  0x1f   : > { %278 = vst.msk [vmem:[#allocation2 + $0x60] sm:$0xff] %vm265_vm0, %v1744_v0 }
  0x20   : > { %279 = vst.msk [vmem:[#allocation2 + $0x68] sm:$0xff] %vm265_vm0, %v1744_v0 }
  0x21   : > { %280 = vst.msk [vmem:[#allocation2 + $0x70] sm:$0xff] %vm265_vm0, %v1744_v0 }
  0x22   : > { %281 = vst.msk [vmem:[#allocation2 + $0x78] sm:$0xff] %vm265_vm0, %v1744_v0 }
  0x23   : > { %282 = vst.msk [vmem:[#allocation2 + $0x80] sm:$0xff] %vm265_vm0, %v1744_v0 }
  0x24   : > { %283 = vst.msk [vmem:[#allocation2 + $0x88] sm:$0xff] %vm265_vm0, %v1744_v0 }
  0x25   : > { %284 = vst.msk [vmem:[#allocation2 + $0x90] sm:$0xff] %vm265_vm0, %v1744_v0 }
  0x26   : > { %285 = vst.msk [vmem:[#allocation2 + $0x98] sm:$0xff] %vm265_vm0, %v1744_v0 }
  0x27   : > { %286 = vst.msk [vmem:[#allocation2 + $0xa0] sm:$0xff] %vm265_vm0, %v1744_v0 }
  0x28   : > { %287 = vst.msk [vmem:[#allocation2 + $0xa8] sm:$0xff] %vm265_vm0, %v1744_v0 }
  0x29   : > { %288 = vst.msk [vmem:[#allocation2 + $0xb0] sm:$0xff] %vm265_vm0, %v1744_v0 }
  0x2a   : > { %289 = vst.msk [vmem:[#allocation2 + $0xb8] sm:$0xff] %vm265_vm0, %v1744_v0 }
  0x2b   : > { %290 = vst.msk [vmem:[#allocation2 + $0xc0] sm:$0xff] %vm265_vm0, %v1744_v0 }
  0x2c   : > { %291 = vst.msk [vmem:[#allocation2 + $0xc8] sm:$0xff] %vm265_vm0, %v1744_v0 }
  0x2d   : > { %292 = vst.msk [vmem:[#allocation2 + $0xd0] sm:$0xff] %vm265_vm0, %v1744_v0 }
  0x2e   : > { %293 = vst.msk [vmem:[#allocation2 + $0xd8] sm:$0xff] %vm265_vm0, %v1744_v0 }
  0x2f   : > { %294 = vst.msk [vmem:[#allocation2 + $0xe0] sm:$0xff] %vm265_vm0, %v1744_v0 }
  0x30   : > { %295 = vst.msk [vmem:[#allocation2 + $0xe8] sm:$0xff] %vm265_vm0, %v1744_v0 }
  0x31   : > { %296 = vst.msk [vmem:[#allocation2 + $0xf0] sm:$0xff] %vm265_vm0, %v1744_v0 }
  0x32   : > { %297 = vst.msk [vmem:[#allocation2 + $0xf8] sm:$0xff] %vm265_vm0, %v1744_v0 }
  0x33   : > { %298 = vst.msk [vmem:[#allocation2 + $0x100] sm:$0xff] %vm265_vm0, %v1744_v0 }
  0x34   : > { %299 = vst.msk [vmem:[#allocation2 + $0x108] sm:$0xff] %vm265_vm0, %v1744_v0 }
  0x35   : > { %300 = vst.msk [vmem:[#allocation2 + $0x110] sm:$0xff] %vm265_vm0, %v1744_v0 }
  0x36   : > { %301 = vst.msk [vmem:[#allocation2 + $0x118] sm:$0xff] %vm265_vm0, %v1744_v0 }
  0x37   : > { %302 = vst.msk [vmem:[#allocation2 + $0x120] sm:$0xff] %vm265_vm0, %v1744_v0 }
  0x38   : > { %303 = vst.msk [vmem:[#allocation2 + $0x128] sm:$0xff] %vm265_vm0, %v1744_v0 }
  0x39   : > { %304 = vst.msk [vmem:[#allocation2 + $0x130] sm:$0xff] %vm265_vm0, %v1744_v0 }
  0x3a   : > { %305 = vst.msk [vmem:[#allocation2 + $0x138] sm:$0xff] %vm265_vm0, %v1744_v0 }
  0x3b   : > { %306 = vst.msk [vmem:[#allocation2 + $0x140] sm:$0xff] %vm265_vm0, %v1744_v0 }
  0x3c   : > { %307 = vst.msk [vmem:[#allocation2 + $0x148] sm:$0xff] %vm265_vm0, %v1744_v0 }
  0x3d   : > { %308 = vst.msk [vmem:[#allocation2 + $0x150] sm:$0xff] %vm265_vm0, %v1744_v0 }
  0x3e   : > { %309 = vst.msk [vmem:[#allocation2 + $0x158] sm:$0xff] %vm265_vm0, %v1744_v0 }
  0x3f   : > { %310 = vst.msk [vmem:[#allocation2 + $0x160] sm:$0xff] %vm265_vm0, %v1744_v0 }
  0x40   : > { %311 = vst.msk [vmem:[#allocation2 + $0x168] sm:$0xff] %vm265_vm0, %v1744_v0 }
  0x41   : > { %312 = vst.msk [vmem:[#allocation2 + $0x170] sm:$0xff] %vm265_vm0, %v1744_v0 }
  0x42   : > { %313 = vst.msk [vmem:[#allocation2 + $0x178] sm:$0xff] %vm265_vm0, %v1744_v0 }
  0x43   : > { %314 = vst.msk [vmem:[#allocation2 + $0x180] sm:$0xff] %vm265_vm0, %v1744_v0 }
  0x44   : > { %315 = vst.msk [vmem:[#allocation2 + $0x188] sm:$0xff] %vm265_vm0, %v1744_v0 }
  0x45   : > { %316 = vst.msk [vmem:[#allocation2 + $0x190] sm:$0xff] %vm265_vm0, %v1744_v0 }
  0x46   : > { %317 = vst.msk [vmem:[#allocation2 + $0x198] sm:$0xff] %vm265_vm0, %v1744_v0 }
  0x47   : > { %318 = vst.msk [vmem:[#allocation2 + $0x1a0] sm:$0xff] %vm265_vm0, %v1744_v0 }
  0x48   : > { %319 = vst.msk [vmem:[#allocation2 + $0x1a8] sm:$0xff] %vm265_vm0, %v1744_v0 }
  0x49   : > { %320 = vst.msk [vmem:[#allocation2 + $0x1b0] sm:$0xff] %vm265_vm0, %v1744_v0 }
  0x4a   : > { %321 = vst.msk [vmem:[#allocation2 + $0x1b8] sm:$0xff] %vm265_vm0, %v1744_v0 }
  0x4b   : > { %322 = vst.msk [vmem:[#allocation2 + $0x1c0] sm:$0xff] %vm265_vm0, %v1744_v0 }
  0x4c   : > { %323 = vst.msk [vmem:[#allocation2 + $0x1c8] sm:$0xff] %vm265_vm0, %v1744_v0 }
  0x4d   : > { %324 = vst.msk [vmem:[#allocation2 + $0x1d0] sm:$0xff] %vm265_vm0, %v1744_v0 }
  0x4e   : > { %325 = vst.msk [vmem:[#allocation2 + $0x1d8] sm:$0xff] %vm265_vm0, %v1744_v0 }
  0x4f   : > { %326 = vst.msk [vmem:[#allocation2 + $0x1e0] sm:$0xff] %vm265_vm0, %v1744_v0 }
  0x50   : > { %327 = vst.msk [vmem:[#allocation2 + $0x1e8] sm:$0xff] %vm265_vm0, %v1744_v0 }
  0x51   : > { %328 = vst.msk [vmem:[#allocation2 + $0x1f0] sm:$0xff] %vm265_vm0, %v1744_v0 }
  0x52   : > { %329 = vst.msk [vmem:[#allocation2 + $0x1f8] sm:$0xff] %vm265_vm0, %v1744_v0 }
  0x53 PF: > { %v1687_v1 = vld [vmem:[%s1795_s24 + $0x8] sm:$0xff]  ;;  %v1686_v2 = vld [vmem:[%s1795_s24] sm:$0xff]  ;;  %vm634_vm1 = vcmask 261120   ;;  %v1656_v11 = vld [vmem:[%s1790_s21 + $0x10] sm:$0xff]  ;;  %vm964_vm2 = vcmask 588800   ;;  %p1647_p6 = scmp.ne.s32.totalorder %s1734_s12, 8 }
  0x54   : > { %737 = vmatpush.bf16.msra.mxu0 %v1687_v1  ;;  %1688 = vmatpush.bf16.msra.mxu1 %v1687_v1  ;;  %v1654_v3 = vld [vmem:[%s1790_s21] sm:$0xff]  ;;  %v1655_v7 = vld [vmem:[%s1790_s21 + $0x8] sm:$0xff]  ;;  %v1664_v12 = vld [vmem:[%s1790_s21 + $0x50] sm:$0xff] }
  0x55   : > { %1689 = vmatpush.bf16.msra.mxu2 %v1687_v1  ;;  %1690 = vmatpush.bf16.msra.mxu3 %v1687_v1  ;;  %v1662_v4 = vld [vmem:[%s1790_s21 + $0x40] sm:$0xff]  ;;  %v1663_v8 = vld [vmem:[%s1790_s21 + $0x48] sm:$0xff]  ;;  %v1672_v13 = vld [vmem:[%s1790_s21 + $0x90] sm:$0xff] }
  0x56   : > { %v1670_v5 = vld [vmem:[%s1790_s21 + $0x80] sm:$0xff]  ;;  %v1671_v9 = vld [vmem:[%s1790_s21 + $0x88] sm:$0xff]  ;;  %v1680_v14 = vld [vmem:[%s1790_s21 + $0xd0] sm:$0xff] }
  0x57   : > { %v1678_v6 = vld [vmem:[%s1790_s21 + $0xc0] sm:$0xff]  ;;  %v1679_v10 = vld [vmem:[%s1790_s21 + $0xc8] sm:$0xff]  ;;  %v1657_v15 = vld [vmem:[%s1790_s21 + $0x18] sm:$0xff] }
  0x58   : > { %738 = vmatpush.bf16.msra.mxu0 %v1686_v2  ;;  %1691 = vmatpush.bf16.msra.mxu1 %v1686_v2  ;;  %v1665_v16 = vld [vmem:[%s1790_s21 + $0x58] sm:$0xff]  ;;  %v1658_v19 = vld [vmem:[%s1790_s21 + $0x20] sm:$0xff]  ;;  %v1659_v23 = vld [vmem:[%s1790_s21 + $0x28] sm:$0xff] }
  0x59   : > { %1692 = vmatpush.bf16.msra.mxu2 %v1686_v2  ;;  %1693 = vmatpush.bf16.msra.mxu3 %v1686_v2  ;;  %v1673_v17 = vld [vmem:[%s1790_s21 + $0x98] sm:$0xff]  ;;  %v1666_v20 = vld [vmem:[%s1790_s21 + $0x60] sm:$0xff]  ;;  %v1667_v24 = vld [vmem:[%s1790_s21 + $0x68] sm:$0xff] }
  0x5a   : > { %v1681_v18 = vld [vmem:[%s1790_s21 + $0xd8] sm:$0xff]  ;;  %v1674_v21 = vld [vmem:[%s1790_s21 + $0xa0] sm:$0xff]  ;;  %v1675_v25 = vld [vmem:[%s1790_s21 + $0xa8] sm:$0xff] }
  0x5b   : > { %1615 = vmatmul.msk.bf16.vlgmr.msra.gmra.mxu0 %vm634_vm1, %v1654_v3  ;;  %1623 = vmatmul.msk.bf16.vlgmr.msra.gmra.mxu1 %vm634_vm1, %v1662_v4  ;;  %v1682_v22 = vld [vmem:[%s1790_s21 + $0xe0] sm:$0xff]  ;;  %v1683_v26 = vld [vmem:[%s1790_s21 + $0xe8] sm:$0xff]  ;;  %v1660_v27 = vld [vmem:[%s1790_s21 + $0x30] sm:$0xff] }
  0x5c   : > { %1631 = vmatmul.msk.bf16.vlgmr.msra.gmra.mxu2 %vm634_vm1, %v1670_v5  ;;  %1639 = vmatmul.msk.bf16.vlgmr.msra.gmra.mxu3 %vm634_vm1, %v1678_v6  ;;  %v1668_v28 = vld [vmem:[%s1790_s21 + $0x70] sm:$0xff]  ;;  %v1661_v31 = vld [vmem:[%s1790_s21 + $0x38] sm:$0xff]  ;;  %v330_v35 = vld [vmem:[#allocation2] sm:$0xff] }
  0x5d   : > { %v1676_v29 = vld [vmem:[%s1790_s21 + $0xb0] sm:$0xff]  ;;  %v1669_v32 = vld [vmem:[%s1790_s21 + $0x78] sm:$0xff]  ;;  %v346_v36 = vld [vmem:[#allocation2 + $0x80] sm:$0xff] }
  0x5e   : > { %v1684_v30 = vld [vmem:[%s1790_s21 + $0xf0] sm:$0xff]  ;;  %v1677_v33 = vld [vmem:[%s1790_s21 + $0xb8] sm:$0xff]  ;;  %v362_v41 = vld [vmem:[#allocation2 + $0x100] sm:$0xff] }
  0x5f   : > { %v1685_v34 = vld [vmem:[%s1790_s21 + $0xf8] sm:$0xff]  ;;  %v378_v42 = vld [vmem:[#allocation2 + $0x180] sm:$0xff]  ;;  %v331_v43 = vld [vmem:[#allocation2 + $0x8] sm:$0xff] }
  0x60   : > { %v347_v44 = vld [vmem:[#allocation2 + $0x88] sm:$0xff]  ;;  %v332_v55 = vld [vmem:[#allocation2 + $0x10] sm:$0xff]  ;;  %v333_v3 = vld [vmem:[#allocation2 + $0x18] sm:$0xff] }
  0x61   : > { %v363_v53 = vld [vmem:[#allocation2 + $0x108] sm:$0xff]  ;;  %v348_v56 = vld [vmem:[#allocation2 + $0x90] sm:$0xff]  ;;  %v349_v4 = vld [vmem:[#allocation2 + $0x98] sm:$0xff] }
  0x62   : > { %v379_v54 = vld [vmem:[#allocation2 + $0x188] sm:$0xff]  ;;  %v364_v1 = vld [vmem:[#allocation2 + $0x110] sm:$0xff] }
  0x63   : > { %v380_v2 = vld [vmem:[#allocation2 + $0x190] sm:$0xff] }
  0x6b   : > { %1616 = vmatmul.msk.bf16.gmra.mxu0 %vm634_vm1, %v1655_v7  ;;  %1624 = vmatmul.msk.bf16.gmra.mxu1 %vm634_vm1, %v1663_v8 }
  0x6c   : > { %1632 = vmatmul.msk.bf16.gmra.mxu2 %vm634_vm1, %v1671_v9  ;;  %1640 = vmatmul.msk.bf16.gmra.mxu3 %vm634_vm1, %v1679_v10 }
  0x7b   : > { %1617 = vmatmul.msk.bf16.gmra.mxu0 %vm634_vm1, %v1656_v11  ;;  %1625 = vmatmul.msk.bf16.gmra.mxu1 %vm634_vm1, %v1664_v12 }
  0x7c   : > { %1633 = vmatmul.msk.bf16.gmra.mxu2 %vm634_vm1, %v1672_v13  ;;  %1641 = vmatmul.msk.bf16.gmra.mxu3 %vm634_vm1, %v1680_v14  ;;  %v365_v13 = vld [vmem:[#allocation2 + $0x118] sm:$0xff] }
  0x7d   : > { %v381_v14 = vld [vmem:[#allocation2 + $0x198] sm:$0xff] }
  0x8b   : > { %1618 = vmatmul.msk.bf16.gmra.mxu0 %vm634_vm1, %v1657_v15  ;;  %1626 = vmatmul.msk.bf16.gmra.mxu1 %vm634_vm1, %v1665_v16  ;;  %v334_v15 = vld [vmem:[#allocation2 + $0x20] sm:$0xff] }
  0x8c   : > { %1634 = vmatmul.msk.bf16.gmra.mxu2 %vm634_vm1, %v1673_v17  ;;  %1642 = vmatmul.msk.bf16.gmra.mxu3 %vm634_vm1, %v1681_v18  ;;  %v350_v16 = vld [vmem:[#allocation2 + $0xa0] sm:$0xff] }
  0x9b   : > { %1619 = vmatmul.msk.bf16.gmra.mxu0 %vm634_vm1, %v1658_v19  ;;  %1627 = vmatmul.msk.bf16.gmra.mxu1 %vm634_vm1, %v1666_v20 }
  0x9c   : > { %1635 = vmatmul.msk.bf16.gmra.mxu2 %vm634_vm1, %v1674_v21  ;;  %1643 = vmatmul.msk.bf16.gmra.mxu3 %vm634_vm1, %v1682_v22 }
  0xab   : > { %1620 = vmatmul.msk.bf16.gmra.mxu0 %vm634_vm1, %v1659_v23  ;;  %1628 = vmatmul.msk.bf16.gmra.mxu1 %vm634_vm1, %v1667_v24 }
  0xac   : > { %1636 = vmatmul.msk.bf16.gmra.mxu2 %vm634_vm1, %v1675_v25  ;;  %1644 = vmatmul.msk.bf16.gmra.mxu3 %vm634_vm1, %v1683_v26  ;;  %v366_v25 = vld [vmem:[#allocation2 + $0x120] sm:$0xff] }
  0xad   : > { %v382_v26 = vld [vmem:[#allocation2 + $0x1a0] sm:$0xff] }
  0xbb   : > { %1621 = vmatmul.msk.bf16.gmra.mxu0 %vm634_vm1, %v1660_v27  ;;  %1629 = vmatmul.msk.bf16.gmra.mxu1 %vm634_vm1, %v1668_v28  ;;  %v335_v27 = vld [vmem:[#allocation2 + $0x28] sm:$0xff] }
  0xbc   : > { %1637 = vmatmul.msk.bf16.gmra.mxu2 %vm634_vm1, %v1676_v29  ;;  %1645 = vmatmul.msk.bf16.gmra.mxu3 %vm634_vm1, %v1684_v30  ;;  %v351_v28 = vld [vmem:[#allocation2 + $0xa8] sm:$0xff] }
  0xcb   : > { %1622 = vmatmul.msk.bf16.gmra.mxu0 %vm634_vm1, %v1661_v31  ;;  %1630 = vmatmul.msk.bf16.gmra.mxu1 %vm634_vm1, %v1669_v32 }
  0xcc   : > { %1638 = vmatmul.msk.bf16.gmra.mxu2 %vm634_vm1, %v1677_v33  ;;  %1646 = vmatmul.msk.bf16.gmra.mxu3 %vm634_vm1, %v1685_v34 }
  0xd8   : > { %v740_v37 = vpop.f32.mrf.mxu0  ;;  %v780_v38 = vpop.f32.mrf.mxu1 }
  0xd9   : > { %v900_v39 = vadd.f32 %v740_v37, %v330_v35  ;;  %v916_v40 = vadd.f32 %v780_v38, %v346_v36  ;;  %v367_v37 = vld [vmem:[#allocation2 + $0x128] sm:$0xff] }
  0xda   : > { %v383_v38 = vld [vmem:[#allocation2 + $0x1a8] sm:$0xff] }
  0xdb   : > { %965 = vst.msk [vmem:[#allocation2] sm:$0xff] %vm964_vm2, %v900_v39  ;;  %v336_v39 = vld [vmem:[#allocation2 + $0x30] sm:$0xff] }
  0xdc   : > { %981 = vst.msk [vmem:[#allocation2 + $0x80] sm:$0xff] %vm964_vm2, %v916_v40  ;;  %v352_v40 = vld [vmem:[#allocation2 + $0xb0] sm:$0xff] }
  0xdf   : > { %v820_v45 = vpop.f32.mrf.mxu2  ;;  %v860_v46 = vpop.f32.mrf.mxu3 }
  0xe0   : > { %v932_v47 = vadd.f32 %v820_v45, %v362_v41  ;;  %v948_v48 = vadd.f32 %v860_v46, %v378_v42  ;;  %v742_v49 = vpop.f32.mrf.mxu0  ;;  %v782_v50 = vpop.f32.mrf.mxu1 }
  0xe1   : > { %v901_v51 = vadd.f32 %v742_v49, %v331_v43  ;;  %v917_v52 = vadd.f32 %v782_v50, %v347_v44  ;;  %v368_v49 = vld [vmem:[#allocation2 + $0x130] sm:$0xff] }
  0xe2   : > { %997 = vst.msk [vmem:[#allocation2 + $0x100] sm:$0xff] %vm964_vm2, %v932_v47  ;;  %v384_v50 = vld [vmem:[#allocation2 + $0x1b0] sm:$0xff] }
  0xe3   : > { %1013 = vst.msk [vmem:[#allocation2 + $0x180] sm:$0xff] %vm964_vm2, %v948_v48 }
  0xe4   : > { %966 = vst.msk [vmem:[#allocation2 + $0x8] sm:$0xff] %vm964_vm2, %v901_v51  ;;  %v337_v51 = vld [vmem:[#allocation2 + $0x38] sm:$0xff] }
  0xe5   : > { %982 = vst.msk [vmem:[#allocation2 + $0x88] sm:$0xff] %vm964_vm2, %v917_v52  ;;  %v353_v52 = vld [vmem:[#allocation2 + $0xb8] sm:$0xff] }
  0xe7   : > { %v822_v57 = vpop.f32.mrf.mxu2  ;;  %v862_v58 = vpop.f32.mrf.mxu3 }
  0xe8   : > { %v933_v59 = vadd.f32 %v822_v57, %v363_v53  ;;  %v949_v60 = vadd.f32 %v862_v58, %v379_v54  ;;  %v745_v61 = vpop.f32.mrf.mxu0  ;;  %v785_v62 = vpop.f32.mrf.mxu1 }
  0xe9   : > { %v902_v63 = vadd.f32 %v745_v61, %v332_v55  ;;  %v918_v0 = vadd.f32 %v785_v62, %v348_v56  ;;  %v369_v61 = vld [vmem:[#allocation2 + $0x138] sm:$0xff] }
  0xea   : > { %998 = vst.msk [vmem:[#allocation2 + $0x108] sm:$0xff] %vm964_vm2, %v933_v59  ;;  %v385_v62 = vld [vmem:[#allocation2 + $0x1b8] sm:$0xff] }
  0xeb   : > { %1014 = vst.msk [vmem:[#allocation2 + $0x188] sm:$0xff] %vm964_vm2, %v949_v60 }
  0xec   : > { %967 = vst.msk [vmem:[#allocation2 + $0x10] sm:$0xff] %vm964_vm2, %v902_v63  ;;  %v338_v63 = vld [vmem:[#allocation2 + $0x40] sm:$0xff] }
  0xed   : > { %983 = vst.msk [vmem:[#allocation2 + $0x90] sm:$0xff] %vm964_vm2, %v918_v0  ;;  %v354_v0 = vld [vmem:[#allocation2 + $0xc0] sm:$0xff] }
  0xef   : > { %v825_v5 = vpop.f32.mrf.mxu2  ;;  %v865_v6 = vpop.f32.mrf.mxu3 }
  0xf0   : > { %v934_v7 = vadd.f32 %v825_v5, %v364_v1  ;;  %v950_v8 = vadd.f32 %v865_v6, %v380_v2  ;;  %v747_v9 = vpop.f32.mrf.mxu0  ;;  %v787_v10 = vpop.f32.mrf.mxu1 }
  0xf1   : > { %v903_v11 = vadd.f32 %v747_v9, %v333_v3  ;;  %v919_v12 = vadd.f32 %v787_v10, %v349_v4  ;;  %v370_v9 = vld [vmem:[#allocation2 + $0x140] sm:$0xff] }
  0xf2   : > { %999 = vst.msk [vmem:[#allocation2 + $0x110] sm:$0xff] %vm964_vm2, %v934_v7  ;;  %v386_v10 = vld [vmem:[#allocation2 + $0x1c0] sm:$0xff] }
  0xf3   : > { %1015 = vst.msk [vmem:[#allocation2 + $0x190] sm:$0xff] %vm964_vm2, %v950_v8 }
  0xf4   : > { %968 = vst.msk [vmem:[#allocation2 + $0x18] sm:$0xff] %vm964_vm2, %v903_v11  ;;  %v339_v11 = vld [vmem:[#allocation2 + $0x48] sm:$0xff] }
  0xf5   : > { %984 = vst.msk [vmem:[#allocation2 + $0x98] sm:$0xff] %vm964_vm2, %v919_v12  ;;  %v355_v12 = vld [vmem:[#allocation2 + $0xc8] sm:$0xff] }
  0xf7   : > { %v827_v17 = vpop.f32.mrf.mxu2  ;;  %v867_v18 = vpop.f32.mrf.mxu3 }
  0xf8   : > { %v935_v19 = vadd.f32 %v827_v17, %v365_v13  ;;  %v951_v20 = vadd.f32 %v867_v18, %v381_v14  ;;  %v750_v21 = vpop.f32.mrf.mxu0  ;;  %v790_v22 = vpop.f32.mrf.mxu1 }
  0xf9   : > { %v904_v23 = vadd.f32 %v750_v21, %v334_v15  ;;  %v920_v24 = vadd.f32 %v790_v22, %v350_v16  ;;  %v371_v21 = vld [vmem:[#allocation2 + $0x148] sm:$0xff] }
  0xfa   : > { %1000 = vst.msk [vmem:[#allocation2 + $0x118] sm:$0xff] %vm964_vm2, %v935_v19  ;;  %v387_v22 = vld [vmem:[#allocation2 + $0x1c8] sm:$0xff] }
  0xfb   : > { %1016 = vst.msk [vmem:[#allocation2 + $0x198] sm:$0xff] %vm964_vm2, %v951_v20 }
  0xfc   : > { %969 = vst.msk [vmem:[#allocation2 + $0x20] sm:$0xff] %vm964_vm2, %v904_v23  ;;  %v340_v23 = vld [vmem:[#allocation2 + $0x50] sm:$0xff] }
  0xfd   : > { %985 = vst.msk [vmem:[#allocation2 + $0xa0] sm:$0xff] %vm964_vm2, %v920_v24  ;;  %v356_v24 = vld [vmem:[#allocation2 + $0xd0] sm:$0xff] }
  0xff   : > { %v830_v29 = vpop.f32.mrf.mxu2  ;;  %v870_v30 = vpop.f32.mrf.mxu3 }
 0x100   : > { %v936_v31 = vadd.f32 %v830_v29, %v366_v25  ;;  %v952_v32 = vadd.f32 %v870_v30, %v382_v26  ;;  %v752_v33 = vpop.f32.mrf.mxu0  ;;  %v792_v34 = vpop.f32.mrf.mxu1 }
 0x101   : > { %v905_v35 = vadd.f32 %v752_v33, %v335_v27  ;;  %v921_v36 = vadd.f32 %v792_v34, %v351_v28  ;;  %v372_v33 = vld [vmem:[#allocation2 + $0x150] sm:$0xff] }
 0x102   : > { %1001 = vst.msk [vmem:[#allocation2 + $0x120] sm:$0xff] %vm964_vm2, %v936_v31  ;;  %v388_v34 = vld [vmem:[#allocation2 + $0x1d0] sm:$0xff] }
 0x103   : > { %1017 = vst.msk [vmem:[#allocation2 + $0x1a0] sm:$0xff] %vm964_vm2, %v952_v32 }
 0x104   : > { %970 = vst.msk [vmem:[#allocation2 + $0x28] sm:$0xff] %vm964_vm2, %v905_v35  ;;  %v341_v35 = vld [vmem:[#allocation2 + $0x58] sm:$0xff] }
 0x105   : > { %986 = vst.msk [vmem:[#allocation2 + $0xa8] sm:$0xff] %vm964_vm2, %v921_v36  ;;  %v357_v36 = vld [vmem:[#allocation2 + $0xd8] sm:$0xff] }
 0x107   : > { %v832_v41 = vpop.f32.mrf.mxu2  ;;  %v872_v42 = vpop.f32.mrf.mxu3 }
 0x108   : > { %v937_v43 = vadd.f32 %v832_v41, %v367_v37  ;;  %v953_v44 = vadd.f32 %v872_v42, %v383_v38  ;;  %v755_v45 = vpop.f32.mrf.mxu0  ;;  %v795_v46 = vpop.f32.mrf.mxu1 }
 0x109   : > { %v906_v47 = vadd.f32 %v755_v45, %v336_v39  ;;  %v922_v48 = vadd.f32 %v795_v46, %v352_v40  ;;  %v373_v45 = vld [vmem:[#allocation2 + $0x158] sm:$0xff] }
 0x10a   : > { %1002 = vst.msk [vmem:[#allocation2 + $0x128] sm:$0xff] %vm964_vm2, %v937_v43  ;;  %v389_v46 = vld [vmem:[#allocation2 + $0x1d8] sm:$0xff] }
 0x10b   : > { %1018 = vst.msk [vmem:[#allocation2 + $0x1a8] sm:$0xff] %vm964_vm2, %v953_v44 }
 0x10c   : > { %971 = vst.msk [vmem:[#allocation2 + $0x30] sm:$0xff] %vm964_vm2, %v906_v47  ;;  %v342_v47 = vld [vmem:[#allocation2 + $0x60] sm:$0xff] }
 0x10d   : > { %987 = vst.msk [vmem:[#allocation2 + $0xb0] sm:$0xff] %vm964_vm2, %v922_v48  ;;  %v358_v48 = vld [vmem:[#allocation2 + $0xe0] sm:$0xff] }
 0x10f   : > { %v835_v53 = vpop.f32.mrf.mxu2  ;;  %v875_v54 = vpop.f32.mrf.mxu3 }
 0x110   : > { %v938_v55 = vadd.f32 %v835_v53, %v368_v49  ;;  %v954_v56 = vadd.f32 %v875_v54, %v384_v50  ;;  %v757_v57 = vpop.f32.mrf.mxu0  ;;  %v797_v58 = vpop.f32.mrf.mxu1 }
 0x111   : > { %v907_v59 = vadd.f32 %v757_v57, %v337_v51  ;;  %v923_v60 = vadd.f32 %v797_v58, %v353_v52  ;;  %v374_v57 = vld [vmem:[#allocation2 + $0x160] sm:$0xff] }
 0x112   : > { %1003 = vst.msk [vmem:[#allocation2 + $0x130] sm:$0xff] %vm964_vm2, %v938_v55  ;;  %v390_v58 = vld [vmem:[#allocation2 + $0x1e0] sm:$0xff] }
 0x113   : > { %1019 = vst.msk [vmem:[#allocation2 + $0x1b0] sm:$0xff] %vm964_vm2, %v954_v56 }
 0x114   : > { %972 = vst.msk [vmem:[#allocation2 + $0x38] sm:$0xff] %vm964_vm2, %v907_v59  ;;  %v343_v59 = vld [vmem:[#allocation2 + $0x68] sm:$0xff] }
 0x115   : > { %988 = vst.msk [vmem:[#allocation2 + $0xb8] sm:$0xff] %vm964_vm2, %v923_v60  ;;  %v359_v60 = vld [vmem:[#allocation2 + $0xe8] sm:$0xff] }
 0x117   : > { %v837_v1 = vpop.f32.mrf.mxu2  ;;  %v877_v2 = vpop.f32.mrf.mxu3 }
 0x118   : > { %v939_v3 = vadd.f32 %v837_v1, %v369_v61  ;;  %v955_v4 = vadd.f32 %v877_v2, %v385_v62  ;;  %v760_v5 = vpop.f32.mrf.mxu0  ;;  %v800_v6 = vpop.f32.mrf.mxu1 }
 0x119   : > { %v908_v7 = vadd.f32 %v760_v5, %v338_v63  ;;  %v924_v8 = vadd.f32 %v800_v6, %v354_v0  ;;  %v375_v5 = vld [vmem:[#allocation2 + $0x168] sm:$0xff] }
 0x11a   : > { %1004 = vst.msk [vmem:[#allocation2 + $0x138] sm:$0xff] %vm964_vm2, %v939_v3  ;;  %v391_v6 = vld [vmem:[#allocation2 + $0x1e8] sm:$0xff] }
 0x11b   : > { %1020 = vst.msk [vmem:[#allocation2 + $0x1b8] sm:$0xff] %vm964_vm2, %v955_v4 }
 0x11c   : > { %973 = vst.msk [vmem:[#allocation2 + $0x40] sm:$0xff] %vm964_vm2, %v908_v7  ;;  %v344_v7 = vld [vmem:[#allocation2 + $0x70] sm:$0xff] }
 0x11d   : > { %989 = vst.msk [vmem:[#allocation2 + $0xc0] sm:$0xff] %vm964_vm2, %v924_v8  ;;  %v360_v8 = vld [vmem:[#allocation2 + $0xf0] sm:$0xff] }
 0x11f   : > { %v840_v13 = vpop.f32.mrf.mxu2  ;;  %v880_v14 = vpop.f32.mrf.mxu3 }
 0x120   : > { %v940_v15 = vadd.f32 %v840_v13, %v370_v9  ;;  %v956_v16 = vadd.f32 %v880_v14, %v386_v10  ;;  %v762_v17 = vpop.f32.mrf.mxu0  ;;  %v802_v18 = vpop.f32.mrf.mxu1 }
 0x121   : > { %v909_v19 = vadd.f32 %v762_v17, %v339_v11  ;;  %v925_v20 = vadd.f32 %v802_v18, %v355_v12  ;;  %v376_v17 = vld [vmem:[#allocation2 + $0x170] sm:$0xff] }
 0x122   : > { %1005 = vst.msk [vmem:[#allocation2 + $0x140] sm:$0xff] %vm964_vm2, %v940_v15  ;;  %v392_v18 = vld [vmem:[#allocation2 + $0x1f0] sm:$0xff] }
 0x123   : > { %1021 = vst.msk [vmem:[#allocation2 + $0x1c0] sm:$0xff] %vm964_vm2, %v956_v16 }
 0x124   : > { %974 = vst.msk [vmem:[#allocation2 + $0x48] sm:$0xff] %vm964_vm2, %v909_v19  ;;  %v345_v19 = vld [vmem:[#allocation2 + $0x78] sm:$0xff] }
 0x125   : > { %990 = vst.msk [vmem:[#allocation2 + $0xc8] sm:$0xff] %vm964_vm2, %v925_v20  ;;  %v361_v20 = vld [vmem:[#allocation2 + $0xf8] sm:$0xff] }
 0x127   : > { %v842_v25 = vpop.f32.mrf.mxu2  ;;  %v882_v26 = vpop.f32.mrf.mxu3 }
 0x128   : > { %v941_v27 = vadd.f32 %v842_v25, %v371_v21  ;;  %v957_v28 = vadd.f32 %v882_v26, %v387_v22  ;;  %v765_v29 = vpop.f32.mrf.mxu0  ;;  %v805_v30 = vpop.f32.mrf.mxu1 }
 0x129   : > { %v910_v31 = vadd.f32 %v765_v29, %v340_v23  ;;  %v926_v32 = vadd.f32 %v805_v30, %v356_v24  ;;  %v377_v29 = vld [vmem:[#allocation2 + $0x178] sm:$0xff] }
 0x12a   : > { %1006 = vst.msk [vmem:[#allocation2 + $0x148] sm:$0xff] %vm964_vm2, %v941_v27  ;;  %v393_v30 = vld [vmem:[#allocation2 + $0x1f8] sm:$0xff] }
 0x12b   : > { %1022 = vst.msk [vmem:[#allocation2 + $0x1c8] sm:$0xff] %vm964_vm2, %v957_v28 }
 0x12c   : > { %975 = vst.msk [vmem:[#allocation2 + $0x50] sm:$0xff] %vm964_vm2, %v910_v31 }
 0x12d   : > { %991 = vst.msk [vmem:[#allocation2 + $0xd0] sm:$0xff] %vm964_vm2, %v926_v32 }
 0x12f   : > { %v845_v37 = vpop.f32.mrf.mxu2  ;;  %v885_v38 = vpop.f32.mrf.mxu3 }
 0x130   : > { %v942_v39 = vadd.f32 %v845_v37, %v372_v33  ;;  %v958_v40 = vadd.f32 %v885_v38, %v388_v34  ;;  %v767_v41 = vpop.f32.mrf.mxu0  ;;  %v807_v42 = vpop.f32.mrf.mxu1 }
 0x131   : > { %v911_v43 = vadd.f32 %v767_v41, %v341_v35  ;;  %v927_v44 = vadd.f32 %v807_v42, %v357_v36 }
 0x132   : > { %1007 = vst.msk [vmem:[#allocation2 + $0x150] sm:$0xff] %vm964_vm2, %v942_v39 }
 0x133   : > { %1023 = vst.msk [vmem:[#allocation2 + $0x1d0] sm:$0xff] %vm964_vm2, %v958_v40 }
 0x134   : > { %976 = vst.msk [vmem:[#allocation2 + $0x58] sm:$0xff] %vm964_vm2, %v911_v43 }
 0x135   : > { %992 = vst.msk [vmem:[#allocation2 + $0xd8] sm:$0xff] %vm964_vm2, %v927_v44 }
 0x137   : > { %v847_v49 = vpop.f32.mrf.mxu2  ;;  %v887_v50 = vpop.f32.mrf.mxu3 }
 0x138   : > { %v943_v51 = vadd.f32 %v847_v49, %v373_v45  ;;  %v959_v52 = vadd.f32 %v887_v50, %v389_v46  ;;  %v770_v53 = vpop.f32.mrf.mxu0  ;;  %v810_v54 = vpop.f32.mrf.mxu1 }
 0x139   : > { %v912_v55 = vadd.f32 %v770_v53, %v342_v47  ;;  %v928_v56 = vadd.f32 %v810_v54, %v358_v48 }
 0x13a   : > { %1008 = vst.msk [vmem:[#allocation2 + $0x158] sm:$0xff] %vm964_vm2, %v943_v51 }
 0x13b   : > { %1024 = vst.msk [vmem:[#allocation2 + $0x1d8] sm:$0xff] %vm964_vm2, %v959_v52 }
 0x13c   : > { %977 = vst.msk [vmem:[#allocation2 + $0x60] sm:$0xff] %vm964_vm2, %v912_v55 }
 0x13d   : > { %993 = vst.msk [vmem:[#allocation2 + $0xe0] sm:$0xff] %vm964_vm2, %v928_v56 }
 0x13f   : > { %v850_v61 = vpop.f32.mrf.mxu2  ;;  %v890_v62 = vpop.f32.mrf.mxu3 }
 0x140   : > { %v944_v63 = vadd.f32 %v850_v61, %v374_v57  ;;  %v960_v0 = vadd.f32 %v890_v62, %v390_v58  ;;  %v772_v1 = vpop.f32.mrf.mxu0  ;;  %v812_v2 = vpop.f32.mrf.mxu1 }
 0x141   : > { %v913_v3 = vadd.f32 %v772_v1, %v343_v59  ;;  %v929_v4 = vadd.f32 %v812_v2, %v359_v60 }
 0x142   : > { %1009 = vst.msk [vmem:[#allocation2 + $0x160] sm:$0xff] %vm964_vm2, %v944_v63 }
 0x143   : > { %1025 = vst.msk [vmem:[#allocation2 + $0x1e0] sm:$0xff] %vm964_vm2, %v960_v0 }
 0x144   : > { %978 = vst.msk [vmem:[#allocation2 + $0x68] sm:$0xff] %vm964_vm2, %v913_v3 }
 0x145   : > { %994 = vst.msk [vmem:[#allocation2 + $0xe8] sm:$0xff] %vm964_vm2, %v929_v4 }
 0x147   : > { %v852_v9 = vpop.f32.mrf.mxu2  ;;  %v892_v10 = vpop.f32.mrf.mxu3 }
 0x148   : > { %v945_v11 = vadd.f32 %v852_v9, %v375_v5  ;;  %v961_v12 = vadd.f32 %v892_v10, %v391_v6  ;;  %v775_v13 = vpop.f32.mrf.mxu0  ;;  %v815_v14 = vpop.f32.mrf.mxu1 }
 0x149   : > { %v914_v15 = vadd.f32 %v775_v13, %v344_v7  ;;  %v930_v16 = vadd.f32 %v815_v14, %v360_v8 }
 0x14a   : > { %1010 = vst.msk [vmem:[#allocation2 + $0x168] sm:$0xff] %vm964_vm2, %v945_v11 }
 0x14b   : > { %1026 = vst.msk [vmem:[#allocation2 + $0x1e8] sm:$0xff] %vm964_vm2, %v961_v12 }
 0x14c   : > { %979 = vst.msk [vmem:[#allocation2 + $0x70] sm:$0xff] %vm964_vm2, %v914_v15 }
 0x14d   : > { %995 = vst.msk [vmem:[#allocation2 + $0xf0] sm:$0xff] %vm964_vm2, %v930_v16 }
 0x14f   : > { %v855_v21 = vpop.f32.mrf.mxu2  ;;  %v895_v22 = vpop.f32.mrf.mxu3 }
 0x150   : > { %v946_v23 = vadd.f32 %v855_v21, %v376_v17  ;;  %v962_v24 = vadd.f32 %v895_v22, %v392_v18  ;;  %v777_v25 = vpop.f32.mrf.mxu0  ;;  %v817_v26 = vpop.f32.mrf.mxu1 }
 0x151   : > { %v915_v27 = vadd.f32 %v777_v25, %v345_v19  ;;  %v931_v28 = vadd.f32 %v817_v26, %v361_v20 }
 0x152   : > { %1011 = vst.msk [vmem:[#allocation2 + $0x170] sm:$0xff] %vm964_vm2, %v946_v23 }
 0x153   : > { %1027 = vst.msk [vmem:[#allocation2 + $0x1f0] sm:$0xff] %vm964_vm2, %v962_v24 }
 0x154   : > { %980 = vst.msk [vmem:[#allocation2 + $0x78] sm:$0xff] %vm964_vm2, %v915_v27 }
 0x155   : > { %996 = vst.msk [vmem:[#allocation2 + $0xf8] sm:$0xff] %vm964_vm2, %v931_v28 }
 0x157   : > { %v857_v31 = vpop.f32.mrf.mxu2  ;;  %v897_v32 = vpop.f32.mrf.mxu3  ;;  %1032 = sbr.rel (%p1647_p6) target bundleno = 420 (0x1a4), region = 40 }
 0x158   : > { %v947_v33 = vadd.f32 %v857_v31, %v377_v29  ;;  %v963_v34 = vadd.f32 %v897_v32, %v393_v30 }
 0x15a   : > { %1012 = vst.msk [vmem:[#allocation2 + $0x178] sm:$0xff] %vm964_vm2, %v947_v33 }
 0x15b   : > { %1028 = vst.msk [vmem:[#allocation2 + $0x1f8] sm:$0xff] %vm964_vm2, %v963_v34 }
 0x15c   : > { %v1033_v35 = vld [vmem:[#allocation2] sm:$0xff]  ;;  %v1034_v37 = vld [vmem:[#allocation2 + $0x8] sm:$0xff]  ;;  %v1035_v38 = vld [vmem:[#allocation2 + $0x10] sm:$0xff]  ;;  %vm1293_vm3 = vcmask 584704  }
 0x15d   : > { %v2060_v36 = vld [vmem:[%s2393_s2] ss:$0 sm:$0xff]  ;;  %v1036_v39 = vld [vmem:[#allocation2 + $0x18] sm:$0xff]  ;;  %v1038_v45 = vld [vmem:[#allocation2 + $0x28] sm:$0xff] }
 0x15e   : > { %v1101_v40 = vadd.f32 %v2060_v36, %v1033_v35  ;;  %v1102_v41 = vadd.f32 %v2060_v36, %v1034_v37  ;;  %v1103_v42 = vadd.f32 %v2060_v36, %v1035_v38  ;;  %v1104_v43 = vadd.f32 %v2060_v36, %v1036_v39  ;;  %v1037_v44 = vld [vmem:[#allocation2 + $0x20] sm:$0xff]  ;;  %v1039_v46 = vld [vmem:[#allocation2 + $0x30] sm:$0xff]  ;;  %v1040_v50 = vld [vmem:[#allocation2 + $0x38] sm:$0xff] }
 0x15f   : > { %v1105_v47 = vadd.f32 %v2060_v36, %v1037_v44  ;;  %v1106_v48 = vadd.f32 %v2060_v36, %v1038_v45  ;;  %v1107_v49 = vadd.f32 %v2060_v36, %v1039_v46  ;;  %v1041_v55 = vld [vmem:[#allocation2 + $0x40] sm:$0xff]  ;;  %v1108_v58 = vadd.f32 %v2060_v36, %v1040_v50  ;;  %v1042_v59 = vld [vmem:[#allocation2 + $0x48] sm:$0xff]  ;;  %v1043_v60 = vld [vmem:[#allocation2 + $0x50] sm:$0xff] }
 0x160   : > { %v1165_v51 = vmax.f32 %v1101_v40, 0.0  ;;  %v1166_v52 = vmax.f32 %v1102_v41, 0.0  ;;  %v1167_v53 = vmax.f32 %v1103_v42, 0.0  ;;  %v1168_v54 = vmax.f32 %v1104_v43, 0.0  ;;  %v1044_v61 = vld [vmem:[#allocation2 + $0x58] sm:$0xff]  ;;  %v1045_v2 = vld [vmem:[#allocation2 + $0x60] sm:$0xff] }
 0x161   : > { %v1169_v56 = vmax.f32 %v1105_v47, 0.0  ;;  %v1170_v57 = vmax.f32 %v1106_v48, 0.0  ;;  %v1171_v1 = vmax.f32 %v1107_v49, 0.0  ;;  %v1046_v3 = vld [vmem:[#allocation2 + $0x68] sm:$0xff]  ;;  %v1047_v4 = vld [vmem:[#allocation2 + $0x70] sm:$0xff]  ;;  %v1172_v7 = vmax.f32 %v1108_v58, 0.0 }
 0x162   : > { %v1229_v62 = vpack.c.bf16 %v1165_v51, %v1165_v51  ;;  %v1230_v63 = vpack.c.bf16 %v1166_v52, %v1166_v52  ;;  %v1231_v0 = vpack.c.bf16 %v1167_v53, %v1167_v53  ;;  %v1232_v5 = vpack.c.bf16 %v1168_v54, %v1168_v54  ;;  %v1048_v12 = vld [vmem:[#allocation2 + $0x78] sm:$0xff]  ;;  %v1049_v24 = vld [vmem:[#allocation2 + $0x80] sm:$0xff]  ;;  %v1050_v25 = vld [vmem:[#allocation2 + $0x88] sm:$0xff] }
 0x163   : > { %v1233_v6 = vpack.c.bf16 %v1169_v56, %v1169_v56  ;;  %v1109_v8 = vadd.f32 %v2060_v36, %v1041_v55  ;;  %v1110_v9 = vadd.f32 %v2060_v36, %v1042_v59  ;;  %v1111_v10 = vadd.f32 %v2060_v36, %v1043_v60  ;;  %v1051_v26 = vld [vmem:[#allocation2 + $0x90] sm:$0xff]  ;;  %v1052_v29 = vld [vmem:[#allocation2 + $0x98] sm:$0xff]  ;;  %v1053_v33 = vld [vmem:[#allocation2 + $0xa0] sm:$0xff] }
 0x164   : > { %1294 = vst.msk [vmem:[%s2394_s3] sm:$0xf] %vm1293_vm3, %v1229_v62  ;;  %v1112_v11 = vadd.f32 %v2060_v36, %v1044_v61  ;;  %v1234_v13 = vpack.c.bf16 %v1170_v57, %v1170_v57  ;;  %v1113_v14 = vadd.f32 %v2060_v36, %v1045_v2  ;;  %v1114_v15 = vadd.f32 %v2060_v36, %v1046_v3  ;;  %v1054_v39 = vld [vmem:[#allocation2 + $0xa8] sm:$0xff]  ;;  %v1055_v43 = vld [vmem:[#allocation2 + $0xb0] sm:$0xff]  ;;  %v1056_v47 = vld [vmem:[#allocation2 + $0xb8] sm:$0xff] }
 0x165   : > { %1295 = vst.msk [vmem:[%s2394_s3 + $0x4] sm:$0xf] %vm1293_vm3, %v1230_v63  ;;  %v1115_v16 = vadd.f32 %v2060_v36, %v1047_v4  ;;  %v1235_v17 = vpack.c.bf16 %v1171_v1, %v1171_v1  ;;  %v1173_v18 = vmax.f32 %v1109_v8, 0.0  ;;  %v1174_v19 = vmax.f32 %v1110_v9, 0.0  ;;  %v1057_v51 = vld [vmem:[#allocation2 + $0xc0] sm:$0xff]  ;;  %v1058_v55 = vld [vmem:[#allocation2 + $0xc8] sm:$0xff] }
 0x166   : > { %1296 = vst.msk [vmem:[%s2394_s3 + $0x8] sm:$0xf] %vm1293_vm3, %v1231_v0  ;;  %v1175_v20 = vmax.f32 %v1111_v10, 0.0  ;;  %v1236_v21 = vpack.c.bf16 %v1172_v7, %v1172_v7  ;;  %v1176_v22 = vmax.f32 %v1112_v11, 0.0  ;;  %v1116_v23 = vadd.f32 %v2060_v36, %v1048_v12  ;;  %v1059_v59 = vld [vmem:[#allocation2 + $0xd0] sm:$0xff]  ;;  %v1060_v63 = vld [vmem:[#allocation2 + $0xd8] sm:$0xff] }
 0x167   : > { %1297 = vst.msk [vmem:[%s2394_s3 + $0xc] sm:$0xf] %vm1293_vm3, %v1232_v5  ;;  %v1237_v27 = vpack.c.bf16 %v1173_v18, %v1173_v18  ;;  %v1177_v28 = vmax.f32 %v1113_v14, 0.0  ;;  %v1238_v30 = vpack.c.bf16 %v1174_v19, %v1174_v19  ;;  %v1178_v31 = vmax.f32 %v1114_v15, 0.0  ;;  %v1061_v3 = vld [vmem:[#allocation2 + $0xe0] sm:$0xff]  ;;  %v1062_v7 = vld [vmem:[#allocation2 + $0xe8] sm:$0xff] }
 0x168   : > { %1298 = vst.msk [vmem:[%s2394_s3 + $0x10] sm:$0xf] %vm1293_vm3, %v1233_v6  ;;  %v1179_v32 = vmax.f32 %v1115_v16, 0.0  ;;  %v1239_v34 = vpack.c.bf16 %v1175_v20, %v1175_v20  ;;  %v1117_v35 = vadd.f32 %v2060_v36, %v1049_v24  ;;  %v1118_v37 = vadd.f32 %v2060_v36, %v1050_v25  ;;  %v1063_v11 = vld [vmem:[#allocation2 + $0xf0] sm:$0xff]  ;;  %v1064_v15 = vld [vmem:[#allocation2 + $0xf8] sm:$0xff]  ;;  %v1065_v19 = vld [vmem:[#allocation2 + $0x100] sm:$0xff] }
 0x169   : > { %1299 = vst.msk [vmem:[%s2394_s3 + $0x14] sm:$0xf] %vm1293_vm3, %v1234_v13  ;;  %v1119_v38 = vadd.f32 %v2060_v36, %v1051_v26  ;;  %v1240_v40 = vpack.c.bf16 %v1176_v22, %v1176_v22  ;;  %v1180_v41 = vmax.f32 %v1116_v23, 0.0  ;;  %v1120_v42 = vadd.f32 %v2060_v36, %v1052_v29  ;;  %v1066_v23 = vld [vmem:[#allocation2 + $0x108] sm:$0xff] }
 0x16a   : > { %1300 = vst.msk [vmem:[%s2394_s3 + $0x18] sm:$0xf] %vm1293_vm3, %v1235_v17  ;;  %v1241_v44 = vpack.c.bf16 %v1177_v28, %v1177_v28  ;;  %v1181_v45 = vmax.f32 %v1117_v35, 0.0  ;;  %v1121_v46 = vadd.f32 %v2060_v36, %v1053_v33  ;;  %v1242_v48 = vpack.c.bf16 %v1178_v31, %v1178_v31  ;;  %v1068_v31 = vld [vmem:[#allocation2 + $0x118] sm:$0xff]  ;;  %v1069_v35 = vld [vmem:[#allocation2 + $0x120] sm:$0xff] }
 0x16b   : > { %1301 = vst.msk [vmem:[%s2394_s3 + $0x1c] sm:$0xf] %vm1293_vm3, %v1236_v21  ;;  %v1182_v49 = vmax.f32 %v1118_v37, 0.0  ;;  %v1122_v50 = vadd.f32 %v2060_v36, %v1054_v39  ;;  %v1243_v52 = vpack.c.bf16 %v1179_v32, %v1179_v32  ;;  %v1183_v53 = vmax.f32 %v1119_v38, 0.0 }
 0x16c   : > { %1302 = vst.msk [vmem:[%s2394_s3 + $0x20] sm:$0xf] %vm1293_vm3, %v1237_v27  ;;  %v1123_v54 = vadd.f32 %v2060_v36, %v1055_v43  ;;  %v1244_v56 = vpack.c.bf16 %v1180_v41, %v1180_v41  ;;  %v1184_v57 = vmax.f32 %v1120_v42, 0.0  ;;  %v1124_v58 = vadd.f32 %v2060_v36, %v1056_v47  ;;  %v1067_v27 = vld [vmem:[#allocation2 + $0x110] sm:$0xff] }
 0x16d   : > { %1303 = vst.msk [vmem:[%s2394_s3 + $0x24] sm:$0xf] %vm1293_vm3, %v1238_v30  ;;  %v1245_v60 = vpack.c.bf16 %v1181_v45, %v1181_v45  ;;  %v1185_v61 = vmax.f32 %v1121_v46, 0.0  ;;  %v1125_v62 = vadd.f32 %v2060_v36, %v1057_v51  ;;  %v1246_v0 = vpack.c.bf16 %v1182_v49, %v1182_v49 }
 0x16e   : > { %1304 = vst.msk [vmem:[%s2394_s3 + $0x28] sm:$0xf] %vm1293_vm3, %v1239_v34  ;;  %v1186_v1 = vmax.f32 %v1122_v50, 0.0  ;;  %v1126_v2 = vadd.f32 %v2060_v36, %v1058_v55  ;;  %v1247_v4 = vpack.c.bf16 %v1183_v53, %v1183_v53  ;;  %v1187_v5 = vmax.f32 %v1123_v54, 0.0 }
 0x16f   : > { %1305 = vst.msk [vmem:[%s2394_s3 + $0x2c] sm:$0xf] %vm1293_vm3, %v1240_v40  ;;  %v1127_v6 = vadd.f32 %v2060_v36, %v1059_v59  ;;  %v1248_v8 = vpack.c.bf16 %v1184_v57, %v1184_v57  ;;  %v1188_v9 = vmax.f32 %v1124_v58, 0.0  ;;  %v1128_v10 = vadd.f32 %v2060_v36, %v1060_v63  ;;  %v1070_v40 = vld [vmem:[#allocation2 + $0x128] sm:$0xff] }
 0x170   : > { %1306 = vst.msk [vmem:[%s2394_s3 + $0x30] sm:$0xf] %vm1293_vm3, %v1241_v44  ;;  %v1249_v12 = vpack.c.bf16 %v1185_v61, %v1185_v61  ;;  %v1189_v13 = vmax.f32 %v1125_v62, 0.0  ;;  %v1129_v14 = vadd.f32 %v2060_v36, %v1061_v3  ;;  %v1250_v16 = vpack.c.bf16 %v1186_v1, %v1186_v1  ;;  %v1071_v44 = vld [vmem:[#allocation2 + $0x130] sm:$0xff] }
 0x171   : > { %1307 = vst.msk [vmem:[%s2394_s3 + $0x34] sm:$0xf] %vm1293_vm3, %v1242_v48  ;;  %v1190_v17 = vmax.f32 %v1126_v2, 0.0  ;;  %v1130_v18 = vadd.f32 %v2060_v36, %v1062_v7  ;;  %v1251_v20 = vpack.c.bf16 %v1187_v5, %v1187_v5  ;;  %v1191_v21 = vmax.f32 %v1127_v6, 0.0  ;;  %v1072_v48 = vld [vmem:[#allocation2 + $0x138] sm:$0xff] }
 0x172   : > { %1308 = vst.msk [vmem:[%s2394_s3 + $0x38] sm:$0xf] %vm1293_vm3, %v1243_v52  ;;  %v1131_v22 = vadd.f32 %v2060_v36, %v1063_v11  ;;  %v1252_v24 = vpack.c.bf16 %v1188_v9, %v1188_v9  ;;  %v1192_v25 = vmax.f32 %v1128_v10, 0.0  ;;  %v1132_v26 = vadd.f32 %v2060_v36, %v1064_v15  ;;  %v1073_v52 = vld [vmem:[#allocation2 + $0x140] sm:$0xff] }
 0x173   : > { %1309 = vst.msk [vmem:[%s2394_s3 + $0x3c] sm:$0xf] %vm1293_vm3, %v1244_v56  ;;  %v1253_v28 = vpack.c.bf16 %v1189_v13, %v1189_v13  ;;  %v1193_v29 = vmax.f32 %v1129_v14, 0.0  ;;  %v1133_v30 = vadd.f32 %v2060_v36, %v1065_v19  ;;  %v1254_v32 = vpack.c.bf16 %v1190_v17, %v1190_v17  ;;  %v1074_v56 = vld [vmem:[#allocation2 + $0x148] sm:$0xff] }
 0x174   : > { %1310 = vst.msk [vmem:[%s2394_s3 + $0x40] sm:$0xf] %vm1293_vm3, %v1245_v60  ;;  %v1194_v33 = vmax.f32 %v1130_v18, 0.0  ;;  %v1134_v34 = vadd.f32 %v2060_v36, %v1066_v23  ;;  %v1255_v37 = vpack.c.bf16 %v1191_v21, %v1191_v21  ;;  %v1195_v38 = vmax.f32 %v1131_v22, 0.0  ;;  %v1075_v60 = vld [vmem:[#allocation2 + $0x150] sm:$0xff] }
 0x175   : > { %1311 = vst.msk [vmem:[%s2394_s3 + $0x44] sm:$0xf] %vm1293_vm3, %v1246_v0  ;;  %v1135_v39 = vadd.f32 %v2060_v36, %v1067_v27  ;;  %v1256_v41 = vpack.c.bf16 %v1192_v25, %v1192_v25  ;;  %v1196_v42 = vmax.f32 %v1132_v26, 0.0  ;;  %v1136_v43 = vadd.f32 %v2060_v36, %v1068_v31  ;;  %v1076_v0 = vld [vmem:[#allocation2 + $0x158] sm:$0xff] }
 0x176   : > { %1312 = vst.msk [vmem:[%s2394_s3 + $0x48] sm:$0xf] %vm1293_vm3, %v1247_v4  ;;  %v1257_v45 = vpack.c.bf16 %v1193_v29, %v1193_v29  ;;  %v1197_v46 = vmax.f32 %v1133_v30, 0.0  ;;  %v1137_v47 = vadd.f32 %v2060_v36, %v1069_v35  ;;  %v1258_v49 = vpack.c.bf16 %v1194_v33, %v1194_v33  ;;  %v1077_v4 = vld [vmem:[#allocation2 + $0x160] sm:$0xff] }
 0x177   : > { %1313 = vst.msk [vmem:[%s2394_s3 + $0x4c] sm:$0xf] %vm1293_vm3, %v1248_v8  ;;  %v1198_v50 = vmax.f32 %v1134_v34, 0.0  ;;  %v1138_v51 = vadd.f32 %v2060_v36, %v1070_v40  ;;  %v1259_v53 = vpack.c.bf16 %v1195_v38, %v1195_v38  ;;  %v1199_v54 = vmax.f32 %v1135_v39, 0.0  ;;  %v1078_v8 = vld [vmem:[#allocation2 + $0x168] sm:$0xff] }
 0x178   : > { %1314 = vst.msk [vmem:[%s2394_s3 + $0x50] sm:$0xf] %vm1293_vm3, %v1249_v12  ;;  %v1139_v55 = vadd.f32 %v2060_v36, %v1071_v44  ;;  %v1260_v57 = vpack.c.bf16 %v1196_v42, %v1196_v42  ;;  %v1200_v58 = vmax.f32 %v1136_v43, 0.0  ;;  %v1140_v59 = vadd.f32 %v2060_v36, %v1072_v48  ;;  %v1079_v12 = vld [vmem:[#allocation2 + $0x170] sm:$0xff] }
 0x179   : > { %1315 = vst.msk [vmem:[%s2394_s3 + $0x54] sm:$0xf] %vm1293_vm3, %v1250_v16  ;;  %v1261_v61 = vpack.c.bf16 %v1197_v46, %v1197_v46  ;;  %v1201_v62 = vmax.f32 %v1137_v47, 0.0  ;;  %v1141_v63 = vadd.f32 %v2060_v36, %v1073_v52  ;;  %v1262_v1 = vpack.c.bf16 %v1198_v50, %v1198_v50  ;;  %v1080_v16 = vld [vmem:[#allocation2 + $0x178] sm:$0xff] }
 0x17a   : > { %1316 = vst.msk [vmem:[%s2394_s3 + $0x58] sm:$0xf] %vm1293_vm3, %v1251_v20  ;;  %v1202_v2 = vmax.f32 %v1138_v51, 0.0  ;;  %v1142_v3 = vadd.f32 %v2060_v36, %v1074_v56  ;;  %v1263_v5 = vpack.c.bf16 %v1199_v54, %v1199_v54  ;;  %v1203_v6 = vmax.f32 %v1139_v55, 0.0  ;;  %v1081_v20 = vld [vmem:[#allocation2 + $0x180] sm:$0xff] }
 0x17b   : > { %1317 = vst.msk [vmem:[%s2394_s3 + $0x5c] sm:$0xf] %vm1293_vm3, %v1252_v24  ;;  %v1143_v7 = vadd.f32 %v2060_v36, %v1075_v60  ;;  %v1264_v9 = vpack.c.bf16 %v1200_v58, %v1200_v58  ;;  %v1204_v10 = vmax.f32 %v1140_v59, 0.0  ;;  %v1144_v11 = vadd.f32 %v2060_v36, %v1076_v0  ;;  %v1082_v24 = vld [vmem:[#allocation2 + $0x188] sm:$0xff] }
 0x17c   : > { %1318 = vst.msk [vmem:[%s2394_s3 + $0x60] sm:$0xf] %vm1293_vm3, %v1253_v28  ;;  %v1265_v13 = vpack.c.bf16 %v1201_v62, %v1201_v62  ;;  %v1205_v14 = vmax.f32 %v1141_v63, 0.0  ;;  %v1145_v15 = vadd.f32 %v2060_v36, %v1077_v4  ;;  %v1266_v17 = vpack.c.bf16 %v1202_v2, %v1202_v2  ;;  %v1083_v28 = vld [vmem:[#allocation2 + $0x190] sm:$0xff] }
 0x17d   : > { %1319 = vst.msk [vmem:[%s2394_s3 + $0x64] sm:$0xf] %vm1293_vm3, %v1254_v32  ;;  %v1206_v18 = vmax.f32 %v1142_v3, 0.0  ;;  %v1146_v19 = vadd.f32 %v2060_v36, %v1078_v8  ;;  %v1267_v21 = vpack.c.bf16 %v1203_v6, %v1203_v6  ;;  %v1207_v22 = vmax.f32 %v1143_v7, 0.0  ;;  %v1084_v32 = vld [vmem:[#allocation2 + $0x198] sm:$0xff] }
 0x17e   : > { %1320 = vst.msk [vmem:[%s2394_s3 + $0x68] sm:$0xf] %vm1293_vm3, %v1255_v37  ;;  %v1147_v23 = vadd.f32 %v2060_v36, %v1079_v12  ;;  %v1268_v25 = vpack.c.bf16 %v1204_v10, %v1204_v10  ;;  %v1208_v26 = vmax.f32 %v1144_v11, 0.0  ;;  %v1148_v27 = vadd.f32 %v2060_v36, %v1080_v16  ;;  %v1085_v37 = vld [vmem:[#allocation2 + $0x1a0] sm:$0xff] }
 0x17f   : > { %1321 = vst.msk [vmem:[%s2394_s3 + $0x6c] sm:$0xf] %vm1293_vm3, %v1256_v41  ;;  %v1269_v29 = vpack.c.bf16 %v1205_v14, %v1205_v14  ;;  %v1209_v30 = vmax.f32 %v1145_v15, 0.0  ;;  %v1149_v31 = vadd.f32 %v2060_v36, %v1081_v20  ;;  %v1270_v33 = vpack.c.bf16 %v1206_v18, %v1206_v18  ;;  %v1086_v41 = vld [vmem:[#allocation2 + $0x1a8] sm:$0xff] }
 0x180   : > { %1322 = vst.msk [vmem:[%s2394_s3 + $0x70] sm:$0xf] %vm1293_vm3, %v1257_v45  ;;  %v1210_v34 = vmax.f32 %v1146_v19, 0.0  ;;  %v1150_v35 = vadd.f32 %v2060_v36, %v1082_v24  ;;  %v1271_v38 = vpack.c.bf16 %v1207_v22, %v1207_v22  ;;  %v1211_v39 = vmax.f32 %v1147_v23, 0.0  ;;  %v1087_v45 = vld [vmem:[#allocation2 + $0x1b0] sm:$0xff] }
 0x181   : > { %1323 = vst.msk [vmem:[%s2394_s3 + $0x74] sm:$0xf] %vm1293_vm3, %v1258_v49  ;;  %v1151_v40 = vadd.f32 %v2060_v36, %v1083_v28  ;;  %v1272_v42 = vpack.c.bf16 %v1208_v26, %v1208_v26  ;;  %v1212_v43 = vmax.f32 %v1148_v27, 0.0  ;;  %v1152_v44 = vadd.f32 %v2060_v36, %v1084_v32  ;;  %v1088_v49 = vld [vmem:[#allocation2 + $0x1b8] sm:$0xff] }
 0x182   : > { %1324 = vst.msk [vmem:[%s2394_s3 + $0x78] sm:$0xf] %vm1293_vm3, %v1259_v53  ;;  %v1273_v46 = vpack.c.bf16 %v1209_v30, %v1209_v30  ;;  %v1213_v47 = vmax.f32 %v1149_v31, 0.0  ;;  %v1153_v48 = vadd.f32 %v2060_v36, %v1085_v37  ;;  %v1274_v50 = vpack.c.bf16 %v1210_v34, %v1210_v34  ;;  %v1089_v53 = vld [vmem:[#allocation2 + $0x1c0] sm:$0xff] }
 0x183   : > { %1325 = vst.msk [vmem:[%s2394_s3 + $0x7c] sm:$0xf] %vm1293_vm3, %v1260_v57  ;;  %v1214_v51 = vmax.f32 %v1150_v35, 0.0  ;;  %v1154_v52 = vadd.f32 %v2060_v36, %v1086_v41  ;;  %v1275_v54 = vpack.c.bf16 %v1211_v39, %v1211_v39  ;;  %v1215_v55 = vmax.f32 %v1151_v40, 0.0  ;;  %v1090_v57 = vld [vmem:[#allocation2 + $0x1c8] sm:$0xff] }
 0x184   : > { %1326 = vst.msk [vmem:[%s2394_s3 + $0x80] sm:$0xf] %vm1293_vm3, %v1261_v61  ;;  %v1155_v56 = vadd.f32 %v2060_v36, %v1087_v45  ;;  %v1276_v58 = vpack.c.bf16 %v1212_v43, %v1212_v43  ;;  %v1216_v59 = vmax.f32 %v1152_v44, 0.0  ;;  %v1156_v60 = vadd.f32 %v2060_v36, %v1088_v49  ;;  %v1091_v61 = vld [vmem:[#allocation2 + $0x1d0] sm:$0xff] }
 0x185   : > { %1327 = vst.msk [vmem:[%s2394_s3 + $0x84] sm:$0xf] %vm1293_vm3, %v1262_v1  ;;  %v1277_v62 = vpack.c.bf16 %v1213_v47, %v1213_v47  ;;  %v1217_v63 = vmax.f32 %v1153_v48, 0.0  ;;  %v1157_v0 = vadd.f32 %v2060_v36, %v1089_v53  ;;  %v1092_v1 = vld [vmem:[#allocation2 + $0x1d8] sm:$0xff]  ;;  %v1278_v2 = vpack.c.bf16 %v1214_v51, %v1214_v51 }
 0x186   : > { %1328 = vst.msk [vmem:[%s2394_s3 + $0x88] sm:$0xf] %vm1293_vm3, %v1263_v5  ;;  %v1218_v3 = vmax.f32 %v1154_v52, 0.0  ;;  %v1158_v4 = vadd.f32 %v2060_v36, %v1090_v57  ;;  %v1093_v5 = vld [vmem:[#allocation2 + $0x1e0] sm:$0xff]  ;;  %v1279_v6 = vpack.c.bf16 %v1215_v55, %v1215_v55  ;;  %v1219_v7 = vmax.f32 %v1155_v56, 0.0 }
 0x187   : > { %1329 = vst.msk [vmem:[%s2394_s3 + $0x8c] sm:$0xf] %vm1293_vm3, %v1264_v9  ;;  %v1159_v8 = vadd.f32 %v2060_v36, %v1091_v61  ;;  %v1094_v9 = vld [vmem:[#allocation2 + $0x1e8] sm:$0xff]  ;;  %v1280_v10 = vpack.c.bf16 %v1216_v59, %v1216_v59  ;;  %v1220_v11 = vmax.f32 %v1156_v60, 0.0  ;;  %v1160_v12 = vadd.f32 %v2060_v36, %v1092_v1 }
 0x188   : > { %1330 = vst.msk [vmem:[%s2394_s3 + $0x90] sm:$0xf] %vm1293_vm3, %v1265_v13  ;;  %v1095_v13 = vld [vmem:[#allocation2 + $0x1f0] sm:$0xff]  ;;  %v1281_v14 = vpack.c.bf16 %v1217_v63, %v1217_v63  ;;  %v1221_v15 = vmax.f32 %v1157_v0, 0.0  ;;  %v1161_v16 = vadd.f32 %v2060_v36, %v1093_v5  ;;  %v1282_v18 = vpack.c.bf16 %v1218_v3, %v1218_v3 }
 0x189   : > { %1331 = vst.msk [vmem:[%s2394_s3 + $0x94] sm:$0xf] %vm1293_vm3, %v1266_v17  ;;  %v1096_v17 = vld [vmem:[#allocation2 + $0x1f8] sm:$0xff]  ;;  %v1222_v19 = vmax.f32 %v1158_v4, 0.0  ;;  %v1162_v20 = vadd.f32 %v2060_v36, %v1094_v9  ;;  %v1223_v22 = vmax.f32 %v1159_v8, 0.0  ;;  %v1163_v23 = vadd.f32 %v2060_v36, %v1095_v13 }
 0x18a   : > { %1332 = vst.msk [vmem:[%s2394_s3 + $0x98] sm:$0xf] %vm1293_vm3, %v1267_v21  ;;  %v1283_v21 = vpack.c.bf16 %v1219_v7, %v1219_v7  ;;  %v1284_v24 = vpack.c.bf16 %v1220_v11, %v1220_v11  ;;  %v1164_v26 = vadd.f32 %v2060_v36, %v1096_v17  ;;  %v1285_v27 = vpack.c.bf16 %v1221_v15, %v1221_v15 }
 0x18b   : > { %1333 = vst.msk [vmem:[%s2394_s3 + $0x9c] sm:$0xf] %vm1293_vm3, %v1268_v25  ;;  %v1224_v25 = vmax.f32 %v1160_v12, 0.0  ;;  %v1225_v28 = vmax.f32 %v1161_v16, 0.0  ;;  %v1226_v30 = vmax.f32 %v1162_v20, 0.0  ;;  %v1287_v36 = vpack.c.bf16 %v1223_v22, %v1223_v22 }
 0x18c   : > { %1334 = vst.msk [vmem:[%s2394_s3 + $0xa0] sm:$0xf] %vm1293_vm3, %v1269_v29  ;;  %v1286_v29 = vpack.c.bf16 %v1222_v19, %v1222_v19  ;;  %v1227_v31 = vmax.f32 %v1163_v23, 0.0 }
 0x18d   : > { %1335 = vst.msk [vmem:[%s2394_s3 + $0xa4] sm:$0xf] %vm1293_vm3, %v1270_v33  ;;  %v1288_v32 = vpack.c.bf16 %v1224_v25, %v1224_v25  ;;  %v1228_v33 = vmax.f32 %v1164_v26, 0.0  ;;  %v1289_v34 = vpack.c.bf16 %v1225_v28, %v1225_v28  ;;  %v1290_v35 = vpack.c.bf16 %v1226_v30, %v1226_v30 }
 0x18e   : > { %1336 = vst.msk [vmem:[%s2394_s3 + $0xa8] sm:$0xf] %vm1293_vm3, %v1271_v38  ;;  %v1291_v37 = vpack.c.bf16 %v1227_v31, %v1227_v31 }
 0x18f   : > { %1337 = vst.msk [vmem:[%s2394_s3 + $0xac] sm:$0xf] %vm1293_vm3, %v1272_v42  ;;  %v1292_v38 = vpack.c.bf16 %v1228_v33, %v1228_v33 }
 0x190   : > { %1338 = vst.msk [vmem:[%s2394_s3 + $0xb0] sm:$0xf] %vm1293_vm3, %v1273_v46 }
 0x191   : > { %1339 = vst.msk [vmem:[%s2394_s3 + $0xb4] sm:$0xf] %vm1293_vm3, %v1274_v50 }
 0x192   : > { %1340 = vst.msk [vmem:[%s2394_s3 + $0xb8] sm:$0xf] %vm1293_vm3, %v1275_v54 }
 0x193   : > { %1341 = vst.msk [vmem:[%s2394_s3 + $0xbc] sm:$0xf] %vm1293_vm3, %v1276_v58 }
 0x194   : > { %1342 = vst.msk [vmem:[%s2394_s3 + $0xc0] sm:$0xf] %vm1293_vm3, %v1277_v62 }
 0x195   : > { %1343 = vst.msk [vmem:[%s2394_s3 + $0xc4] sm:$0xf] %vm1293_vm3, %v1278_v2 }
 0x196   : > { %1344 = vst.msk [vmem:[%s2394_s3 + $0xc8] sm:$0xf] %vm1293_vm3, %v1279_v6 }
 0x197   : > { %1345 = vst.msk [vmem:[%s2394_s3 + $0xcc] sm:$0xf] %vm1293_vm3, %v1280_v10 }
 0x198   : > { %1346 = vst.msk [vmem:[%s2394_s3 + $0xd0] sm:$0xf] %vm1293_vm3, %v1281_v14 }
 0x199   : > { %1347 = vst.msk [vmem:[%s2394_s3 + $0xd4] sm:$0xf] %vm1293_vm3, %v1282_v18 }
 0x19a   : > { %1348 = vst.msk [vmem:[%s2394_s3 + $0xd8] sm:$0xf] %vm1293_vm3, %v1283_v21 }
 0x19b   : > { %1349 = vst.msk [vmem:[%s2394_s3 + $0xdc] sm:$0xf] %vm1293_vm3, %v1284_v24 }
 0x19c   : > { %1350 = vst.msk [vmem:[%s2394_s3 + $0xe0] sm:$0xf] %vm1293_vm3, %v1285_v27 }
 0x19d   : > { %1351 = vst.msk [vmem:[%s2394_s3 + $0xe4] sm:$0xf] %vm1293_vm3, %v1286_v29 }
 0x19e   : > { %1352 = vst.msk [vmem:[%s2394_s3 + $0xe8] sm:$0xf] %vm1293_vm3, %v1287_v36 }
 0x19f   : > { %1353 = vst.msk [vmem:[%s2394_s3 + $0xec] sm:$0xf] %vm1293_vm3, %v1288_v32 }
 0x1a0   : > { %1354 = vst.msk [vmem:[%s2394_s3 + $0xf0] sm:$0xf] %vm1293_vm3, %v1289_v34 }
 0x1a1   : > { %1355 = vst.msk [vmem:[%s2394_s3 + $0xf4] sm:$0xf] %vm1293_vm3, %v1290_v35 }
 0x1a2   : > { %1356 = vst.msk [vmem:[%s2394_s3 + $0xf8] sm:$0xf] %vm1293_vm3, %v1291_v37 }
 0x1a3   : > { %1357 = vst.msk [vmem:[%s2394_s3 + $0xfc] sm:$0xf] %vm1293_vm3, %v1292_v38 }
 0x1a4 PF: > { %s13_s14 = sadd.s32 1, %s1742_s14   ;;  %s2395_s12 = smov %s1738_s13 }
 0x1a5   : > { %p10_p7 = scmp.ge.s32.totalorder %s13_s14, 11   ;;  %s2396_s13 = smov %s2398_s15 }
 0x1a7   :  { %12 = sbr.rel (!%p10_p7) target bundleno = 2 (0x2), region = 76 }

// kernel: layer_forward.12
= control target key start
LH: loop header
LB: loop body
LE: loop exit
PB: predicated region body
PF: predicated region fallthrough
CT: control target
= control target key end

     0   :  { %vm227_vm0 = vcmask 523264   ;;  %s973_s1 = inlined_call_operand.vmem [shape: bf16[1,64,128], index: 1, kind: input, shape index: {}]   ;;  %s974_s2 = inlined_call_operand.vmem [shape: f32[1,128], index: 2, kind: input, shape index: {}]   ;;  %s975_s0 = inlined_call_operand.vmem [shape: bf16[1,256,64], index: 0, kind: input, shape index: {}]   ;;  %s976_s3 = inlined_call_operand.vmem [shape: bf16[256,128], index: 3, kind: output, shape index: {}]  }
   0x1   :  { %v683_v0 = vld [vmem:[%s973_s1 + $0x18] sm:$0xff]  ;;  %v682_v1 = vld [vmem:[%s973_s1 + $0x10] sm:$0xff]  ;;  %v681_v2 = vld [vmem:[%s973_s1 + $0x8] sm:$0xff] }
   0x2   :  { %280 = vmatpush.bf16.msra.mxu0 %v683_v0  ;;  %779 = vmatpush.bf16.msra.mxu1 %v683_v0  ;;  %v680_v3 = vld [vmem:[%s973_s1] sm:$0xff]  ;;  %v665_v8 = vld [vmem:[%s975_s0 + $0x8] sm:$0xff]  ;;  %v666_v12 = vld [vmem:[%s975_s0 + $0x10] sm:$0xff] }
   0x3   :  { %780 = vmatpush.bf16.msra.mxu2 %v683_v0  ;;  %781 = vmatpush.bf16.msra.mxu3 %v683_v0  ;;  %v664_v4 = vld [vmem:[%s975_s0] sm:$0xff]  ;;  %v669_v9 = vld [vmem:[%s975_s0 + $0x28] sm:$0xff]  ;;  %v670_v13 = vld [vmem:[%s975_s0 + $0x30] sm:$0xff] }
   0x4   :  { %v668_v5 = vld [vmem:[%s975_s0 + $0x20] sm:$0xff]  ;;  %v673_v10 = vld [vmem:[%s975_s0 + $0x48] sm:$0xff]  ;;  %v674_v14 = vld [vmem:[%s975_s0 + $0x50] sm:$0xff] }
   0x5   :  { %v672_v6 = vld [vmem:[%s975_s0 + $0x40] sm:$0xff]  ;;  %v677_v11 = vld [vmem:[%s975_s0 + $0x68] sm:$0xff]  ;;  %v678_v15 = vld [vmem:[%s975_s0 + $0x70] sm:$0xff] }
   0x6   :  { %281 = vmatpush.bf16.msra.mxu0 %v682_v1  ;;  %782 = vmatpush.bf16.msra.mxu1 %v682_v1  ;;  %v676_v7 = vld [vmem:[%s975_s0 + $0x60] sm:$0xff]  ;;  %v667_v16 = vld [vmem:[%s975_s0 + $0x18] sm:$0xff] }
   0x7   :  { %783 = vmatpush.bf16.msra.mxu2 %v682_v1  ;;  %784 = vmatpush.bf16.msra.mxu3 %v682_v1  ;;  %v671_v17 = vld [vmem:[%s975_s0 + $0x38] sm:$0xff]  ;;  %v891_v22 = vld [vmem:[%s974_s2] ss:$0 sm:$0xff] }
   0x8   :  { %v675_v18 = vld [vmem:[%s975_s0 + $0x58] sm:$0xff] }
   0x9   :  { %v679_v19 = vld [vmem:[%s975_s0 + $0x78] sm:$0xff] }
   0xa   :  { %282 = vmatpush.bf16.msra.mxu0 %v681_v2  ;;  %785 = vmatpush.bf16.msra.mxu1 %v681_v2 }
   0xb   :  { %786 = vmatpush.bf16.msra.mxu2 %v681_v2  ;;  %787 = vmatpush.bf16.msra.mxu3 %v681_v2 }
   0xe   :  { %283 = vmatpush.bf16.msra.mxu0 %v680_v3  ;;  %788 = vmatpush.bf16.msra.mxu1 %v680_v3 }
   0xf   :  { %789 = vmatpush.bf16.msra.mxu2 %v680_v3  ;;  %790 = vmatpush.bf16.msra.mxu3 %v680_v3 }
  0x11   :  { %648 = vmatmul.msk.bf16.vlgmr.msra.gmra.mxu0 %vm227_vm0, %v664_v4  ;;  %652 = vmatmul.msk.bf16.vlgmr.msra.gmra.mxu1 %vm227_vm0, %v668_v5 }
  0x12   :  { %656 = vmatmul.msk.bf16.vlgmr.msra.gmra.mxu2 %vm227_vm0, %v672_v6  ;;  %660 = vmatmul.msk.bf16.vlgmr.msra.gmra.mxu3 %vm227_vm0, %v676_v7 }
  0x21   :  { %649 = vmatmul.msk.bf16.gmra.mxu0 %vm227_vm0, %v665_v8  ;;  %653 = vmatmul.msk.bf16.gmra.mxu1 %vm227_vm0, %v669_v9 }
  0x22   :  { %657 = vmatmul.msk.bf16.gmra.mxu2 %vm227_vm0, %v673_v10  ;;  %661 = vmatmul.msk.bf16.gmra.mxu3 %vm227_vm0, %v677_v11 }
  0x31   :  { %650 = vmatmul.msk.bf16.gmra.mxu0 %vm227_vm0, %v666_v12  ;;  %654 = vmatmul.msk.bf16.gmra.mxu1 %vm227_vm0, %v670_v13 }
  0x32   :  { %658 = vmatmul.msk.bf16.gmra.mxu2 %vm227_vm0, %v674_v14  ;;  %662 = vmatmul.msk.bf16.gmra.mxu3 %vm227_vm0, %v678_v15 }
  0x41   :  { %651 = vmatmul.msk.bf16.gmra.mxu0 %vm227_vm0, %v667_v16  ;;  %655 = vmatmul.msk.bf16.gmra.mxu1 %vm227_vm0, %v671_v17 }
  0x42   :  { %659 = vmatmul.msk.bf16.gmra.mxu2 %vm227_vm0, %v675_v18  ;;  %663 = vmatmul.msk.bf16.gmra.mxu3 %vm227_vm0, %v679_v19 }
  0x8e   :  { %v285_v20 = vpop.f32.mrf.mxu0  ;;  %v305_v21 = vpop.f32.mrf.mxu1 }
  0x8f   :  { %v468_v27 = vadd.f32 %v891_v22, %v285_v20  ;;  %v476_v28 = vadd.f32 %v891_v22, %v305_v21 }
  0x95   :  { %v325_v23 = vpop.f32.mrf.mxu2  ;;  %v345_v24 = vpop.f32.mrf.mxu3 }
  0x96   :  { %v287_v25 = vpop.f32.mrf.mxu0  ;;  %v307_v26 = vpop.f32.mrf.mxu1  ;;  %v484_v35 = vadd.f32 %v891_v22, %v325_v23  ;;  %v492_v36 = vadd.f32 %v891_v22, %v345_v24 }
  0x97   :  { %v469_v29 = vadd.f32 %v891_v22, %v287_v25  ;;  %v477_v30 = vadd.f32 %v891_v22, %v307_v26 }
  0x99   :  { %v687_v31 = vpack.c.bf16 %v469_v29, %v468_v27  ;;  %v707_v32 = vpack.c.bf16 %v477_v30, %v476_v28 }
  0x9b   :  { %688 = vst [vmem:[%s976_s3] sm:$0xff] %v687_v31  }
  0x9c   :  { %767 = vst [vmem:[%s976_s3 + $0x20] sm:$0xff] %v707_v32  }
  0x9d   :  { %v327_v33 = vpop.f32.mrf.mxu2  ;;  %v347_v34 = vpop.f32.mrf.mxu3 }
  0x9e   :  { %v485_v37 = vadd.f32 %v891_v22, %v327_v33  ;;  %v493_v38 = vadd.f32 %v891_v22, %v347_v34  ;;  %v290_v39 = vpop.f32.mrf.mxu0  ;;  %v310_v40 = vpop.f32.mrf.mxu1 }
  0x9f   :  { %v470_v47 = vadd.f32 %v891_v22, %v290_v39  ;;  %v478_v48 = vadd.f32 %v891_v22, %v310_v40 }
  0xa0   :  { %v727_v41 = vpack.c.bf16 %v485_v37, %v484_v35  ;;  %v747_v42 = vpack.c.bf16 %v493_v38, %v492_v36 }
  0xa2   :  { %771 = vst [vmem:[%s976_s3 + $0x40] sm:$0xff] %v727_v41  }
  0xa3   :  { %775 = vst [vmem:[%s976_s3 + $0x60] sm:$0xff] %v747_v42  }
  0xa5   :  { %v330_v43 = vpop.f32.mrf.mxu2  ;;  %v350_v44 = vpop.f32.mrf.mxu3 }
  0xa6   :  { %v292_v45 = vpop.f32.mrf.mxu0  ;;  %v312_v46 = vpop.f32.mrf.mxu1  ;;  %v486_v55 = vadd.f32 %v891_v22, %v330_v43  ;;  %v494_v56 = vadd.f32 %v891_v22, %v350_v44 }
  0xa7   :  { %v471_v49 = vadd.f32 %v891_v22, %v292_v45  ;;  %v479_v50 = vadd.f32 %v891_v22, %v312_v46 }
  0xa9   :  { %v692_v51 = vpack.c.bf16 %v471_v49, %v470_v47  ;;  %v712_v52 = vpack.c.bf16 %v479_v50, %v478_v48 }
  0xab   :  { %764 = vst [vmem:[%s976_s3 + $0x8] sm:$0xff] %v692_v51  }
  0xac   :  { %768 = vst [vmem:[%s976_s3 + $0x28] sm:$0xff] %v712_v52  }
  0xad   :  { %v332_v53 = vpop.f32.mrf.mxu2  ;;  %v352_v54 = vpop.f32.mrf.mxu3 }
  0xae   :  { %v487_v57 = vadd.f32 %v891_v22, %v332_v53  ;;  %v495_v58 = vadd.f32 %v891_v22, %v352_v54  ;;  %v295_v59 = vpop.f32.mrf.mxu0  ;;  %v315_v60 = vpop.f32.mrf.mxu1 }
  0xaf   :  { %v472_v3 = vadd.f32 %v891_v22, %v295_v59  ;;  %v480_v4 = vadd.f32 %v891_v22, %v315_v60 }
  0xb0   :  { %v732_v61 = vpack.c.bf16 %v487_v57, %v486_v55  ;;  %v752_v62 = vpack.c.bf16 %v495_v58, %v494_v56 }
  0xb2   :  { %772 = vst [vmem:[%s976_s3 + $0x48] sm:$0xff] %v732_v61  }
  0xb3   :  { %776 = vst [vmem:[%s976_s3 + $0x68] sm:$0xff] %v752_v62  }
  0xb5   :  { %v335_v63 = vpop.f32.mrf.mxu2  ;;  %v355_v0 = vpop.f32.mrf.mxu3 }
  0xb6   :  { %v297_v1 = vpop.f32.mrf.mxu0  ;;  %v317_v2 = vpop.f32.mrf.mxu1  ;;  %v488_v11 = vadd.f32 %v891_v22, %v335_v63  ;;  %v496_v12 = vadd.f32 %v891_v22, %v355_v0 }
  0xb7   :  { %v473_v5 = vadd.f32 %v891_v22, %v297_v1  ;;  %v481_v6 = vadd.f32 %v891_v22, %v317_v2 }
  0xb9   :  { %v697_v7 = vpack.c.bf16 %v473_v5, %v472_v3  ;;  %v717_v8 = vpack.c.bf16 %v481_v6, %v480_v4 }
  0xbb   :  { %765 = vst [vmem:[%s976_s3 + $0x10] sm:$0xff] %v697_v7  }
  0xbc   :  { %769 = vst [vmem:[%s976_s3 + $0x30] sm:$0xff] %v717_v8  }
  0xbd   :  { %v337_v9 = vpop.f32.mrf.mxu2  ;;  %v357_v10 = vpop.f32.mrf.mxu3 }
  0xbe   :  { %v489_v13 = vadd.f32 %v891_v22, %v337_v9  ;;  %v497_v14 = vadd.f32 %v891_v22, %v357_v10  ;;  %v300_v15 = vpop.f32.mrf.mxu0  ;;  %v320_v16 = vpop.f32.mrf.mxu1 }
  0xbf   :  { %v474_v24 = vadd.f32 %v891_v22, %v300_v15  ;;  %v482_v25 = vadd.f32 %v891_v22, %v320_v16 }
  0xc0   :  { %v737_v17 = vpack.c.bf16 %v489_v13, %v488_v11  ;;  %v757_v18 = vpack.c.bf16 %v497_v14, %v496_v12 }
  0xc2   :  { %773 = vst [vmem:[%s976_s3 + $0x50] sm:$0xff] %v737_v17  }
  0xc3   :  { %777 = vst [vmem:[%s976_s3 + $0x70] sm:$0xff] %v757_v18  }
  0xc5   :  { %v340_v19 = vpop.f32.mrf.mxu2  ;;  %v360_v20 = vpop.f32.mrf.mxu3 }
  0xc6   :  { %v302_v21 = vpop.f32.mrf.mxu0  ;;  %v322_v23 = vpop.f32.mrf.mxu1  ;;  %v490_v32 = vadd.f32 %v891_v22, %v340_v19  ;;  %v498_v33 = vadd.f32 %v891_v22, %v360_v20 }
  0xc7   :  { %v475_v26 = vadd.f32 %v891_v22, %v302_v21  ;;  %v483_v27 = vadd.f32 %v891_v22, %v322_v23 }
  0xc9   :  { %v702_v28 = vpack.c.bf16 %v475_v26, %v474_v24  ;;  %v722_v29 = vpack.c.bf16 %v483_v27, %v482_v25 }
  0xcb   :  { %766 = vst [vmem:[%s976_s3 + $0x18] sm:$0xff] %v702_v28  }
  0xcc   :  { %770 = vst [vmem:[%s976_s3 + $0x38] sm:$0xff] %v722_v29  }
  0xcd   :  { %v342_v30 = vpop.f32.mrf.mxu2  ;;  %v362_v31 = vpop.f32.mrf.mxu3 }
  0xce   :  { %v491_v34 = vadd.f32 %v891_v22, %v342_v30  ;;  %v499_v35 = vadd.f32 %v891_v22, %v362_v31 }
  0xd0   :  { %v742_v36 = vpack.c.bf16 %v491_v34, %v490_v32  ;;  %v762_v37 = vpack.c.bf16 %v499_v35, %v498_v33 }
  0xd2   :  { %774 = vst [vmem:[%s976_s3 + $0x58] sm:$0xff] %v742_v36  }
  0xd3   :  { %778 = vst [vmem:[%s976_s3 + $0x78] sm:$0xff] %v762_v37  }

// kernel: layer_forward.13
= control target key start
LH: loop header
LB: loop body
LE: loop exit
PB: predicated region body
PF: predicated region fallthrough
CT: control target
= control target key end

     0   :  { %vm214_vm0 = vcmask 261120   ;;  %s1198_s1 = inlined_call_operand.vmem [shape: bf16[1,32,128], index: 1, kind: input, shape index: {}]   ;;  %s1199_s0 = inlined_call_operand.vmem [shape: bf16[1,256,32], index: 0, kind: input, shape index: {}]   ;;  %s1200_s2 = inlined_call_operand.vmem [shape: f32[1,128], index: 2, kind: input, shape index: {}]   ;;  %s1201_s3 = inlined_call_operand.vmem [shape: bf16[256,128], index: 3, kind: input, shape index: {}]   ;;  %s1202_s4 = inlined_call_operand.vmem [shape: bf16[256,128], index: 4, kind: output, shape index: {}]  }
   0x1   :  { %v788_v0 = vld [vmem:[%s1198_s1 + $0x8] sm:$0xff]  ;;  %v787_v1 = vld [vmem:[%s1198_s1] sm:$0xff]  ;;  %v773_v10 = vld [vmem:[%s1199_s0 + $0x10] sm:$0xff] }
   0x2   :  { %269 = vmatpush.bf16.msra.mxu0 %v788_v0  ;;  %963 = vmatpush.bf16.msra.mxu1 %v788_v0  ;;  %v771_v2 = vld [vmem:[%s1199_s0] sm:$0xff]  ;;  %v772_v6 = vld [vmem:[%s1199_s0 + $0x8] sm:$0xff]  ;;  %v777_v11 = vld [vmem:[%s1199_s0 + $0x30] sm:$0xff] }
   0x3   :  { %964 = vmatpush.bf16.msra.mxu2 %v788_v0  ;;  %965 = vmatpush.bf16.msra.mxu3 %v788_v0  ;;  %v775_v3 = vld [vmem:[%s1199_s0 + $0x20] sm:$0xff]  ;;  %v776_v7 = vld [vmem:[%s1199_s0 + $0x28] sm:$0xff]  ;;  %v781_v12 = vld [vmem:[%s1199_s0 + $0x50] sm:$0xff] }
   0x4   :  { %v779_v4 = vld [vmem:[%s1199_s0 + $0x40] sm:$0xff]  ;;  %v780_v8 = vld [vmem:[%s1199_s0 + $0x48] sm:$0xff]  ;;  %v785_v13 = vld [vmem:[%s1199_s0 + $0x70] sm:$0xff] }
   0x5   :  { %v783_v5 = vld [vmem:[%s1199_s0 + $0x60] sm:$0xff]  ;;  %v784_v9 = vld [vmem:[%s1199_s0 + $0x68] sm:$0xff]  ;;  %v774_v14 = vld [vmem:[%s1199_s0 + $0x18] sm:$0xff] }
   0x6   :  { %270 = vmatpush.bf16.msra.mxu0 %v787_v1  ;;  %966 = vmatpush.bf16.msra.mxu1 %v787_v1  ;;  %v778_v15 = vld [vmem:[%s1199_s0 + $0x38] sm:$0xff]  ;;  %v1068_v20 = vld [vmem:[%s1200_s2] ss:$0 sm:$0xff]  ;;  %v933_v63 = vld [vmem:[%s1201_s3 + $0x8] sm:$0xff]  }
   0x7   :  { %967 = vmatpush.bf16.msra.mxu2 %v787_v1  ;;  %968 = vmatpush.bf16.msra.mxu3 %v787_v1  ;;  %v782_v16 = vld [vmem:[%s1199_s0 + $0x58] sm:$0xff]  ;;  %v790_v21 = vld [vmem:[%s1201_s3] sm:$0xff]   ;;  %v937_v0 = vld [vmem:[%s1201_s3 + $0x28] sm:$0xff]  }
   0x8   :  { %v786_v17 = vld [vmem:[%s1199_s0 + $0x78] sm:$0xff]  ;;  %v936_v22 = vld [vmem:[%s1201_s3 + $0x20] sm:$0xff]   ;;  %v791_v24 = vunpack.c.l.bf16 %v790_v21  ;;  %v792_v29 = vunpack.c.h.bf16 %v790_v21  ;;  %v945_v21 = vld [vmem:[%s1201_s3 + $0x68] sm:$0xff]  }
   0x9   :  { %755 = vmatmul.msk.bf16.vlgmr.msra.gmra.mxu0 %vm214_vm0, %v771_v2  ;;  %759 = vmatmul.msk.bf16.vlgmr.msra.gmra.mxu1 %vm214_vm0, %v775_v3  ;;  %v807_v26 = vunpack.c.l.bf16 %v936_v22  ;;  %v808_v30 = vunpack.c.h.bf16 %v936_v22  ;;  %v940_v35 = vld [vmem:[%s1201_s3 + $0x40] sm:$0xff]  }
   0xa   :  { %763 = vmatmul.msk.bf16.vlgmr.msra.gmra.mxu2 %vm214_vm0, %v779_v4  ;;  %767 = vmatmul.msk.bf16.vlgmr.msra.gmra.mxu3 %vm214_vm0, %v783_v5  ;;  %v944_v36 = vld [vmem:[%s1201_s3 + $0x60] sm:$0xff]   ;;  %v823_v42 = vunpack.c.l.bf16 %v940_v35  ;;  %v824_v49 = vunpack.c.h.bf16 %v940_v35  ;;  %v844_v35 = vunpack.c.h.bf16 %v945_v21 }
   0xb   :  { %v839_v44 = vunpack.c.l.bf16 %v944_v36  ;;  %v840_v50 = vunpack.c.h.bf16 %v944_v36 }
  0x19   :  { %756 = vmatmul.msk.bf16.gmra.mxu0 %vm214_vm0, %v772_v6  ;;  %760 = vmatmul.msk.bf16.gmra.mxu1 %vm214_vm0, %v776_v7  ;;  %v795_v6 = vunpack.c.l.bf16 %v933_v63 }
  0x1a   :  { %764 = vmatmul.msk.bf16.gmra.mxu2 %vm214_vm0, %v780_v8  ;;  %768 = vmatmul.msk.bf16.gmra.mxu3 %vm214_vm0, %v784_v9  ;;  %v811_v8 = vunpack.c.l.bf16 %v937_v0 }
  0x29   :  { %757 = vmatmul.msk.bf16.gmra.mxu0 %vm214_vm0, %v773_v10  ;;  %761 = vmatmul.msk.bf16.gmra.mxu1 %vm214_vm0, %v777_v11 }
  0x2a   :  { %765 = vmatmul.msk.bf16.gmra.mxu2 %vm214_vm0, %v781_v12  ;;  %769 = vmatmul.msk.bf16.gmra.mxu3 %vm214_vm0, %v785_v13  ;;  %v796_v13 = vunpack.c.h.bf16 %v933_v63 }
  0x39   :  { %758 = vmatmul.msk.bf16.gmra.mxu0 %vm214_vm0, %v774_v14  ;;  %762 = vmatmul.msk.bf16.gmra.mxu1 %vm214_vm0, %v778_v15  ;;  %v812_v14 = vunpack.c.h.bf16 %v937_v0 }
  0x3a   :  { %766 = vmatmul.msk.bf16.gmra.mxu2 %vm214_vm0, %v782_v16  ;;  %770 = vmatmul.msk.bf16.gmra.mxu3 %vm214_vm0, %v786_v17 }
  0x86   :  { %v272_v18 = vpop.f32.mrf.mxu0  ;;  %v292_v19 = vpop.f32.mrf.mxu1 }
  0x87   :  { %v455_v23 = vadd.f32 %v1068_v20, %v272_v18  ;;  %v463_v25 = vadd.f32 %v1068_v20, %v292_v19  ;;  %v941_v19 = vld [vmem:[%s1201_s3 + $0x48] sm:$0xff]  }
  0x89   :  { %v551_v33 = vadd.f32 %v791_v24, %v455_v23  ;;  %v559_v34 = vadd.f32 %v807_v26, %v463_v25 }
  0x8b   :  { %v583_v45 = vmax.f32 %v551_v33, 0.0  ;;  %v591_v46 = vmax.f32 %v559_v34, 0.0  ;;  %v828_v34 = vunpack.c.h.bf16 %v941_v19 }
  0x8d   :  { %v312_v27 = vpop.f32.mrf.mxu2  ;;  %v332_v28 = vpop.f32.mrf.mxu3 }
  0x8e   :  { %v274_v31 = vpop.f32.mrf.mxu0  ;;  %v294_v32 = vpop.f32.mrf.mxu1  ;;  %v471_v41 = vadd.f32 %v1068_v20, %v312_v27  ;;  %v479_v43 = vadd.f32 %v1068_v20, %v332_v28  ;;  %v827_v27 = vunpack.c.l.bf16 %v941_v19 }
  0x8f   :  { %v456_v37 = vadd.f32 %v1068_v20, %v274_v31  ;;  %v464_v38 = vadd.f32 %v1068_v20, %v294_v32 }
  0x90   :  { %v567_v55 = vadd.f32 %v823_v42, %v471_v41  ;;  %v575_v56 = vadd.f32 %v839_v44, %v479_v43 }
  0x91   :  { %v552_v39 = vadd.f32 %v792_v29, %v456_v37  ;;  %v560_v40 = vadd.f32 %v808_v30, %v464_v38  ;;  %v843_v29 = vunpack.c.l.bf16 %v945_v21 }
  0x92   :  { %v599_v1 = vmax.f32 %v567_v55, 0.0  ;;  %v607_v2 = vmax.f32 %v575_v56, 0.0 }
  0x93   :  { %v584_v47 = vmax.f32 %v552_v39, 0.0  ;;  %v592_v48 = vmax.f32 %v560_v40, 0.0 }
  0x95   :  { %v856_v51 = vpack.c.bf16 %v584_v47, %v583_v45  ;;  %v876_v52 = vpack.c.bf16 %v592_v48, %v591_v46  ;;  %v314_v53 = vpop.f32.mrf.mxu2  ;;  %v334_v54 = vpop.f32.mrf.mxu3  ;;  %v934_v48 = vld [vmem:[%s1201_s3 + $0x10] sm:$0xff]  }
  0x96   :  { %v472_v57 = vadd.f32 %v1068_v20, %v314_v53  ;;  %v480_v58 = vadd.f32 %v1068_v20, %v334_v54  ;;  %v277_v59 = vpop.f32.mrf.mxu0  ;;  %v297_v60 = vpop.f32.mrf.mxu1  ;;  %v799_v55 = vunpack.c.l.bf16 %v934_v48 }
  0x97   :  { %857 = vst [vmem:[%s1202_s4] sm:$0xff] %v856_v51   ;;  %v457_v5 = vadd.f32 %v1068_v20, %v277_v59  ;;  %v465_v7 = vadd.f32 %v1068_v20, %v297_v60 }
  0x98   :  { %951 = vst [vmem:[%s1202_s4 + $0x20] sm:$0xff] %v876_v52   ;;  %v568_v61 = vadd.f32 %v824_v49, %v472_v57  ;;  %v576_v62 = vadd.f32 %v840_v50, %v480_v58  ;;  %v938_v49 = vld [vmem:[%s1201_s3 + $0x30] sm:$0xff]  }
  0x99   :  { %v553_v17 = vadd.f32 %v795_v6, %v457_v5  ;;  %v561_v18 = vadd.f32 %v811_v8, %v465_v7  ;;  %v815_v57 = vunpack.c.l.bf16 %v938_v49  ;;  %v816_v63 = vunpack.c.h.bf16 %v938_v49  ;;  %v946_v5 = vld [vmem:[%s1201_s3 + $0x70] sm:$0xff]  }
  0x9a   :  { %v600_v3 = vmax.f32 %v568_v61, 0.0  ;;  %v608_v4 = vmax.f32 %v576_v62, 0.0  ;;  %v800_v62 = vunpack.c.h.bf16 %v934_v48  ;;  %v848_v19 = vunpack.c.h.bf16 %v946_v5 }
  0x9b   :  { %v585_v30 = vmax.f32 %v553_v17, 0.0  ;;  %v593_v31 = vmax.f32 %v561_v18, 0.0 }
  0x9c   :  { %v896_v9 = vpack.c.bf16 %v600_v3, %v599_v1  ;;  %v916_v10 = vpack.c.bf16 %v608_v4, %v607_v2  ;;  %v942_v4 = vld [vmem:[%s1201_s3 + $0x50] sm:$0xff]  }
  0x9d   :  { %v317_v11 = vpop.f32.mrf.mxu2  ;;  %v337_v12 = vpop.f32.mrf.mxu3  ;;  %v832_v18 = vunpack.c.h.bf16 %v942_v4 }
  0x9e   :  { %955 = vst [vmem:[%s1202_s4 + $0x40] sm:$0xff] %v896_v9   ;;  %v279_v15 = vpop.f32.mrf.mxu0  ;;  %v299_v16 = vpop.f32.mrf.mxu1  ;;  %v473_v26 = vadd.f32 %v1068_v20, %v317_v11  ;;  %v481_v28 = vadd.f32 %v1068_v20, %v337_v12  ;;  %v831_v11 = vunpack.c.l.bf16 %v942_v4 }
  0x9f   :  { %959 = vst [vmem:[%s1202_s4 + $0x60] sm:$0xff] %v916_v10   ;;  %v458_v22 = vadd.f32 %v1068_v20, %v279_v15  ;;  %v466_v23 = vadd.f32 %v1068_v20, %v299_v16 }
  0xa0   :  { %v569_v40 = vadd.f32 %v827_v27, %v473_v26  ;;  %v577_v41 = vadd.f32 %v843_v29, %v481_v28 }
  0xa1   :  { %v554_v24 = vadd.f32 %v796_v13, %v458_v22  ;;  %v562_v25 = vadd.f32 %v812_v14, %v466_v23  ;;  %v847_v13 = vunpack.c.l.bf16 %v946_v5 }
  0xa2   :  { %v601_v50 = vmax.f32 %v569_v40, 0.0  ;;  %v609_v51 = vmax.f32 %v577_v41, 0.0 }
  0xa3   :  { %v586_v32 = vmax.f32 %v554_v24, 0.0  ;;  %v594_v33 = vmax.f32 %v562_v25, 0.0 }
  0xa5   :  { %v861_v36 = vpack.c.bf16 %v586_v32, %v585_v30  ;;  %v881_v37 = vpack.c.bf16 %v594_v33, %v593_v31  ;;  %v319_v38 = vpop.f32.mrf.mxu2  ;;  %v339_v39 = vpop.f32.mrf.mxu3  ;;  %v935_v33 = vld [vmem:[%s1201_s3 + $0x18] sm:$0xff]  }
  0xa6   :  { %v474_v42 = vadd.f32 %v1068_v20, %v319_v38  ;;  %v482_v43 = vadd.f32 %v1068_v20, %v339_v39  ;;  %v282_v44 = vpop.f32.mrf.mxu0  ;;  %v302_v45 = vpop.f32.mrf.mxu1  ;;  %v803_v40 = vunpack.c.l.bf16 %v935_v33 }
  0xa7   :  { %948 = vst [vmem:[%s1202_s4 + $0x8] sm:$0xff] %v861_v36   ;;  %v459_v54 = vadd.f32 %v1068_v20, %v282_v44  ;;  %v467_v56 = vadd.f32 %v1068_v20, %v302_v45 }
  0xa8   :  { %952 = vst [vmem:[%s1202_s4 + $0x28] sm:$0xff] %v881_v37   ;;  %v570_v46 = vadd.f32 %v828_v34, %v474_v42  ;;  %v578_v47 = vadd.f32 %v844_v35, %v482_v43  ;;  %v939_v34 = vld [vmem:[%s1201_s3 + $0x38] sm:$0xff]  }
  0xa9   :  { %v555_v2 = vadd.f32 %v799_v55, %v459_v54  ;;  %v563_v3 = vadd.f32 %v815_v57, %v467_v56  ;;  %v819_v42 = vunpack.c.l.bf16 %v939_v34  ;;  %v820_v48 = vunpack.c.h.bf16 %v939_v34  ;;  %v947_v54 = vld [vmem:[%s1201_s3 + $0x78] sm:$0xff]  }
  0xaa   :  { %v602_v52 = vmax.f32 %v570_v46, 0.0  ;;  %v610_v53 = vmax.f32 %v578_v47, 0.0  ;;  %v804_v47 = vunpack.c.h.bf16 %v935_v33  ;;  %v852_v4 = vunpack.c.h.bf16 %v947_v54 }
  0xab   :  { %v587_v14 = vmax.f32 %v555_v2, 0.0  ;;  %v595_v15 = vmax.f32 %v563_v3, 0.0 }
  0xac   :  { %v901_v58 = vpack.c.bf16 %v602_v52, %v601_v50  ;;  %v921_v59 = vpack.c.bf16 %v610_v53, %v609_v51  ;;  %v943_v53 = vld [vmem:[%s1201_s3 + $0x58] sm:$0xff]  }
  0xad   :  { %v322_v60 = vpop.f32.mrf.mxu2  ;;  %v342_v61 = vpop.f32.mrf.mxu3  ;;  %v836_v3 = vunpack.c.h.bf16 %v943_v53 }
  0xae   :  { %956 = vst [vmem:[%s1202_s4 + $0x48] sm:$0xff] %v901_v58   ;;  %v284_v0 = vpop.f32.mrf.mxu0  ;;  %v304_v1 = vpop.f32.mrf.mxu1  ;;  %v475_v10 = vadd.f32 %v1068_v20, %v322_v60  ;;  %v483_v12 = vadd.f32 %v1068_v20, %v342_v61  ;;  %v835_v60 = vunpack.c.l.bf16 %v943_v53 }
  0xaf   :  { %960 = vst [vmem:[%s1202_s4 + $0x68] sm:$0xff] %v921_v59   ;;  %v460_v6 = vadd.f32 %v1068_v20, %v284_v0  ;;  %v468_v7 = vadd.f32 %v1068_v20, %v304_v1 }
  0xb0   :  { %v571_v25 = vadd.f32 %v831_v11, %v475_v10  ;;  %v579_v26 = vadd.f32 %v847_v13, %v483_v12 }
  0xb1   :  { %v556_v8 = vadd.f32 %v800_v62, %v460_v6  ;;  %v564_v9 = vadd.f32 %v816_v63, %v468_v7  ;;  %v851_v62 = vunpack.c.l.bf16 %v947_v54 }
  0xb2   :  { %v603_v35 = vmax.f32 %v571_v25, 0.0  ;;  %v611_v36 = vmax.f32 %v579_v26, 0.0 }
  0xb3   :  { %v588_v16 = vmax.f32 %v556_v8, 0.0  ;;  %v596_v17 = vmax.f32 %v564_v9, 0.0 }
  0xb5   :  { %v866_v21 = vpack.c.bf16 %v588_v16, %v587_v14  ;;  %v886_v22 = vpack.c.bf16 %v596_v17, %v595_v15  ;;  %v324_v23 = vpop.f32.mrf.mxu2  ;;  %v344_v24 = vpop.f32.mrf.mxu3 }
  0xb6   :  { %v476_v27 = vadd.f32 %v1068_v20, %v324_v23  ;;  %v484_v28 = vadd.f32 %v1068_v20, %v344_v24  ;;  %v287_v29 = vpop.f32.mrf.mxu0  ;;  %v307_v30 = vpop.f32.mrf.mxu1 }
  0xb7   :  { %949 = vst [vmem:[%s1202_s4 + $0x10] sm:$0xff] %v866_v21   ;;  %v461_v39 = vadd.f32 %v1068_v20, %v287_v29  ;;  %v469_v41 = vadd.f32 %v1068_v20, %v307_v30 }
  0xb8   :  { %953 = vst [vmem:[%s1202_s4 + $0x30] sm:$0xff] %v886_v22   ;;  %v572_v31 = vadd.f32 %v832_v18, %v476_v27  ;;  %v580_v32 = vadd.f32 %v848_v19, %v484_v28 }
  0xb9   :  { %v557_v51 = vadd.f32 %v803_v40, %v461_v39  ;;  %v565_v52 = vadd.f32 %v819_v42, %v469_v41 }
  0xba   :  { %v604_v37 = vmax.f32 %v572_v31, 0.0  ;;  %v612_v38 = vmax.f32 %v580_v32, 0.0 }
  0xbb   :  { %v589_v63 = vmax.f32 %v557_v51, 0.0  ;;  %v597_v0 = vmax.f32 %v565_v52, 0.0 }
  0xbc   :  { %v906_v43 = vpack.c.bf16 %v604_v37, %v603_v35  ;;  %v926_v44 = vpack.c.bf16 %v612_v38, %v611_v36 }
  0xbd   :  { %v327_v45 = vpop.f32.mrf.mxu2  ;;  %v347_v46 = vpop.f32.mrf.mxu3 }
  0xbe   :  { %957 = vst [vmem:[%s1202_s4 + $0x50] sm:$0xff] %v906_v43   ;;  %v289_v49 = vpop.f32.mrf.mxu0  ;;  %v309_v50 = vpop.f32.mrf.mxu1  ;;  %v477_v59 = vadd.f32 %v1068_v20, %v327_v45  ;;  %v485_v61 = vadd.f32 %v1068_v20, %v347_v46 }
  0xbf   :  { %961 = vst [vmem:[%s1202_s4 + $0x70] sm:$0xff] %v926_v44   ;;  %v462_v55 = vadd.f32 %v1068_v20, %v289_v49  ;;  %v470_v56 = vadd.f32 %v1068_v20, %v309_v50 }
  0xc0   :  { %v573_v9 = vadd.f32 %v835_v60, %v477_v59  ;;  %v581_v10 = vadd.f32 %v851_v62, %v485_v61 }
  0xc1   :  { %v558_v57 = vadd.f32 %v804_v47, %v462_v55  ;;  %v566_v58 = vadd.f32 %v820_v48, %v470_v56 }
  0xc2   :  { %v605_v15 = vmax.f32 %v573_v9, 0.0  ;;  %v613_v16 = vmax.f32 %v581_v10, 0.0 }
  0xc3   :  { %v590_v1 = vmax.f32 %v558_v57, 0.0  ;;  %v598_v2 = vmax.f32 %v566_v58, 0.0 }
  0xc5   :  { %v871_v5 = vpack.c.bf16 %v590_v1, %v589_v63  ;;  %v891_v6 = vpack.c.bf16 %v598_v2, %v597_v0  ;;  %v329_v7 = vpop.f32.mrf.mxu2  ;;  %v349_v8 = vpop.f32.mrf.mxu3 }
  0xc6   :  { %v478_v11 = vadd.f32 %v1068_v20, %v329_v7  ;;  %v486_v12 = vadd.f32 %v1068_v20, %v349_v8 }
  0xc7   :  { %950 = vst [vmem:[%s1202_s4 + $0x18] sm:$0xff] %v871_v5  }
  0xc8   :  { %954 = vst [vmem:[%s1202_s4 + $0x38] sm:$0xff] %v891_v6   ;;  %v574_v13 = vadd.f32 %v836_v3, %v478_v11  ;;  %v582_v14 = vadd.f32 %v852_v4, %v486_v12 }
  0xca   :  { %v606_v17 = vmax.f32 %v574_v13, 0.0  ;;  %v614_v18 = vmax.f32 %v582_v14, 0.0 }
  0xcc   :  { %v911_v19 = vpack.c.bf16 %v606_v17, %v605_v15  ;;  %v931_v21 = vpack.c.bf16 %v614_v18, %v613_v16 }
  0xce   :  { %958 = vst [vmem:[%s1202_s4 + $0x58] sm:$0xff] %v911_v19  }
  0xcf   :  { %962 = vst [vmem:[%s1202_s4 + $0x78] sm:$0xff] %v931_v21  }

// kernel: layer_forward.14
= control target key start
LH: loop header
LB: loop body
LE: loop exit
PB: predicated region body
PF: predicated region fallthrough
CT: control target
= control target key end

     0   :  { %vm18_vm0 = vcmask 261120   ;;  %v747_v16 = vmov 0.0   ;;  %vm564_vm1 = vcmask 257024   ;;  %s1069_s1 = inlined_call_operand.vmem [shape: bf16[1,128,32], index: 1, kind: input, shape index: {}]   ;;  %s1070_s2 = inlined_call_operand.vmem [shape: f32[1,32], index: 2, kind: input, shape index: {}]   ;;  %s1071_s0 = inlined_call_operand.vmem [shape: bf16[1,256,128], index: 0, kind: input, shape index: {}]   ;;  %s1072_s3 = inlined_call_operand.vmem [shape: bf16[256,32], index: 3, kind: output, shape index: {}]  }
   0x1   :  { %v720_v0 = vld [vmem:[%s1069_s1 + $0x38] sm:$0xff]  ;;  %v719_v1 = vld [vmem:[%s1069_s1 + $0x30] sm:$0xff]  ;;  %v718_v2 = vld [vmem:[%s1069_s1 + $0x28] sm:$0xff]  ;;  %19 = vst.msk [vmem:[#allocation2] sm:$0xff] %vm18_vm0, %v747_v16 }
   0x2   :  { %275 = vmatpush.bf16.msra.mxu0 %v720_v0  ;;  %721 = vmatpush.bf16.msra.mxu1 %v720_v0  ;;  %v717_v3 = vld [vmem:[%s1069_s1 + $0x20] sm:$0xff]  ;;  %v716_v4 = vld [vmem:[%s1069_s1 + $0x18] sm:$0xff]  ;;  %v715_v5 = vld [vmem:[%s1069_s1 + $0x10] sm:$0xff]  ;;  %20 = vst.msk [vmem:[#allocation2 + $0x8] sm:$0xff] %vm18_vm0, %v747_v16 }
   0x3   :  { %722 = vmatpush.bf16.msra.mxu2 %v720_v0  ;;  %723 = vmatpush.bf16.msra.mxu3 %v720_v0  ;;  %v714_v6 = vld [vmem:[%s1069_s1 + $0x8] sm:$0xff]  ;;  %v713_v7 = vld [vmem:[%s1069_s1] sm:$0xff]  ;;  %21 = vst.msk [vmem:[#allocation2 + $0x10] sm:$0xff] %vm18_vm0, %v747_v16  ;;  %v699_v17 = vld [vmem:[%s1071_s0 + $0x10] sm:$0xff] }
   0x4   :  { %v697_v8 = vld [vmem:[%s1071_s0] sm:$0xff]  ;;  %v698_v12 = vld [vmem:[%s1071_s0 + $0x8] sm:$0xff]  ;;  %22 = vst.msk [vmem:[#allocation2 + $0x18] sm:$0xff] %vm18_vm0, %v747_v16  ;;  %v703_v18 = vld [vmem:[%s1071_s0 + $0x30] sm:$0xff] }
   0x5   :  { %v701_v9 = vld [vmem:[%s1071_s0 + $0x20] sm:$0xff]  ;;  %v702_v13 = vld [vmem:[%s1071_s0 + $0x28] sm:$0xff]  ;;  %23 = vst.msk [vmem:[#allocation2 + $0x20] sm:$0xff] %vm18_vm0, %v747_v16  ;;  %v707_v19 = vld [vmem:[%s1071_s0 + $0x50] sm:$0xff] }
   0x6   :  { %276 = vmatpush.bf16.msra.mxu0 %v719_v1  ;;  %724 = vmatpush.bf16.msra.mxu1 %v719_v1  ;;  %v705_v10 = vld [vmem:[%s1071_s0 + $0x40] sm:$0xff]  ;;  %v706_v14 = vld [vmem:[%s1071_s0 + $0x48] sm:$0xff]  ;;  %24 = vst.msk [vmem:[#allocation2 + $0x28] sm:$0xff] %vm18_vm0, %v747_v16  ;;  %v711_v20 = vld [vmem:[%s1071_s0 + $0x70] sm:$0xff] }
   0x7   :  { %725 = vmatpush.bf16.msra.mxu2 %v719_v1  ;;  %726 = vmatpush.bf16.msra.mxu3 %v719_v1  ;;  %v709_v11 = vld [vmem:[%s1071_s0 + $0x60] sm:$0xff]  ;;  %v710_v15 = vld [vmem:[%s1071_s0 + $0x68] sm:$0xff]  ;;  %25 = vst.msk [vmem:[#allocation2 + $0x30] sm:$0xff] %vm18_vm0, %v747_v16  ;;  %v700_v21 = vld [vmem:[%s1071_s0 + $0x18] sm:$0xff] }
   0x8   :  { %26 = vst.msk [vmem:[#allocation2 + $0x38] sm:$0xff] %vm18_vm0, %v747_v16  ;;  %v704_v22 = vld [vmem:[%s1071_s0 + $0x38] sm:$0xff]  ;;  %v51_v25 = vld [vmem:[#allocation2] sm:$0xff] }
   0x9   :  { %27 = vst.msk [vmem:[#allocation2 + $0x40] sm:$0xff] %vm18_vm0, %v747_v16  ;;  %v708_v23 = vld [vmem:[%s1071_s0 + $0x58] sm:$0xff]  ;;  %v52_v33 = vld [vmem:[#allocation2 + $0x8] sm:$0xff]  ;;  %v877_v35 = vld [vmem:[%s1070_s2] ss:$0 sm:$0xff] }
   0xa   :  { %277 = vmatpush.bf16.msra.mxu0 %v718_v2  ;;  %727 = vmatpush.bf16.msra.mxu1 %v718_v2  ;;  %28 = vst.msk [vmem:[#allocation2 + $0x48] sm:$0xff] %vm18_vm0, %v747_v16  ;;  %v712_v24 = vld [vmem:[%s1071_s0 + $0x78] sm:$0xff]  ;;  %v53_v52 = vld [vmem:[#allocation2 + $0x10] sm:$0xff] }
   0xb   :  { %728 = vmatpush.bf16.msra.mxu2 %v718_v2  ;;  %729 = vmatpush.bf16.msra.mxu3 %v718_v2  ;;  %29 = vst.msk [vmem:[#allocation2 + $0x50] sm:$0xff] %vm18_vm0, %v747_v16 }
   0xc   :  { %30 = vst.msk [vmem:[#allocation2 + $0x58] sm:$0xff] %vm18_vm0, %v747_v16 }
   0xd   :  { %31 = vst.msk [vmem:[#allocation2 + $0x60] sm:$0xff] %vm18_vm0, %v747_v16 }
   0xe   :  { %278 = vmatpush.bf16.msra.mxu0 %v717_v3  ;;  %730 = vmatpush.bf16.msra.mxu1 %v717_v3  ;;  %32 = vst.msk [vmem:[#allocation2 + $0x68] sm:$0xff] %vm18_vm0, %v747_v16 }
   0xf   :  { %731 = vmatpush.bf16.msra.mxu2 %v717_v3  ;;  %732 = vmatpush.bf16.msra.mxu3 %v717_v3  ;;  %33 = vst.msk [vmem:[#allocation2 + $0x70] sm:$0xff] %vm18_vm0, %v747_v16 }
  0x10   :  { %34 = vst.msk [vmem:[#allocation2 + $0x78] sm:$0xff] %vm18_vm0, %v747_v16  ;;  %v59_v26 = vld [vmem:[#allocation2 + $0x40] sm:$0xff] }
  0x11   :  { %35 = vst.msk [vmem:[#allocation2 + $0x80] sm:$0xff] %vm18_vm0, %v747_v16  ;;  %v60_v34 = vld [vmem:[#allocation2 + $0x48] sm:$0xff] }
  0x12   :  { %279 = vmatpush.bf16.msra.mxu0 %v716_v4  ;;  %733 = vmatpush.bf16.msra.mxu1 %v716_v4  ;;  %36 = vst.msk [vmem:[#allocation2 + $0x88] sm:$0xff] %vm18_vm0, %v747_v16  ;;  %v61_v56 = vld [vmem:[#allocation2 + $0x50] sm:$0xff] }
  0x13   :  { %734 = vmatpush.bf16.msra.mxu2 %v716_v4  ;;  %735 = vmatpush.bf16.msra.mxu3 %v716_v4  ;;  %37 = vst.msk [vmem:[#allocation2 + $0x90] sm:$0xff] %vm18_vm0, %v747_v16 }
  0x14   :  { %38 = vst.msk [vmem:[#allocation2 + $0x98] sm:$0xff] %vm18_vm0, %v747_v16 }
  0x15   :  { %39 = vst.msk [vmem:[#allocation2 + $0xa0] sm:$0xff] %vm18_vm0, %v747_v16 }
  0x16   :  { %280 = vmatpush.bf16.msra.mxu0 %v715_v5  ;;  %736 = vmatpush.bf16.msra.mxu1 %v715_v5  ;;  %40 = vst.msk [vmem:[#allocation2 + $0xa8] sm:$0xff] %vm18_vm0, %v747_v16 }
  0x17   :  { %737 = vmatpush.bf16.msra.mxu2 %v715_v5  ;;  %738 = vmatpush.bf16.msra.mxu3 %v715_v5  ;;  %41 = vst.msk [vmem:[#allocation2 + $0xb0] sm:$0xff] %vm18_vm0, %v747_v16 }
  0x18   :  { %42 = vst.msk [vmem:[#allocation2 + $0xb8] sm:$0xff] %vm18_vm0, %v747_v16  ;;  %v67_v31 = vld [vmem:[#allocation2 + $0x80] sm:$0xff] }
  0x19   :  { %43 = vst.msk [vmem:[#allocation2 + $0xc0] sm:$0xff] %vm18_vm0, %v747_v16  ;;  %v68_v49 = vld [vmem:[#allocation2 + $0x88] sm:$0xff] }
  0x1a   :  { %281 = vmatpush.bf16.msra.mxu0 %v714_v6  ;;  %739 = vmatpush.bf16.msra.mxu1 %v714_v6  ;;  %44 = vst.msk [vmem:[#allocation2 + $0xc8] sm:$0xff] %vm18_vm0, %v747_v16 }
  0x1b   :  { %740 = vmatpush.bf16.msra.mxu2 %v714_v6  ;;  %741 = vmatpush.bf16.msra.mxu3 %v714_v6  ;;  %45 = vst.msk [vmem:[#allocation2 + $0xd0] sm:$0xff] %vm18_vm0, %v747_v16 }
  0x1c   :  { %46 = vst.msk [vmem:[#allocation2 + $0xd8] sm:$0xff] %vm18_vm0, %v747_v16 }
  0x1d   :  { %47 = vst.msk [vmem:[#allocation2 + $0xe0] sm:$0xff] %vm18_vm0, %v747_v16 }
  0x1e   :  { %282 = vmatpush.bf16.msra.mxu0 %v713_v7  ;;  %742 = vmatpush.bf16.msra.mxu1 %v713_v7  ;;  %48 = vst.msk [vmem:[#allocation2 + $0xe8] sm:$0xff] %vm18_vm0, %v747_v16 }
  0x1f   :  { %743 = vmatpush.bf16.msra.mxu2 %v713_v7  ;;  %744 = vmatpush.bf16.msra.mxu3 %v713_v7  ;;  %49 = vst.msk [vmem:[#allocation2 + $0xf0] sm:$0xff] %vm18_vm0, %v747_v16 }
  0x20   :  { %50 = vst.msk [vmem:[#allocation2 + $0xf8] sm:$0xff] %vm18_vm0, %v747_v16  ;;  %v75_v32 = vld [vmem:[#allocation2 + $0xc0] sm:$0xff] }
  0x21   :  { %283 = vmatmul.bf16.vlgmr.msra.gmra.mxu0 %v697_v8  ;;  %303 = vmatmul.bf16.vlgmr.msra.gmra.mxu1 %v701_v9  ;;  %v76_v50 = vld [vmem:[#allocation2 + $0xc8] sm:$0xff] }
  0x22   :  { %323 = vmatmul.bf16.vlgmr.msra.gmra.mxu2 %v705_v10  ;;  %343 = vmatmul.bf16.vlgmr.msra.gmra.mxu3 %v709_v11  ;;  %v69_v10 = vld [vmem:[#allocation2 + $0x90] sm:$0xff] }
  0x31   :  { %288 = vmatmul.bf16.gmra.mxu0 %v698_v12  ;;  %308 = vmatmul.bf16.gmra.mxu1 %v702_v13  ;;  %v77_v13 = vld [vmem:[#allocation2 + $0xd0] sm:$0xff] }
  0x32   :  { %328 = vmatmul.bf16.gmra.mxu2 %v706_v14  ;;  %348 = vmatmul.bf16.gmra.mxu3 %v710_v15 }
  0x41   :  { %293 = vmatmul.bf16.gmra.mxu0 %v699_v17  ;;  %313 = vmatmul.bf16.gmra.mxu1 %v703_v18  ;;  %v54_v18 = vld [vmem:[#allocation2 + $0x18] sm:$0xff] }
  0x42   :  { %333 = vmatmul.bf16.gmra.mxu2 %v707_v19  ;;  %353 = vmatmul.bf16.gmra.mxu3 %v711_v20 }
  0x51   :  { %298 = vmatmul.bf16.gmra.mxu0 %v700_v21  ;;  %318 = vmatmul.bf16.gmra.mxu1 %v704_v22  ;;  %v62_v22 = vld [vmem:[#allocation2 + $0x58] sm:$0xff] }
  0x52   :  { %338 = vmatmul.bf16.gmra.mxu2 %v708_v23  ;;  %358 = vmatmul.bf16.gmra.mxu3 %v712_v24 }
  0x9e   :  { %v284_v27 = vpop.f32.mrf.mxu0  ;;  %v304_v28 = vpop.f32.mrf.mxu1 }
  0x9f   :  { %v364_v29 = vadd.f32 %v284_v27, %v51_v25  ;;  %v372_v30 = vadd.f32 %v304_v28, %v59_v26 }
  0xa1   :  { %397 = vst.msk [vmem:[#allocation2] sm:$0xff] %vm18_vm0, %v364_v29 }
  0xa2   :  { %405 = vst.msk [vmem:[#allocation2 + $0x40] sm:$0xff] %vm18_vm0, %v372_v30 }
  0xa5   :  { %v324_v36 = vpop.f32.mrf.mxu2  ;;  %v344_v37 = vpop.f32.mrf.mxu3 }
  0xa6   :  { %v380_v38 = vadd.f32 %v324_v36, %v67_v31  ;;  %v388_v39 = vadd.f32 %v344_v37, %v75_v32  ;;  %v286_v40 = vpop.f32.mrf.mxu0  ;;  %v306_v41 = vpop.f32.mrf.mxu1 }
  0xa7   :  { %v365_v42 = vadd.f32 %v286_v40, %v52_v33  ;;  %v373_v43 = vadd.f32 %v306_v41, %v60_v34 }
  0xa8   :  { %v432_v44 = vld [vmem:[#allocation2] sm:$0xff]  ;;  %413 = vst.msk [vmem:[#allocation2 + $0x80] sm:$0xff] %vm18_vm0, %v380_v38 }
  0xa9   :  { %v468_v45 = vadd.f32 %v877_v35, %v432_v44  ;;  %v440_v46 = vld [vmem:[#allocation2 + $0x40] sm:$0xff]  ;;  %421 = vst.msk [vmem:[#allocation2 + $0xc0] sm:$0xff] %vm18_vm0, %v388_v39  ;;  %v70_v39 = vld [vmem:[#allocation2 + $0x98] sm:$0xff] }
  0xaa   :  { %v476_v47 = vadd.f32 %v877_v35, %v440_v46  ;;  %398 = vst.msk [vmem:[#allocation2 + $0x8] sm:$0xff] %vm18_vm0, %v365_v42 }
  0xab   :  { %v500_v48 = vmax.f32 %v468_v45, 0.0  ;;  %406 = vst.msk [vmem:[#allocation2 + $0x48] sm:$0xff] %vm18_vm0, %v373_v43  ;;  %v78_v43 = vld [vmem:[#allocation2 + $0xd8] sm:$0xff] }
  0xac   :  { %v508_v51 = vmax.f32 %v476_v47, 0.0  ;;  %v55_v47 = vld [vmem:[#allocation2 + $0x20] sm:$0xff] }
  0xad   :  { %v532_v53 = vpack.c.bf16 %v500_v48, %v500_v48  ;;  %v326_v54 = vpop.f32.mrf.mxu2  ;;  %v346_v55 = vpop.f32.mrf.mxu3 }
  0xae   :  { %v540_v57 = vpack.c.bf16 %v508_v51, %v508_v51  ;;  %v381_v58 = vadd.f32 %v326_v54, %v68_v49  ;;  %v389_v59 = vadd.f32 %v346_v55, %v76_v50  ;;  %v289_v60 = vpop.f32.mrf.mxu0  ;;  %v309_v61 = vpop.f32.mrf.mxu1 }
  0xaf   :  { %565 = vst.msk [vmem:[%s1072_s3] sm:$0xf] %vm564_vm1, %v532_v53  ;;  %v448_v62 = vld [vmem:[#allocation2 + $0x80] sm:$0xff]  ;;  %v366_v63 = vadd.f32 %v289_v60, %v53_v52  ;;  %v374_v2 = vadd.f32 %v309_v61, %v61_v56 }
  0xb0   :  { %573 = vst.msk [vmem:[%s1072_s3 + $0x20] sm:$0xf] %vm564_vm1, %v540_v57  ;;  %v484_v0 = vadd.f32 %v877_v35, %v448_v62  ;;  %v456_v1 = vld [vmem:[#allocation2 + $0xc0] sm:$0xff] }
  0xb1   :  { %v492_v3 = vadd.f32 %v877_v35, %v456_v1  ;;  %v433_v4 = vld [vmem:[#allocation2 + $0x8] sm:$0xff]  ;;  %414 = vst.msk [vmem:[#allocation2 + $0x88] sm:$0xff] %vm18_vm0, %v381_v58  ;;  %v63_v52 = vld [vmem:[#allocation2 + $0x60] sm:$0xff] }
  0xb2   :  { %v516_v5 = vmax.f32 %v484_v0, 0.0  ;;  %v469_v6 = vadd.f32 %v877_v35, %v433_v4  ;;  %v441_v7 = vld [vmem:[#allocation2 + $0x48] sm:$0xff]  ;;  %422 = vst.msk [vmem:[#allocation2 + $0xc8] sm:$0xff] %vm18_vm0, %v389_v59 }
  0xb3   :  { %v524_v8 = vmax.f32 %v492_v3, 0.0  ;;  %v477_v9 = vadd.f32 %v877_v35, %v441_v7  ;;  %399 = vst.msk [vmem:[#allocation2 + $0x10] sm:$0xff] %vm18_vm0, %v366_v63  ;;  %v71_v3 = vld [vmem:[#allocation2 + $0xa0] sm:$0xff] }
  0xb4   :  { %v548_v11 = vpack.c.bf16 %v516_v5, %v516_v5  ;;  %v501_v12 = vmax.f32 %v469_v6, 0.0  ;;  %407 = vst.msk [vmem:[#allocation2 + $0x50] sm:$0xff] %vm18_vm0, %v374_v2 }
  0xb5   :  { %v556_v14 = vpack.c.bf16 %v524_v8, %v524_v8  ;;  %v509_v15 = vmax.f32 %v477_v9, 0.0  ;;  %v329_v16 = vpop.f32.mrf.mxu2  ;;  %v349_v17 = vpop.f32.mrf.mxu3  ;;  %v79_v8 = vld [vmem:[#allocation2 + $0xe0] sm:$0xff] }
  0xb6   :  { %581 = vst.msk [vmem:[%s1072_s3 + $0x40] sm:$0xf] %vm564_vm1, %v548_v11  ;;  %v533_v19 = vpack.c.bf16 %v501_v12, %v501_v12  ;;  %v382_v20 = vadd.f32 %v329_v16, %v69_v10  ;;  %v291_v21 = vpop.f32.mrf.mxu0  ;;  %v311_v23 = vpop.f32.mrf.mxu1  ;;  %v390_v25 = vadd.f32 %v349_v17, %v77_v13  ;;  %v56_v13 = vld [vmem:[#allocation2 + $0x28] sm:$0xff] }
  0xb7   :  { %589 = vst.msk [vmem:[%s1072_s3 + $0x60] sm:$0xf] %vm564_vm1, %v556_v14  ;;  %v541_v24 = vpack.c.bf16 %v509_v15, %v509_v15  ;;  %v367_v27 = vadd.f32 %v291_v21, %v54_v18  ;;  %v375_v30 = vadd.f32 %v311_v23, %v62_v22  ;;  %v64_v16 = vld [vmem:[#allocation2 + $0x68] sm:$0xff] }
  0xb8   :  { %566 = vst.msk [vmem:[%s1072_s3 + $0x4] sm:$0xf] %vm564_vm1, %v533_v19  ;;  %v449_v26 = vld [vmem:[#allocation2 + $0x88] sm:$0xff] }
  0xb9   :  { %574 = vst.msk [vmem:[%s1072_s3 + $0x24] sm:$0xf] %vm564_vm1, %v541_v24  ;;  %v485_v28 = vadd.f32 %v877_v35, %v449_v26  ;;  %v457_v29 = vld [vmem:[#allocation2 + $0xc8] sm:$0xff] }
  0xba   :  { %v493_v31 = vadd.f32 %v877_v35, %v457_v29  ;;  %v434_v32 = vld [vmem:[#allocation2 + $0x10] sm:$0xff]  ;;  %415 = vst.msk [vmem:[#allocation2 + $0x90] sm:$0xff] %vm18_vm0, %v382_v20  ;;  %v72_v24 = vld [vmem:[#allocation2 + $0xa8] sm:$0xff] }
  0xbb   :  { %v517_v33 = vmax.f32 %v485_v28, 0.0  ;;  %v470_v34 = vadd.f32 %v877_v35, %v434_v32  ;;  %v442_v36 = vld [vmem:[#allocation2 + $0x50] sm:$0xff]  ;;  %423 = vst.msk [vmem:[#allocation2 + $0xd0] sm:$0xff] %vm18_vm0, %v390_v25 }
  0xbc   :  { %v525_v37 = vmax.f32 %v493_v31, 0.0  ;;  %v478_v38 = vadd.f32 %v877_v35, %v442_v36  ;;  %400 = vst.msk [vmem:[#allocation2 + $0x18] sm:$0xff] %vm18_vm0, %v367_v27  ;;  %v80_v36 = vld [vmem:[#allocation2 + $0xe8] sm:$0xff] }
  0xbd   :  { %v549_v40 = vpack.c.bf16 %v517_v33, %v517_v33  ;;  %v502_v41 = vmax.f32 %v470_v34, 0.0  ;;  %408 = vst.msk [vmem:[#allocation2 + $0x58] sm:$0xff] %vm18_vm0, %v375_v30  ;;  %v331_v42 = vpop.f32.mrf.mxu2  ;;  %v351_v44 = vpop.f32.mrf.mxu3 }
  0xbe   :  { %v557_v45 = vpack.c.bf16 %v525_v37, %v525_v37  ;;  %v510_v46 = vmax.f32 %v478_v38, 0.0  ;;  %v294_v48 = vpop.f32.mrf.mxu0  ;;  %v314_v49 = vpop.f32.mrf.mxu1  ;;  %v383_v51 = vadd.f32 %v331_v42, %v70_v39  ;;  %v391_v54 = vadd.f32 %v351_v44, %v78_v43  ;;  %v65_v44 = vld [vmem:[#allocation2 + $0x70] sm:$0xff] }
  0xbf   :  { %582 = vst.msk [vmem:[%s1072_s3 + $0x44] sm:$0xf] %vm564_vm1, %v549_v40  ;;  %v534_v50 = vpack.c.bf16 %v502_v41, %v502_v41  ;;  %v368_v56 = vadd.f32 %v294_v48, %v55_v47  ;;  %v376_v59 = vadd.f32 %v314_v49, %v63_v52  ;;  %v57_v40 = vld [vmem:[#allocation2 + $0x30] sm:$0xff] }
  0xc0   :  { %590 = vst.msk [vmem:[%s1072_s3 + $0x64] sm:$0xf] %vm564_vm1, %v557_v45  ;;  %v542_v53 = vpack.c.bf16 %v510_v46, %v510_v46  ;;  %v81_v52 = vld [vmem:[#allocation2 + $0xf0] sm:$0xff] }
  0xc1   :  { %567 = vst.msk [vmem:[%s1072_s3 + $0x8] sm:$0xf] %vm564_vm1, %v534_v50  ;;  %v450_v55 = vld [vmem:[#allocation2 + $0x90] sm:$0xff] }
  0xc2   :  { %575 = vst.msk [vmem:[%s1072_s3 + $0x28] sm:$0xf] %vm564_vm1, %v542_v53  ;;  %v486_v57 = vadd.f32 %v877_v35, %v450_v55  ;;  %v458_v58 = vld [vmem:[#allocation2 + $0xd0] sm:$0xff] }
  0xc3   :  { %v494_v60 = vadd.f32 %v877_v35, %v458_v58  ;;  %v435_v61 = vld [vmem:[#allocation2 + $0x18] sm:$0xff]  ;;  %416 = vst.msk [vmem:[#allocation2 + $0x98] sm:$0xff] %vm18_vm0, %v383_v51  ;;  %v73_v51 = vld [vmem:[#allocation2 + $0xb0] sm:$0xff] }
  0xc4   :  { %v518_v62 = vmax.f32 %v486_v57, 0.0  ;;  %v471_v63 = vadd.f32 %v877_v35, %v435_v61  ;;  %v443_v0 = vld [vmem:[#allocation2 + $0x58] sm:$0xff]  ;;  %424 = vst.msk [vmem:[#allocation2 + $0xd8] sm:$0xff] %vm18_vm0, %v391_v54 }
  0xc5   :  { %v526_v1 = vmax.f32 %v494_v60, 0.0  ;;  %v479_v2 = vadd.f32 %v877_v35, %v443_v0  ;;  %401 = vst.msk [vmem:[#allocation2 + $0x20] sm:$0xff] %vm18_vm0, %v368_v56  ;;  %v334_v4 = vpop.f32.mrf.mxu2  ;;  %v354_v5 = vpop.f32.mrf.mxu3 }
  0xc6   :  { %v550_v6 = vpack.c.bf16 %v518_v62, %v518_v62  ;;  %v503_v7 = vmax.f32 %v471_v63, 0.0  ;;  %409 = vst.msk [vmem:[#allocation2 + $0x60] sm:$0xff] %vm18_vm0, %v376_v59  ;;  %v296_v9 = vpop.f32.mrf.mxu0  ;;  %v316_v10 = vpop.f32.mrf.mxu1  ;;  %v384_v15 = vadd.f32 %v334_v4, %v71_v3  ;;  %v392_v18 = vadd.f32 %v354_v5, %v79_v8 }
  0xc7   :  { %v558_v11 = vpack.c.bf16 %v526_v1, %v526_v1  ;;  %v511_v12 = vmax.f32 %v479_v2, 0.0  ;;  %v369_v20 = vadd.f32 %v296_v9, %v56_v13  ;;  %v377_v23 = vadd.f32 %v316_v10, %v64_v16  ;;  %v66_v10 = vld [vmem:[#allocation2 + $0x78] sm:$0xff] }
  0xc8   :  { %583 = vst.msk [vmem:[%s1072_s3 + $0x48] sm:$0xf] %vm564_vm1, %v550_v6  ;;  %v535_v14 = vpack.c.bf16 %v503_v7, %v503_v7  ;;  %v58_v6 = vld [vmem:[#allocation2 + $0x38] sm:$0xff] }
  0xc9   :  { %591 = vst.msk [vmem:[%s1072_s3 + $0x68] sm:$0xf] %vm564_vm1, %v558_v11  ;;  %v543_v17 = vpack.c.bf16 %v511_v12, %v511_v12  ;;  %v74_v16 = vld [vmem:[#allocation2 + $0xb8] sm:$0xff] }
  0xca   :  { %568 = vst.msk [vmem:[%s1072_s3 + $0xc] sm:$0xf] %vm564_vm1, %v535_v14  ;;  %v451_v19 = vld [vmem:[#allocation2 + $0x98] sm:$0xff] }
  0xcb   :  { %576 = vst.msk [vmem:[%s1072_s3 + $0x2c] sm:$0xf] %vm564_vm1, %v543_v17  ;;  %v487_v21 = vadd.f32 %v877_v35, %v451_v19  ;;  %v459_v22 = vld [vmem:[#allocation2 + $0xd8] sm:$0xff] }
  0xcc   :  { %v495_v25 = vadd.f32 %v877_v35, %v459_v22  ;;  %v436_v26 = vld [vmem:[#allocation2 + $0x20] sm:$0xff]  ;;  %417 = vst.msk [vmem:[#allocation2 + $0xa0] sm:$0xff] %vm18_vm0, %v384_v15  ;;  %v82_v17 = vld [vmem:[#allocation2 + $0xf8] sm:$0xff] }
  0xcd   :  { %v519_v27 = vmax.f32 %v487_v21, 0.0  ;;  %v472_v28 = vadd.f32 %v877_v35, %v436_v26  ;;  %v444_v29 = vld [vmem:[#allocation2 + $0x60] sm:$0xff]  ;;  %425 = vst.msk [vmem:[#allocation2 + $0xe0] sm:$0xff] %vm18_vm0, %v392_v18  ;;  %v336_v30 = vpop.f32.mrf.mxu2  ;;  %v356_v31 = vpop.f32.mrf.mxu3 }
  0xce   :  { %v527_v32 = vmax.f32 %v495_v25, 0.0  ;;  %v480_v33 = vadd.f32 %v877_v35, %v444_v29  ;;  %402 = vst.msk [vmem:[#allocation2 + $0x28] sm:$0xff] %vm18_vm0, %v369_v20  ;;  %v385_v34 = vadd.f32 %v336_v30, %v72_v24  ;;  %v299_v37 = vpop.f32.mrf.mxu0  ;;  %v319_v41 = vpop.f32.mrf.mxu1  ;;  %v393_v46 = vadd.f32 %v356_v31, %v80_v36 }
  0xcf   :  { %v551_v38 = vpack.c.bf16 %v519_v27, %v519_v27  ;;  %v504_v39 = vmax.f32 %v472_v28, 0.0  ;;  %410 = vst.msk [vmem:[#allocation2 + $0x68] sm:$0xff] %vm18_vm0, %v377_v23  ;;  %v370_v48 = vadd.f32 %v299_v37, %v57_v40  ;;  %v378_v50 = vadd.f32 %v319_v41, %v65_v44 }
  0xd0   :  { %v559_v42 = vpack.c.bf16 %v527_v32, %v527_v32  ;;  %v512_v43 = vmax.f32 %v480_v33, 0.0  ;;  %418 = vst.msk [vmem:[#allocation2 + $0xa8] sm:$0xff] %vm18_vm0, %v385_v34 }
  0xd1   :  { %584 = vst.msk [vmem:[%s1072_s3 + $0x4c] sm:$0xf] %vm564_vm1, %v551_v38  ;;  %v536_v45 = vpack.c.bf16 %v504_v39, %v504_v39 }
  0xd2   :  { %592 = vst.msk [vmem:[%s1072_s3 + $0x6c] sm:$0xf] %vm564_vm1, %v559_v42  ;;  %v544_v47 = vpack.c.bf16 %v512_v43, %v512_v43 }
  0xd3   :  { %569 = vst.msk [vmem:[%s1072_s3 + $0x10] sm:$0xf] %vm564_vm1, %v536_v45  ;;  %v452_v49 = vld [vmem:[#allocation2 + $0xa0] sm:$0xff] }
  0xd4   :  { %577 = vst.msk [vmem:[%s1072_s3 + $0x30] sm:$0xf] %vm564_vm1, %v544_v47  ;;  %v488_v53 = vadd.f32 %v877_v35, %v452_v49  ;;  %v460_v54 = vld [vmem:[#allocation2 + $0xe0] sm:$0xff] }
  0xd5   :  { %v496_v55 = vadd.f32 %v877_v35, %v460_v54  ;;  %v437_v56 = vld [vmem:[#allocation2 + $0x28] sm:$0xff]  ;;  %426 = vst.msk [vmem:[#allocation2 + $0xe8] sm:$0xff] %vm18_vm0, %v393_v46  ;;  %v339_v57 = vpop.f32.mrf.mxu2  ;;  %v359_v58 = vpop.f32.mrf.mxu3 }
  0xd6   :  { %v520_v59 = vmax.f32 %v488_v53, 0.0  ;;  %v473_v60 = vadd.f32 %v877_v35, %v437_v56  ;;  %v445_v61 = vld [vmem:[#allocation2 + $0x68] sm:$0xff]  ;;  %403 = vst.msk [vmem:[#allocation2 + $0x30] sm:$0xff] %vm18_vm0, %v370_v48  ;;  %v386_v62 = vadd.f32 %v339_v57, %v73_v51  ;;  %v394_v63 = vadd.f32 %v359_v58, %v81_v52  ;;  %v301_v7 = vpop.f32.mrf.mxu0  ;;  %v321_v11 = vpop.f32.mrf.mxu1 }
  0xd7   :  { %v528_v0 = vmax.f32 %v496_v55, 0.0  ;;  %v481_v1 = vadd.f32 %v877_v35, %v445_v61  ;;  %v453_v2 = vld [vmem:[#allocation2 + $0xa8] sm:$0xff]  ;;  %411 = vst.msk [vmem:[#allocation2 + $0x70] sm:$0xff] %vm18_vm0, %v378_v50  ;;  %v371_v15 = vadd.f32 %v301_v7, %v58_v6  ;;  %v379_v20 = vadd.f32 %v321_v11, %v66_v10 }
  0xd8   :  { %v552_v3 = vpack.c.bf16 %v520_v59, %v520_v59  ;;  %v505_v4 = vmax.f32 %v473_v60, 0.0  ;;  %v489_v5 = vadd.f32 %v877_v35, %v453_v2  ;;  %419 = vst.msk [vmem:[#allocation2 + $0xb0] sm:$0xff] %vm18_vm0, %v386_v62 }
  0xd9   :  { %v560_v8 = vpack.c.bf16 %v528_v0, %v528_v0  ;;  %v513_v9 = vmax.f32 %v481_v1, 0.0  ;;  %427 = vst.msk [vmem:[#allocation2 + $0xf0] sm:$0xff] %vm18_vm0, %v394_v63 }
  0xda   :  { %585 = vst.msk [vmem:[%s1072_s3 + $0x50] sm:$0xf] %vm564_vm1, %v552_v3  ;;  %v537_v12 = vpack.c.bf16 %v505_v4, %v505_v4  ;;  %v521_v13 = vmax.f32 %v489_v5, 0.0 }
  0xdb   :  { %593 = vst.msk [vmem:[%s1072_s3 + $0x70] sm:$0xf] %vm564_vm1, %v560_v8  ;;  %v545_v14 = vpack.c.bf16 %v513_v9, %v513_v9 }
  0xdc   :  { %570 = vst.msk [vmem:[%s1072_s3 + $0x14] sm:$0xf] %vm564_vm1, %v537_v12  ;;  %v553_v18 = vpack.c.bf16 %v521_v13, %v521_v13  ;;  %v461_v19 = vld [vmem:[#allocation2 + $0xe8] sm:$0xff] }
  0xdd   :  { %578 = vst.msk [vmem:[%s1072_s3 + $0x34] sm:$0xf] %vm564_vm1, %v545_v14  ;;  %v497_v21 = vadd.f32 %v877_v35, %v461_v19  ;;  %v438_v22 = vld [vmem:[#allocation2 + $0x30] sm:$0xff]  ;;  %v341_v23 = vpop.f32.mrf.mxu2  ;;  %v361_v24 = vpop.f32.mrf.mxu3 }
  0xde   :  { %586 = vst.msk [vmem:[%s1072_s3 + $0x54] sm:$0xf] %vm564_vm1, %v553_v18  ;;  %v474_v25 = vadd.f32 %v877_v35, %v438_v22  ;;  %v446_v26 = vld [vmem:[#allocation2 + $0x70] sm:$0xff]  ;;  %v387_v27 = vadd.f32 %v341_v23, %v74_v16  ;;  %v395_v28 = vadd.f32 %v361_v24, %v82_v17 }
  0xdf   :  { %v529_v29 = vmax.f32 %v497_v21, 0.0  ;;  %v482_v30 = vadd.f32 %v877_v35, %v446_v26  ;;  %v454_v31 = vld [vmem:[#allocation2 + $0xb0] sm:$0xff]  ;;  %404 = vst.msk [vmem:[#allocation2 + $0x38] sm:$0xff] %vm18_vm0, %v371_v15 }
  0xe0   :  { %v506_v32 = vmax.f32 %v474_v25, 0.0  ;;  %v490_v33 = vadd.f32 %v877_v35, %v454_v31  ;;  %v462_v34 = vld [vmem:[#allocation2 + $0xf0] sm:$0xff]  ;;  %412 = vst.msk [vmem:[#allocation2 + $0x78] sm:$0xff] %vm18_vm0, %v379_v20 }
  0xe1   :  { %v561_v36 = vpack.c.bf16 %v529_v29, %v529_v29  ;;  %v514_v37 = vmax.f32 %v482_v30, 0.0  ;;  %v498_v38 = vadd.f32 %v877_v35, %v462_v34  ;;  %420 = vst.msk [vmem:[#allocation2 + $0xb8] sm:$0xff] %vm18_vm0, %v387_v27 }
  0xe2   :  { %v538_v39 = vpack.c.bf16 %v506_v32, %v506_v32  ;;  %v522_v40 = vmax.f32 %v490_v33, 0.0  ;;  %428 = vst.msk [vmem:[#allocation2 + $0xf8] sm:$0xff] %vm18_vm0, %v395_v28 }
  0xe3   :  { %594 = vst.msk [vmem:[%s1072_s3 + $0x74] sm:$0xf] %vm564_vm1, %v561_v36  ;;  %v546_v41 = vpack.c.bf16 %v514_v37, %v514_v37  ;;  %v530_v42 = vmax.f32 %v498_v38, 0.0 }
  0xe4   :  { %571 = vst.msk [vmem:[%s1072_s3 + $0x18] sm:$0xf] %vm564_vm1, %v538_v39  ;;  %v554_v43 = vpack.c.bf16 %v522_v40, %v522_v40 }
  0xe5   :  { %579 = vst.msk [vmem:[%s1072_s3 + $0x38] sm:$0xf] %vm564_vm1, %v546_v41  ;;  %v562_v44 = vpack.c.bf16 %v530_v42, %v530_v42 }
  0xe6   :  { %587 = vst.msk [vmem:[%s1072_s3 + $0x58] sm:$0xf] %vm564_vm1, %v554_v43  ;;  %v439_v45 = vld [vmem:[#allocation2 + $0x38] sm:$0xff] }
  0xe7   :  { %595 = vst.msk [vmem:[%s1072_s3 + $0x78] sm:$0xf] %vm564_vm1, %v562_v44  ;;  %v475_v46 = vadd.f32 %v877_v35, %v439_v45  ;;  %v447_v47 = vld [vmem:[#allocation2 + $0x78] sm:$0xff] }
  0xe8   :  { %v483_v48 = vadd.f32 %v877_v35, %v447_v47  ;;  %v455_v49 = vld [vmem:[#allocation2 + $0xb8] sm:$0xff] }
  0xe9   :  { %v507_v50 = vmax.f32 %v475_v46, 0.0  ;;  %v491_v51 = vadd.f32 %v877_v35, %v455_v49  ;;  %v463_v52 = vld [vmem:[#allocation2 + $0xf8] sm:$0xff] }
  0xea   :  { %v515_v53 = vmax.f32 %v483_v48, 0.0  ;;  %v499_v54 = vadd.f32 %v877_v35, %v463_v52 }
  0xeb   :  { %v539_v55 = vpack.c.bf16 %v507_v50, %v507_v50  ;;  %v523_v56 = vmax.f32 %v491_v51, 0.0 }
  0xec   :  { %v547_v57 = vpack.c.bf16 %v515_v53, %v515_v53  ;;  %v531_v58 = vmax.f32 %v499_v54, 0.0 }
  0xed   :  { %572 = vst.msk [vmem:[%s1072_s3 + $0x1c] sm:$0xf] %vm564_vm1, %v539_v55  ;;  %v555_v59 = vpack.c.bf16 %v523_v56, %v523_v56 }
  0xee   :  { %580 = vst.msk [vmem:[%s1072_s3 + $0x3c] sm:$0xf] %vm564_vm1, %v547_v57  ;;  %v563_v60 = vpack.c.bf16 %v531_v58, %v531_v58 }
  0xef   :  { %588 = vst.msk [vmem:[%s1072_s3 + $0x5c] sm:$0xf] %vm564_vm1, %v555_v59 }
  0xf0   :  { %596 = vst.msk [vmem:[%s1072_s3 + $0x7c] sm:$0xf] %vm564_vm1, %v563_v60 }

// kernel: layer_forward.15
= control target key start
LH: loop header
LB: loop body
LE: loop exit
PB: predicated region body
PF: predicated region fallthrough
CT: control target
= control target key end

     0   :  { %s1141_s12 = smov 0   ;;  %s1143_s13 = smov 0   ;;  %s1447_s0 = inlined_call_operand.vmem [shape: bf16[9,256,32], index: 0, kind: input, shape index: {}]   ;;  %s1448_s1 = inlined_call_operand.vmem [shape: bf16[9,32,72], index: 1, kind: input, shape index: {}]   ;;  %s1449_s2 = inlined_call_operand.vmem [shape: f32[1,72], index: 2, kind: input, shape index: {}]   ;;  %s1450_s3 = inlined_call_operand.vmem [shape: bf16[256,72], index: 3, kind: output, shape index: {}]  }
   0x1   :  { %s1145_s14 = smov 0  }
   0x2 LB: > { %s25_s15 = sadd.s32 1, %s1114_s13  ;;  %p945_p0 = scmp.ge.s32.totalorder %s1118_s14, 1  ;;  %s1118_s14 = sphi %s1145_s14, %s13_s14   ;;  %s1114_s13 = sphi %s1143_s13, %s1452_s13   ;;  %s1110_s12 = sphi %s1141_s12, %s1451_s12  }
   0x3   : > { %p26_p1 = scmp.ge.s32.totalorder %s25_s15, 9  ;;  %p188_p2 = scmp.lt.s32.totalorder %s1118_s14, 10 }
   0x5   : > { %s1454_s15 = smov (%p26_p1, %s25_s15), 0  ;;  %p189_p3 = pnand %p945_p0, %p188_p2 }
   0x6   : > { %p231_p4 = scmp.lt.s32.totalorder (!%p189_p3), %s1110_s12, 8  ;;  %p950_p5 = scmp.ne.s32.totalorder (!%p189_p3), %s1110_s12, 0 }
   0x7   : > { %192 = sbr.rel (%p189_p3) target bundleno = 292 (0x124), region = 32 }
   0xc   : > { %s232_s16 = scalar_select %p231_p4, %s1110_s12, 8 }
   0xd   : > { %264 = sbr.rel (%p950_p5) target bundleno = 51 (0x33), region = 36 }
   0xe   : > { %s1044_s17 = sshll.u32 %s232_s16, 7  ;;  %s1045_s18 = sshll.u32 %s232_s16, 4 }
   0xf   : > { %s1166_s21 = scalar_lea.vmem %s1447_s0, %s1044_s17  ;;  %s1171_s24 = scalar_lea.vmem %s1448_s1, %s1045_s18 }
  0x12   : > { %vm265_vm0 = vcmask 588800   ;;  %v1120_v0 = vmov 0.0  }
  0x13   : > { %266 = vst.msk [vmem:[#allocation2] sm:$0xff] %vm265_vm0, %v1120_v0 }
  0x14   : > { %267 = vst.msk [vmem:[#allocation2 + $0x8] sm:$0xff] %vm265_vm0, %v1120_v0 }
  0x15   : > { %268 = vst.msk [vmem:[#allocation2 + $0x10] sm:$0xff] %vm265_vm0, %v1120_v0 }
  0x16   : > { %269 = vst.msk [vmem:[#allocation2 + $0x18] sm:$0xff] %vm265_vm0, %v1120_v0 }
  0x17   : > { %270 = vst.msk [vmem:[#allocation2 + $0x20] sm:$0xff] %vm265_vm0, %v1120_v0 }
  0x18   : > { %271 = vst.msk [vmem:[#allocation2 + $0x28] sm:$0xff] %vm265_vm0, %v1120_v0 }
  0x19   : > { %272 = vst.msk [vmem:[#allocation2 + $0x30] sm:$0xff] %vm265_vm0, %v1120_v0 }
  0x1a   : > { %273 = vst.msk [vmem:[#allocation2 + $0x38] sm:$0xff] %vm265_vm0, %v1120_v0 }
  0x1b   : > { %274 = vst.msk [vmem:[#allocation2 + $0x40] sm:$0xff] %vm265_vm0, %v1120_v0 }
  0x1c   : > { %275 = vst.msk [vmem:[#allocation2 + $0x48] sm:$0xff] %vm265_vm0, %v1120_v0 }
  0x1d   : > { %276 = vst.msk [vmem:[#allocation2 + $0x50] sm:$0xff] %vm265_vm0, %v1120_v0 }
  0x1e   : > { %277 = vst.msk [vmem:[#allocation2 + $0x58] sm:$0xff] %vm265_vm0, %v1120_v0 }
  0x1f   : > { %278 = vst.msk [vmem:[#allocation2 + $0x60] sm:$0xff] %vm265_vm0, %v1120_v0 }
  0x20   : > { %279 = vst.msk [vmem:[#allocation2 + $0x68] sm:$0xff] %vm265_vm0, %v1120_v0 }
  0x21   : > { %280 = vst.msk [vmem:[#allocation2 + $0x70] sm:$0xff] %vm265_vm0, %v1120_v0 }
  0x22   : > { %281 = vst.msk [vmem:[#allocation2 + $0x78] sm:$0xff] %vm265_vm0, %v1120_v0 }
  0x23   : > { %282 = vst.msk [vmem:[#allocation2 + $0x80] sm:$0xff] %vm265_vm0, %v1120_v0 }
  0x24   : > { %283 = vst.msk [vmem:[#allocation2 + $0x88] sm:$0xff] %vm265_vm0, %v1120_v0 }
  0x25   : > { %284 = vst.msk [vmem:[#allocation2 + $0x90] sm:$0xff] %vm265_vm0, %v1120_v0 }
  0x26   : > { %285 = vst.msk [vmem:[#allocation2 + $0x98] sm:$0xff] %vm265_vm0, %v1120_v0 }
  0x27   : > { %286 = vst.msk [vmem:[#allocation2 + $0xa0] sm:$0xff] %vm265_vm0, %v1120_v0 }
  0x28   : > { %287 = vst.msk [vmem:[#allocation2 + $0xa8] sm:$0xff] %vm265_vm0, %v1120_v0 }
  0x29   : > { %288 = vst.msk [vmem:[#allocation2 + $0xb0] sm:$0xff] %vm265_vm0, %v1120_v0 }
  0x2a   : > { %289 = vst.msk [vmem:[#allocation2 + $0xb8] sm:$0xff] %vm265_vm0, %v1120_v0 }
  0x2b   : > { %290 = vst.msk [vmem:[#allocation2 + $0xc0] sm:$0xff] %vm265_vm0, %v1120_v0 }
  0x2c   : > { %291 = vst.msk [vmem:[#allocation2 + $0xc8] sm:$0xff] %vm265_vm0, %v1120_v0 }
  0x2d   : > { %292 = vst.msk [vmem:[#allocation2 + $0xd0] sm:$0xff] %vm265_vm0, %v1120_v0 }
  0x2e   : > { %293 = vst.msk [vmem:[#allocation2 + $0xd8] sm:$0xff] %vm265_vm0, %v1120_v0 }
  0x2f   : > { %294 = vst.msk [vmem:[#allocation2 + $0xe0] sm:$0xff] %vm265_vm0, %v1120_v0 }
  0x30   : > { %295 = vst.msk [vmem:[#allocation2 + $0xe8] sm:$0xff] %vm265_vm0, %v1120_v0 }
  0x31   : > { %296 = vst.msk [vmem:[#allocation2 + $0xf0] sm:$0xff] %vm265_vm0, %v1120_v0 }
  0x32   : > { %297 = vst.msk [vmem:[#allocation2 + $0xf8] sm:$0xff] %vm265_vm0, %v1120_v0 }
  0x33 PF: > { %v1063_v1 = vld [vmem:[%s1171_s24 + $0x8] sm:$0xff]  ;;  %v1062_v2 = vld [vmem:[%s1171_s24] sm:$0xff]  ;;  %vm458_vm1 = vcmask 261120   ;;  %v1048_v11 = vld [vmem:[%s1166_s21 + $0x10] sm:$0xff]  ;;  %vm628_vm2 = vcmask 588800   ;;  %p1039_p6 = scmp.ne.s32.totalorder %s1110_s12, 8 }
  0x34   : > { %513 = vmatpush.bf16.msra.mxu0 %v1063_v1  ;;  %1064 = vmatpush.bf16.msra.mxu1 %v1063_v1  ;;  %v1046_v3 = vld [vmem:[%s1166_s21] sm:$0xff]  ;;  %v1047_v7 = vld [vmem:[%s1166_s21 + $0x8] sm:$0xff]  ;;  %v1052_v12 = vld [vmem:[%s1166_s21 + $0x30] sm:$0xff] }
  0x35   : > { %1065 = vmatpush.bf16.msra.mxu2 %v1063_v1  ;;  %1066 = vmatpush.bf16.msra.mxu3 %v1063_v1  ;;  %v1050_v4 = vld [vmem:[%s1166_s21 + $0x20] sm:$0xff]  ;;  %v1051_v8 = vld [vmem:[%s1166_s21 + $0x28] sm:$0xff]  ;;  %v1056_v13 = vld [vmem:[%s1166_s21 + $0x50] sm:$0xff] }
  0x36   : > { %v1054_v5 = vld [vmem:[%s1166_s21 + $0x40] sm:$0xff]  ;;  %v1055_v9 = vld [vmem:[%s1166_s21 + $0x48] sm:$0xff]  ;;  %v1060_v14 = vld [vmem:[%s1166_s21 + $0x70] sm:$0xff] }
  0x37   : > { %v1058_v6 = vld [vmem:[%s1166_s21 + $0x60] sm:$0xff]  ;;  %v1059_v10 = vld [vmem:[%s1166_s21 + $0x68] sm:$0xff]  ;;  %v1049_v15 = vld [vmem:[%s1166_s21 + $0x18] sm:$0xff] }
  0x38   : > { %514 = vmatpush.bf16.msra.mxu0 %v1062_v2  ;;  %1067 = vmatpush.bf16.msra.mxu1 %v1062_v2  ;;  %v1053_v16 = vld [vmem:[%s1166_s21 + $0x38] sm:$0xff]  ;;  %v298_v19 = vld [vmem:[#allocation2] sm:$0xff]  ;;  %v299_v27 = vld [vmem:[#allocation2 + $0x8] sm:$0xff] }
  0x39   : > { %1068 = vmatpush.bf16.msra.mxu2 %v1062_v2  ;;  %1069 = vmatpush.bf16.msra.mxu3 %v1062_v2  ;;  %v1057_v17 = vld [vmem:[%s1166_s21 + $0x58] sm:$0xff]  ;;  %v306_v20 = vld [vmem:[#allocation2 + $0x40] sm:$0xff]  ;;  %v307_v28 = vld [vmem:[#allocation2 + $0x48] sm:$0xff] }
  0x3a   : > { %v1061_v18 = vld [vmem:[%s1166_s21 + $0x78] sm:$0xff]  ;;  %v314_v25 = vld [vmem:[#allocation2 + $0x80] sm:$0xff]  ;;  %v315_v37 = vld [vmem:[#allocation2 + $0x88] sm:$0xff] }
  0x3b   : > { %1023 = vmatmul.msk.bf16.vlgmr.msra.gmra.mxu0 %vm458_vm1, %v1046_v3  ;;  %1027 = vmatmul.msk.bf16.vlgmr.msra.gmra.mxu1 %vm458_vm1, %v1050_v4  ;;  %v322_v26 = vld [vmem:[#allocation2 + $0xc0] sm:$0xff]  ;;  %v323_v38 = vld [vmem:[#allocation2 + $0xc8] sm:$0xff]  ;;  %v300_v39 = vld [vmem:[#allocation2 + $0x10] sm:$0xff] }
  0x3c   : > { %1031 = vmatmul.msk.bf16.vlgmr.msra.gmra.mxu2 %vm458_vm1, %v1054_v5  ;;  %1035 = vmatmul.msk.bf16.vlgmr.msra.gmra.mxu3 %vm458_vm1, %v1058_v6  ;;  %v308_v40 = vld [vmem:[#allocation2 + $0x50] sm:$0xff]  ;;  %v301_v51 = vld [vmem:[#allocation2 + $0x18] sm:$0xff]  ;;  %v302_v63 = vld [vmem:[#allocation2 + $0x20] sm:$0xff] }
  0x3d   : > { %v316_v49 = vld [vmem:[#allocation2 + $0x90] sm:$0xff]  ;;  %v309_v52 = vld [vmem:[#allocation2 + $0x58] sm:$0xff]  ;;  %v310_v0 = vld [vmem:[#allocation2 + $0x60] sm:$0xff] }
  0x3e   : > { %v324_v50 = vld [vmem:[#allocation2 + $0xd0] sm:$0xff]  ;;  %v317_v61 = vld [vmem:[#allocation2 + $0x98] sm:$0xff] }
  0x3f   : > { %v325_v62 = vld [vmem:[#allocation2 + $0xd8] sm:$0xff] }
  0x4b   : > { %1024 = vmatmul.msk.bf16.gmra.mxu0 %vm458_vm1, %v1047_v7  ;;  %1028 = vmatmul.msk.bf16.gmra.mxu1 %vm458_vm1, %v1051_v8 }
  0x4c   : > { %1032 = vmatmul.msk.bf16.gmra.mxu2 %vm458_vm1, %v1055_v9  ;;  %1036 = vmatmul.msk.bf16.gmra.mxu3 %vm458_vm1, %v1059_v10  ;;  %v318_v9 = vld [vmem:[#allocation2 + $0xa0] sm:$0xff] }
  0x4d   : > { %v326_v10 = vld [vmem:[#allocation2 + $0xe0] sm:$0xff] }
  0x5b   : > { %1025 = vmatmul.msk.bf16.gmra.mxu0 %vm458_vm1, %v1048_v11  ;;  %1029 = vmatmul.msk.bf16.gmra.mxu1 %vm458_vm1, %v1052_v12  ;;  %v303_v11 = vld [vmem:[#allocation2 + $0x28] sm:$0xff] }
  0x5c   : > { %1033 = vmatmul.msk.bf16.gmra.mxu2 %vm458_vm1, %v1056_v13  ;;  %1037 = vmatmul.msk.bf16.gmra.mxu3 %vm458_vm1, %v1060_v14  ;;  %v311_v12 = vld [vmem:[#allocation2 + $0x68] sm:$0xff] }
  0x6b   : > { %1026 = vmatmul.msk.bf16.gmra.mxu0 %vm458_vm1, %v1049_v15  ;;  %1030 = vmatmul.msk.bf16.gmra.mxu1 %vm458_vm1, %v1053_v16 }
  0x6c   : > { %1034 = vmatmul.msk.bf16.gmra.mxu2 %vm458_vm1, %v1057_v17  ;;  %1038 = vmatmul.msk.bf16.gmra.mxu3 %vm458_vm1, %v1061_v18 }
  0xb8   : > { %v516_v21 = vpop.f32.mrf.mxu0  ;;  %v536_v22 = vpop.f32.mrf.mxu1 }
  0xb9   : > { %v596_v23 = vadd.f32 %v516_v21, %v298_v19  ;;  %v604_v24 = vadd.f32 %v536_v22, %v306_v20  ;;  %v319_v21 = vld [vmem:[#allocation2 + $0xa8] sm:$0xff] }
  0xba   : > { %v327_v22 = vld [vmem:[#allocation2 + $0xe8] sm:$0xff] }
  0xbb   : > { %629 = vst.msk [vmem:[#allocation2] sm:$0xff] %vm628_vm2, %v596_v23  ;;  %v304_v23 = vld [vmem:[#allocation2 + $0x30] sm:$0xff] }
  0xbc   : > { %637 = vst.msk [vmem:[#allocation2 + $0x40] sm:$0xff] %vm628_vm2, %v604_v24  ;;  %v312_v24 = vld [vmem:[#allocation2 + $0x70] sm:$0xff] }
  0xbf   : > { %v556_v29 = vpop.f32.mrf.mxu2  ;;  %v576_v30 = vpop.f32.mrf.mxu3 }
  0xc0   : > { %v612_v31 = vadd.f32 %v556_v29, %v314_v25  ;;  %v620_v32 = vadd.f32 %v576_v30, %v322_v26  ;;  %v518_v33 = vpop.f32.mrf.mxu0  ;;  %v538_v34 = vpop.f32.mrf.mxu1 }
  0xc1   : > { %v597_v35 = vadd.f32 %v518_v33, %v299_v27  ;;  %v605_v36 = vadd.f32 %v538_v34, %v307_v28  ;;  %v320_v33 = vld [vmem:[#allocation2 + $0xb0] sm:$0xff] }
  0xc2   : > { %645 = vst.msk [vmem:[#allocation2 + $0x80] sm:$0xff] %vm628_vm2, %v612_v31  ;;  %v328_v34 = vld [vmem:[#allocation2 + $0xf0] sm:$0xff] }
  0xc3   : > { %653 = vst.msk [vmem:[#allocation2 + $0xc0] sm:$0xff] %vm628_vm2, %v620_v32 }
  0xc4   : > { %630 = vst.msk [vmem:[#allocation2 + $0x8] sm:$0xff] %vm628_vm2, %v597_v35  ;;  %v305_v35 = vld [vmem:[#allocation2 + $0x38] sm:$0xff] }
  0xc5   : > { %638 = vst.msk [vmem:[#allocation2 + $0x48] sm:$0xff] %vm628_vm2, %v605_v36  ;;  %v313_v36 = vld [vmem:[#allocation2 + $0x78] sm:$0xff] }
  0xc7   : > { %v558_v41 = vpop.f32.mrf.mxu2  ;;  %v578_v42 = vpop.f32.mrf.mxu3 }
  0xc8   : > { %v613_v43 = vadd.f32 %v558_v41, %v315_v37  ;;  %v621_v44 = vadd.f32 %v578_v42, %v323_v38  ;;  %v521_v45 = vpop.f32.mrf.mxu0  ;;  %v541_v46 = vpop.f32.mrf.mxu1 }
  0xc9   : > { %v598_v47 = vadd.f32 %v521_v45, %v300_v39  ;;  %v606_v48 = vadd.f32 %v541_v46, %v308_v40  ;;  %v321_v45 = vld [vmem:[#allocation2 + $0xb8] sm:$0xff] }
  0xca   : > { %646 = vst.msk [vmem:[#allocation2 + $0x88] sm:$0xff] %vm628_vm2, %v613_v43  ;;  %v329_v46 = vld [vmem:[#allocation2 + $0xf8] sm:$0xff] }
  0xcb   : > { %654 = vst.msk [vmem:[#allocation2 + $0xc8] sm:$0xff] %vm628_vm2, %v621_v44 }
  0xcc   : > { %631 = vst.msk [vmem:[#allocation2 + $0x10] sm:$0xff] %vm628_vm2, %v598_v47 }
  0xcd   : > { %639 = vst.msk [vmem:[#allocation2 + $0x50] sm:$0xff] %vm628_vm2, %v606_v48 }
  0xcf   : > { %v561_v53 = vpop.f32.mrf.mxu2  ;;  %v581_v54 = vpop.f32.mrf.mxu3 }
  0xd0   : > { %v614_v55 = vadd.f32 %v561_v53, %v316_v49  ;;  %v622_v56 = vadd.f32 %v581_v54, %v324_v50  ;;  %v523_v57 = vpop.f32.mrf.mxu0  ;;  %v543_v58 = vpop.f32.mrf.mxu1 }
  0xd1   : > { %v599_v59 = vadd.f32 %v523_v57, %v301_v51  ;;  %v607_v60 = vadd.f32 %v543_v58, %v309_v52 }
  0xd2   : > { %647 = vst.msk [vmem:[#allocation2 + $0x90] sm:$0xff] %vm628_vm2, %v614_v55 }
  0xd3   : > { %655 = vst.msk [vmem:[#allocation2 + $0xd0] sm:$0xff] %vm628_vm2, %v622_v56 }
  0xd4   : > { %632 = vst.msk [vmem:[#allocation2 + $0x18] sm:$0xff] %vm628_vm2, %v599_v59 }
  0xd5   : > { %640 = vst.msk [vmem:[#allocation2 + $0x58] sm:$0xff] %vm628_vm2, %v607_v60 }
  0xd7   : > { %v563_v1 = vpop.f32.mrf.mxu2  ;;  %v583_v2 = vpop.f32.mrf.mxu3 }
  0xd8   : > { %v615_v3 = vadd.f32 %v563_v1, %v317_v61  ;;  %v623_v4 = vadd.f32 %v583_v2, %v325_v62  ;;  %v526_v5 = vpop.f32.mrf.mxu0  ;;  %v546_v6 = vpop.f32.mrf.mxu1 }
  0xd9   : > { %v600_v7 = vadd.f32 %v526_v5, %v302_v63  ;;  %v608_v8 = vadd.f32 %v546_v6, %v310_v0 }
  0xda   : > { %648 = vst.msk [vmem:[#allocation2 + $0x98] sm:$0xff] %vm628_vm2, %v615_v3 }
  0xdb   : > { %656 = vst.msk [vmem:[#allocation2 + $0xd8] sm:$0xff] %vm628_vm2, %v623_v4 }
  0xdc   : > { %633 = vst.msk [vmem:[#allocation2 + $0x20] sm:$0xff] %vm628_vm2, %v600_v7 }
  0xdd   : > { %641 = vst.msk [vmem:[#allocation2 + $0x60] sm:$0xff] %vm628_vm2, %v608_v8 }
  0xdf   : > { %v566_v13 = vpop.f32.mrf.mxu2  ;;  %v586_v14 = vpop.f32.mrf.mxu3 }
  0xe0   : > { %v616_v15 = vadd.f32 %v566_v13, %v318_v9  ;;  %v624_v16 = vadd.f32 %v586_v14, %v326_v10  ;;  %v528_v17 = vpop.f32.mrf.mxu0  ;;  %v548_v18 = vpop.f32.mrf.mxu1 }
  0xe1   : > { %v601_v19 = vadd.f32 %v528_v17, %v303_v11  ;;  %v609_v20 = vadd.f32 %v548_v18, %v311_v12 }
  0xe2   : > { %649 = vst.msk [vmem:[#allocation2 + $0xa0] sm:$0xff] %vm628_vm2, %v616_v15 }
  0xe3   : > { %657 = vst.msk [vmem:[#allocation2 + $0xe0] sm:$0xff] %vm628_vm2, %v624_v16 }
  0xe4   : > { %634 = vst.msk [vmem:[#allocation2 + $0x28] sm:$0xff] %vm628_vm2, %v601_v19 }
  0xe5   : > { %642 = vst.msk [vmem:[#allocation2 + $0x68] sm:$0xff] %vm628_vm2, %v609_v20 }
  0xe7   : > { %v568_v25 = vpop.f32.mrf.mxu2  ;;  %v588_v26 = vpop.f32.mrf.mxu3 }
  0xe8   : > { %v617_v27 = vadd.f32 %v568_v25, %v319_v21  ;;  %v625_v28 = vadd.f32 %v588_v26, %v327_v22  ;;  %v531_v29 = vpop.f32.mrf.mxu0  ;;  %v551_v30 = vpop.f32.mrf.mxu1 }
  0xe9   : > { %v602_v31 = vadd.f32 %v531_v29, %v304_v23  ;;  %v610_v32 = vadd.f32 %v551_v30, %v312_v24 }
  0xea   : > { %650 = vst.msk [vmem:[#allocation2 + $0xa8] sm:$0xff] %vm628_vm2, %v617_v27 }
  0xeb   : > { %658 = vst.msk [vmem:[#allocation2 + $0xe8] sm:$0xff] %vm628_vm2, %v625_v28 }
  0xec   : > { %635 = vst.msk [vmem:[#allocation2 + $0x30] sm:$0xff] %vm628_vm2, %v602_v31 }
  0xed   : > { %643 = vst.msk [vmem:[#allocation2 + $0x70] sm:$0xff] %vm628_vm2, %v610_v32 }
  0xef   : > { %v571_v37 = vpop.f32.mrf.mxu2  ;;  %v591_v38 = vpop.f32.mrf.mxu3 }
  0xf0   : > { %v618_v39 = vadd.f32 %v571_v37, %v320_v33  ;;  %v626_v40 = vadd.f32 %v591_v38, %v328_v34  ;;  %v533_v41 = vpop.f32.mrf.mxu0  ;;  %v553_v42 = vpop.f32.mrf.mxu1 }
  0xf1   : > { %v603_v43 = vadd.f32 %v533_v41, %v305_v35  ;;  %v611_v44 = vadd.f32 %v553_v42, %v313_v36 }
  0xf2   : > { %651 = vst.msk [vmem:[#allocation2 + $0xb0] sm:$0xff] %vm628_vm2, %v618_v39 }
  0xf3   : > { %659 = vst.msk [vmem:[#allocation2 + $0xf0] sm:$0xff] %vm628_vm2, %v626_v40 }
  0xf4   : > { %636 = vst.msk [vmem:[#allocation2 + $0x38] sm:$0xff] %vm628_vm2, %v603_v43 }
  0xf5   : > { %644 = vst.msk [vmem:[#allocation2 + $0x78] sm:$0xff] %vm628_vm2, %v611_v44 }
  0xf7   : > { %v573_v47 = vpop.f32.mrf.mxu2  ;;  %v593_v48 = vpop.f32.mrf.mxu3  ;;  %664 = sbr.rel (%p1039_p6) target bundleno = 292 (0x124), region = 40 }
  0xf8   : > { %v619_v49 = vadd.f32 %v573_v47, %v321_v45  ;;  %v627_v50 = vadd.f32 %v593_v48, %v329_v46 }
  0xfa   : > { %652 = vst.msk [vmem:[#allocation2 + $0xb8] sm:$0xff] %vm628_vm2, %v619_v49 }
  0xfb   : > { %660 = vst.msk [vmem:[#allocation2 + $0xf8] sm:$0xff] %vm628_vm2, %v627_v50 }
  0xfc   : > { %v665_v51 = vld [vmem:[#allocation2] sm:$0xff]  ;;  %v666_v53 = vld [vmem:[#allocation2 + $0x8] sm:$0xff]  ;;  %v667_v54 = vld [vmem:[#allocation2 + $0x10] sm:$0xff]  ;;  %vm797_vm3 = vcmask 584704  }
  0xfd   : > { %v1276_v52 = vld [vmem:[%s1449_s2] ss:$0 sm:$0xff]  ;;  %v668_v55 = vld [vmem:[#allocation2 + $0x18] sm:$0xff]  ;;  %v670_v61 = vld [vmem:[#allocation2 + $0x28] sm:$0xff] }
  0xfe   : > { %v701_v56 = vadd.f32 %v1276_v52, %v665_v51  ;;  %v702_v57 = vadd.f32 %v1276_v52, %v666_v53  ;;  %v703_v58 = vadd.f32 %v1276_v52, %v667_v54  ;;  %v704_v59 = vadd.f32 %v1276_v52, %v668_v55  ;;  %v669_v60 = vld [vmem:[#allocation2 + $0x20] sm:$0xff]  ;;  %v671_v62 = vld [vmem:[#allocation2 + $0x30] sm:$0xff]  ;;  %v672_v2 = vld [vmem:[#allocation2 + $0x38] sm:$0xff] }
  0xff   : > { %v705_v63 = vadd.f32 %v1276_v52, %v669_v60  ;;  %v706_v0 = vadd.f32 %v1276_v52, %v670_v61  ;;  %v707_v1 = vadd.f32 %v1276_v52, %v671_v62  ;;  %v673_v7 = vld [vmem:[#allocation2 + $0x40] sm:$0xff]  ;;  %v708_v10 = vadd.f32 %v1276_v52, %v672_v2  ;;  %v674_v11 = vld [vmem:[#allocation2 + $0x48] sm:$0xff]  ;;  %v675_v12 = vld [vmem:[#allocation2 + $0x50] sm:$0xff] }
 0x100   : > { %v733_v3 = vmax.f32 %v701_v56, 0.0  ;;  %v734_v4 = vmax.f32 %v702_v57, 0.0  ;;  %v735_v5 = vmax.f32 %v703_v58, 0.0  ;;  %v736_v6 = vmax.f32 %v704_v59, 0.0  ;;  %v676_v13 = vld [vmem:[#allocation2 + $0x58] sm:$0xff]  ;;  %v677_v18 = vld [vmem:[#allocation2 + $0x60] sm:$0xff] }
 0x101   : > { %v737_v8 = vmax.f32 %v705_v63, 0.0  ;;  %v738_v9 = vmax.f32 %v706_v0, 0.0  ;;  %v739_v17 = vmax.f32 %v707_v1, 0.0  ;;  %v678_v19 = vld [vmem:[#allocation2 + $0x68] sm:$0xff]  ;;  %v679_v20 = vld [vmem:[#allocation2 + $0x70] sm:$0xff]  ;;  %v740_v23 = vmax.f32 %v708_v10, 0.0 }
 0x102   : > { %v765_v14 = vpack.c.bf16 %v733_v3, %v733_v3  ;;  %v766_v15 = vpack.c.bf16 %v734_v4, %v734_v4  ;;  %v767_v16 = vpack.c.bf16 %v735_v5, %v735_v5  ;;  %v768_v21 = vpack.c.bf16 %v736_v6, %v736_v6  ;;  %v680_v28 = vld [vmem:[#allocation2 + $0x78] sm:$0xff]  ;;  %v681_v40 = vld [vmem:[#allocation2 + $0x80] sm:$0xff]  ;;  %v682_v41 = vld [vmem:[#allocation2 + $0x88] sm:$0xff] }
 0x103   : > { %v769_v22 = vpack.c.bf16 %v737_v8, %v737_v8  ;;  %v709_v24 = vadd.f32 %v1276_v52, %v673_v7  ;;  %v710_v25 = vadd.f32 %v1276_v52, %v674_v11  ;;  %v711_v26 = vadd.f32 %v1276_v52, %v675_v12  ;;  %v683_v42 = vld [vmem:[#allocation2 + $0x90] sm:$0xff]  ;;  %v684_v45 = vld [vmem:[#allocation2 + $0x98] sm:$0xff]  ;;  %v685_v49 = vld [vmem:[#allocation2 + $0xa0] sm:$0xff] }
 0x104   : > { %798 = vst.msk [vmem:[%s1450_s3] sm:$0xf] %vm797_vm3, %v765_v14  ;;  %v712_v27 = vadd.f32 %v1276_v52, %v676_v13  ;;  %v770_v29 = vpack.c.bf16 %v738_v9, %v738_v9  ;;  %v713_v30 = vadd.f32 %v1276_v52, %v677_v18  ;;  %v714_v31 = vadd.f32 %v1276_v52, %v678_v19  ;;  %v686_v55 = vld [vmem:[#allocation2 + $0xa8] sm:$0xff]  ;;  %v687_v59 = vld [vmem:[#allocation2 + $0xb0] sm:$0xff]  ;;  %v688_v63 = vld [vmem:[#allocation2 + $0xb8] sm:$0xff] }
 0x105   : > { %799 = vst.msk [vmem:[%s1450_s3 + $0x4] sm:$0xf] %vm797_vm3, %v766_v15  ;;  %v715_v32 = vadd.f32 %v1276_v52, %v679_v20  ;;  %v771_v33 = vpack.c.bf16 %v739_v17, %v739_v17  ;;  %v741_v34 = vmax.f32 %v709_v24, 0.0  ;;  %v742_v35 = vmax.f32 %v710_v25, 0.0  ;;  %v689_v3 = vld [vmem:[#allocation2 + $0xc0] sm:$0xff]  ;;  %v690_v7 = vld [vmem:[#allocation2 + $0xc8] sm:$0xff] }
 0x106   : > { %800 = vst.msk [vmem:[%s1450_s3 + $0x8] sm:$0xf] %vm797_vm3, %v767_v16  ;;  %v743_v36 = vmax.f32 %v711_v26, 0.0  ;;  %v772_v37 = vpack.c.bf16 %v740_v23, %v740_v23  ;;  %v744_v38 = vmax.f32 %v712_v27, 0.0  ;;  %v716_v39 = vadd.f32 %v1276_v52, %v680_v28  ;;  %v691_v11 = vld [vmem:[#allocation2 + $0xd0] sm:$0xff]  ;;  %v692_v15 = vld [vmem:[#allocation2 + $0xd8] sm:$0xff] }
 0x107   : > { %801 = vst.msk [vmem:[%s1450_s3 + $0xc] sm:$0xf] %vm797_vm3, %v768_v21  ;;  %v773_v43 = vpack.c.bf16 %v741_v34, %v741_v34  ;;  %v745_v44 = vmax.f32 %v713_v30, 0.0  ;;  %v774_v46 = vpack.c.bf16 %v742_v35, %v742_v35  ;;  %v746_v47 = vmax.f32 %v714_v31, 0.0  ;;  %v693_v19 = vld [vmem:[#allocation2 + $0xe0] sm:$0xff]  ;;  %v694_v23 = vld [vmem:[#allocation2 + $0xe8] sm:$0xff] }
 0x108   : > { %802 = vst.msk [vmem:[%s1450_s3 + $0x10] sm:$0xf] %vm797_vm3, %v769_v22  ;;  %v747_v48 = vmax.f32 %v715_v32, 0.0  ;;  %v775_v50 = vpack.c.bf16 %v743_v36, %v743_v36  ;;  %v717_v51 = vadd.f32 %v1276_v52, %v681_v40  ;;  %v718_v53 = vadd.f32 %v1276_v52, %v682_v41  ;;  %v695_v27 = vld [vmem:[#allocation2 + $0xf0] sm:$0xff]  ;;  %v696_v31 = vld [vmem:[#allocation2 + $0xf8] sm:$0xff] }
 0x109   : > { %803 = vst.msk [vmem:[%s1450_s3 + $0x14] sm:$0xf] %vm797_vm3, %v770_v29  ;;  %v719_v54 = vadd.f32 %v1276_v52, %v683_v42  ;;  %v776_v56 = vpack.c.bf16 %v744_v38, %v744_v38  ;;  %v748_v57 = vmax.f32 %v716_v39, 0.0  ;;  %v720_v58 = vadd.f32 %v1276_v52, %v684_v45 }
 0x10a   : > { %804 = vst.msk [vmem:[%s1450_s3 + $0x18] sm:$0xf] %vm797_vm3, %v771_v33  ;;  %v777_v60 = vpack.c.bf16 %v745_v44, %v745_v44  ;;  %v749_v61 = vmax.f32 %v717_v51, 0.0  ;;  %v721_v62 = vadd.f32 %v1276_v52, %v685_v49  ;;  %v778_v0 = vpack.c.bf16 %v746_v47, %v746_v47 }
 0x10b   : > { %805 = vst.msk [vmem:[%s1450_s3 + $0x1c] sm:$0xf] %vm797_vm3, %v772_v37  ;;  %v750_v1 = vmax.f32 %v718_v53, 0.0  ;;  %v722_v2 = vadd.f32 %v1276_v52, %v686_v55  ;;  %v779_v4 = vpack.c.bf16 %v747_v48, %v747_v48  ;;  %v751_v5 = vmax.f32 %v719_v54, 0.0 }
 0x10c   : > { %806 = vst.msk [vmem:[%s1450_s3 + $0x20] sm:$0xf] %vm797_vm3, %v773_v43  ;;  %v723_v6 = vadd.f32 %v1276_v52, %v687_v59  ;;  %v780_v8 = vpack.c.bf16 %v748_v57, %v748_v57  ;;  %v752_v9 = vmax.f32 %v720_v58, 0.0  ;;  %v724_v10 = vadd.f32 %v1276_v52, %v688_v63 }
 0x10d   : > { %807 = vst.msk [vmem:[%s1450_s3 + $0x24] sm:$0xf] %vm797_vm3, %v774_v46  ;;  %v781_v12 = vpack.c.bf16 %v749_v61, %v749_v61  ;;  %v753_v13 = vmax.f32 %v721_v62, 0.0  ;;  %v725_v14 = vadd.f32 %v1276_v52, %v689_v3  ;;  %v782_v16 = vpack.c.bf16 %v750_v1, %v750_v1 }
 0x10e   : > { %808 = vst.msk [vmem:[%s1450_s3 + $0x28] sm:$0xf] %vm797_vm3, %v775_v50  ;;  %v754_v17 = vmax.f32 %v722_v2, 0.0  ;;  %v726_v18 = vadd.f32 %v1276_v52, %v690_v7  ;;  %v783_v20 = vpack.c.bf16 %v751_v5, %v751_v5  ;;  %v755_v21 = vmax.f32 %v723_v6, 0.0 }
 0x10f   : > { %809 = vst.msk [vmem:[%s1450_s3 + $0x2c] sm:$0xf] %vm797_vm3, %v776_v56  ;;  %v727_v22 = vadd.f32 %v1276_v52, %v691_v11  ;;  %v784_v24 = vpack.c.bf16 %v752_v9, %v752_v9  ;;  %v756_v25 = vmax.f32 %v724_v10, 0.0  ;;  %v728_v26 = vadd.f32 %v1276_v52, %v692_v15 }
 0x110   : > { %810 = vst.msk [vmem:[%s1450_s3 + $0x30] sm:$0xf] %vm797_vm3, %v777_v60  ;;  %v785_v28 = vpack.c.bf16 %v753_v13, %v753_v13  ;;  %v757_v29 = vmax.f32 %v725_v14, 0.0  ;;  %v729_v30 = vadd.f32 %v1276_v52, %v693_v19  ;;  %v786_v32 = vpack.c.bf16 %v754_v17, %v754_v17 }
 0x111   : > { %811 = vst.msk [vmem:[%s1450_s3 + $0x34] sm:$0xf] %vm797_vm3, %v778_v0  ;;  %v758_v33 = vmax.f32 %v726_v18, 0.0  ;;  %v730_v34 = vadd.f32 %v1276_v52, %v694_v23  ;;  %v787_v35 = vpack.c.bf16 %v755_v21, %v755_v21  ;;  %v759_v36 = vmax.f32 %v727_v22, 0.0 }
 0x112   : > { %812 = vst.msk [vmem:[%s1450_s3 + $0x38] sm:$0xf] %vm797_vm3, %v779_v4  ;;  %v731_v37 = vadd.f32 %v1276_v52, %v695_v27  ;;  %v788_v38 = vpack.c.bf16 %v756_v25, %v756_v25  ;;  %v760_v39 = vmax.f32 %v728_v26, 0.0  ;;  %v732_v40 = vadd.f32 %v1276_v52, %v696_v31 }
 0x113   : > { %813 = vst.msk [vmem:[%s1450_s3 + $0x3c] sm:$0xf] %vm797_vm3, %v780_v8  ;;  %v789_v41 = vpack.c.bf16 %v757_v29, %v757_v29  ;;  %v761_v42 = vmax.f32 %v729_v30, 0.0  ;;  %v790_v43 = vpack.c.bf16 %v758_v33, %v758_v33  ;;  %v762_v44 = vmax.f32 %v730_v34, 0.0 }
 0x114   : > { %814 = vst.msk [vmem:[%s1450_s3 + $0x40] sm:$0xf] %vm797_vm3, %v781_v12  ;;  %v791_v52 = vpack.c.bf16 %v759_v36, %v759_v36  ;;  %v763_v45 = vmax.f32 %v731_v37, 0.0  ;;  %v792_v46 = vpack.c.bf16 %v760_v39, %v760_v39  ;;  %v764_v47 = vmax.f32 %v732_v40, 0.0 }
 0x115   : > { %815 = vst.msk [vmem:[%s1450_s3 + $0x44] sm:$0xf] %vm797_vm3, %v782_v16  ;;  %v793_v48 = vpack.c.bf16 %v761_v42, %v761_v42  ;;  %v794_v49 = vpack.c.bf16 %v762_v44, %v762_v44 }
 0x116   : > { %816 = vst.msk [vmem:[%s1450_s3 + $0x48] sm:$0xf] %vm797_vm3, %v783_v20  ;;  %v795_v50 = vpack.c.bf16 %v763_v45, %v763_v45  ;;  %v796_v51 = vpack.c.bf16 %v764_v47, %v764_v47 }
 0x117   : > { %817 = vst.msk [vmem:[%s1450_s3 + $0x4c] sm:$0xf] %vm797_vm3, %v784_v24 }
 0x118   : > { %818 = vst.msk [vmem:[%s1450_s3 + $0x50] sm:$0xf] %vm797_vm3, %v785_v28 }
 0x119   : > { %819 = vst.msk [vmem:[%s1450_s3 + $0x54] sm:$0xf] %vm797_vm3, %v786_v32 }
 0x11a   : > { %820 = vst.msk [vmem:[%s1450_s3 + $0x58] sm:$0xf] %vm797_vm3, %v787_v35 }
 0x11b   : > { %821 = vst.msk [vmem:[%s1450_s3 + $0x5c] sm:$0xf] %vm797_vm3, %v788_v38 }
 0x11c   : > { %822 = vst.msk [vmem:[%s1450_s3 + $0x60] sm:$0xf] %vm797_vm3, %v789_v41 }
 0x11d   : > { %823 = vst.msk [vmem:[%s1450_s3 + $0x64] sm:$0xf] %vm797_vm3, %v790_v43 }
 0x11e   : > { %824 = vst.msk [vmem:[%s1450_s3 + $0x68] sm:$0xf] %vm797_vm3, %v791_v52 }
 0x11f   : > { %825 = vst.msk [vmem:[%s1450_s3 + $0x6c] sm:$0xf] %vm797_vm3, %v792_v46 }
 0x120   : > { %826 = vst.msk [vmem:[%s1450_s3 + $0x70] sm:$0xf] %vm797_vm3, %v793_v48 }
 0x121   : > { %827 = vst.msk [vmem:[%s1450_s3 + $0x74] sm:$0xf] %vm797_vm3, %v794_v49 }
 0x122   : > { %828 = vst.msk [vmem:[%s1450_s3 + $0x78] sm:$0xf] %vm797_vm3, %v795_v50 }
 0x123   : > { %829 = vst.msk [vmem:[%s1450_s3 + $0x7c] sm:$0xf] %vm797_vm3, %v796_v51 }
 0x124 PF: > { %s13_s14 = sadd.s32 1, %s1118_s14   ;;  %s1451_s12 = smov %s1114_s13 }
 0x125   : > { %p10_p7 = scmp.ge.s32.totalorder %s13_s14, 11   ;;  %s1452_s13 = smov %s1454_s15 }
 0x127   :  { %12 = sbr.rel (!%p10_p7) target bundleno = 2 (0x2), region = 76 }

</bundles_post_ra>
